<compile_context>
chip_gen: v7x
topology: tpu7x:2x2x1
jax: 0.10.0
libtpu: 0.0.40
codegen_flags: <defaults>
</compile_context>

<pallas_src>
import jax
import jax.numpy as jnp
from jax.experimental import pallas as pl
from jax.experimental.pallas import tpu as pltpu

_BN_EPS = 1e-5


def _bn_scale_shift(y, p_ref, row, c):
    """Training-mode BatchNorm1d folded to per-channel (scale, shift).

    f32 column sums (VPU/XLU) + two-pass centered variance (biased, like
    PyTorch train-mode BN).  gamma at p_ref[row], beta at p_ref[row+1]
    (first c lanes of the packed per-channel operand).
    """
    r = y.shape[0]
    inv_r = 1.0 / float(r)
    mean = jnp.sum(y, axis=0, keepdims=True) * inv_r            # (1, c) f32
    centered = y - mean
    var = jnp.sum(centered * centered, axis=0, keepdims=True) * inv_r
    gamma = p_ref[row:row + 1, 0:c]
    beta = p_ref[row + 1:row + 2, 0:c]
    scale = gamma * jax.lax.rsqrt(var + _BN_EPS)
    shift = beta - mean * scale
    return scale, shift


def _bn_relu(y, p_ref, row, c):
    scale, shift = _bn_scale_shift(y, p_ref, row, c)
    return jnp.maximum(y * scale + shift, 0.0)


def qstn_kernel(x_ref,
                w1_ref, w2_ref, w3_ref, wf1_ref, wf2_ref, wf3_ref,
                p_ref,
                out_ref):
    B, N, D = x_ref.shape            # NWC input (wrapper did the NCW flip)
    C1 = w1_ref.shape[1]             # 64
    C2 = w2_ref.shape[1]             # 128
    H = w3_ref.shape[1]              # net_size_max
    F1 = wf1_ref.shape[1]            # H // 2
    F2 = wf2_ref.shape[1]            # H // 4

    # (B, N, D) -> (B*N, D): collapses leading dims, layout-preserving (free).
    x2d = x_ref[...].reshape(B * N, D)

    # conv1 (1x1, K=dim=3) on the VPU: three broadcast FMAs.  A K=3 matmul
    # would fill <3% of the MXU contraction depth and is pure latency.
    # (conv bias dropped in prepare_params: cancels under train-mode BN.)
    y = x2d[:, 0:1] * w1_ref[0:1, :]
    for d in range(1, D):
        y = y + x2d[:, d:d + 1] * w1_ref[d:d + 1, :]             # (B*N, 64) f32
    y = _bn_relu(y, p_ref, 0, C1)

    # conv2 (1x1) + bn2 + relu
    y = jnp.dot(y.astype(jnp.bfloat16), w2_ref[...],
                preferred_element_type=jnp.float32)               # (B*N, 128)
    y = _bn_relu(y, p_ref, 2, C2)

    # conv3 (1x1) + bn3 affine, then max-pool over points, then ReLU
    # (ReLU monotone => relu(max) == max(relu); the affine stays pre-pool
    #  because gamma may be negative.)
    y = jnp.dot(y.astype(jnp.bfloat16), w3_ref[...],
                preferred_element_type=jnp.float32)               # (B*N, H)
    scale, shift = _bn_scale_shift(y, p_ref, 4, H)
    y = y * scale + shift
    y = jnp.max(y.reshape(B, N, H), axis=1)                       # (B, H)
    y = jnp.maximum(y, 0.0)

    # fc1 + bn4 + relu   (bn4/bn5 stats over only B rows: faithful to the
    # PyTorch module in train mode, numerically brittle for tiny B by design.)
    y = jnp.dot(y.astype(jnp.bfloat16), wf1_ref[...],
                preferred_element_type=jnp.float32)               # (B, H/2)
    y = _bn_relu(y, p_ref, 6, F1)

    # fc2 + bn5 + relu
    y = jnp.dot(y.astype(jnp.bfloat16), wf2_ref[...],
                preferred_element_type=jnp.float32)               # (B, H/4)
    y = _bn_relu(y, p_ref, 8, F2)

    # fc3 + bias (identity quaternion [1,0,0,0] pre-folded into the bias row)
    y = jnp.dot(y.astype(jnp.bfloat16), wf3_ref[...],
                preferred_element_type=jnp.float32)               # (B, 4)
    q = y + p_ref[10:11, 0:4]                                     # quaternion

    # --- fused batch_quat_to_rotmat epilogue (VPU, data already in VMEM) ---
    qw = q[:, 0:1]
    qx = q[:, 1:2]
    qy = q[:, 2:3]
    qz = q[:, 3:4]
    s = 2.0 / (qw * qw + qx * qx + qy * qy + qz * qz)             # (B, 1)
    r00 = 1.0 - (qy * qy + qz * qz) * s
    r01 = (qx * qy - qz * qw) * s
    r02 = (qx * qz + qy * qw) * s
    r10 = (qx * qy + qz * qw) * s
    r11 = 1.0 - (qx * qx + qz * qz) * s
    r12 = (qy * qz - qx * qw) * s
    r20 = (qx * qz - qy * qw) * s
    r21 = (qy * qz + qx * qw) * s
    r22 = 1.0 - (qx * qx + qy * qy) * s

    # One output slab: lanes [0:9] = rotmat (row-major), lanes [9:13] = quat.
    out_ref[...] = jnp.concatenate(
        [r00, r01, r02, r10, r11, r12, r20, r21, r22, qw, qx, qy, qz], axis=1)


def prepare_params(params):
    """One-time parameter preprocessing (NOT in the per-call path).

    Drops the conv/FC biases that feed straight into train-mode BN (exact
    no-op), casts the MXU weights to bf16 (conv1 stays f32 — it runs on the
    VPU), and packs all tiny per-channel vectors into one (11, H) operand with
    the identity quaternion folded into the fc3 bias row.
    """
    (w1, b1, g1, be1,
     w2, b2, g2, be2,
     w3, b3, g3, be3,
     wf1, bf1, g4, be4,
     wf2, bf2, g5, be5,
     wf3, bf3) = params
    del b1, b2, b3, bf1, bf2   # per-channel bias before train-mode BN cancels

    H = w3.shape[1]

    def row(v):
        v = jnp.asarray(v, jnp.float32).reshape(-1)
        return jnp.pad(v, (0, H - v.shape[0]))

    iden = jnp.array([1.0, 0.0, 0.0, 0.0], jnp.float32)
    pvec = jnp.stack([row(g1), row(be1),
                      row(g2), row(be2),
                      row(g3), row(be3),
                      row(g4), row(be4),
                      row(g5), row(be5),
                      row(bf3.reshape(-1) + iden)])               # (11, H)

    return (jnp.asarray(w1, jnp.float32),                         # VPU conv1
            w2.astype(jnp.bfloat16), w3.astype(jnp.bfloat16),
            wf1.astype(jnp.bfloat16), wf2.astype(jnp.bfloat16),
            wf3.astype(jnp.bfloat16),
            pvec)


@jax.jit
def qstn_forward(x_ncw, prepared):
    """x_ncw: (B, dim, N) float32 (PyTorch NCW).  Returns (rotmat, quat)."""
    w1, w2, w3, wf1, wf2, wf3, pvec = prepared
    B = x_ncw.shape[0]

    # Single layout op per call: NCW -> NWC.
    x_bnd = jnp.transpose(x_ncw, (0, 2, 1))                       # (B, N, dim)

    vmem = pl.BlockSpec(memory_space=pltpu.MemorySpace.VMEM)
    out = pl.pallas_call(
        qstn_kernel,
        out_shape=jax.ShapeDtypeStruct((B, 13), jnp.float32),
        in_specs=[vmem] * 8,
        out_specs=vmem,
        compiler_params=pltpu.CompilerParams(
            # headroom beyond v5e's 16 MiB scoped default; safe on v6e/v7x too
            vmem_limit_bytes=32 * 1024 * 1024),
    )(x_bnd, w1, w2, w3, wf1, wf2, wf3, pvec)

    rot = out[:, 0:9].reshape(B, 3, 3)
    quat = out[:, 9:13]
    return rot, quat


def init_params(key, dim, net_size_max):
    """Deterministic synthetic parameters matching QSTN.__init__ shapes (num_scales=1)."""
    H = net_size_max
    keys = jax.random.split(key, 12)

    def lin(k, fan_in, fan_out):
        lim = 1.0 / jnp.sqrt(jnp.float32(fan_in))
        kw, kb = jax.random.split(k)
        w = jax.random.uniform(kw, (fan_in, fan_out), jnp.float32, -lim, lim)
        b = jax.random.uniform(kb, (1, fan_out), jnp.float32, -lim, lim)
        return w, b

    def bn(k, c):
        kg, kb = jax.random.split(k)
        g = 1.0 + 0.1 * jax.random.uniform(kg, (1, c), jnp.float32, -1.0, 1.0)
        be = 0.1 * jax.random.uniform(kb, (1, c), jnp.float32, -1.0, 1.0)
        return g, be

    w1, b1 = lin(keys[0], dim, 64);          g1, be1 = bn(keys[1], 64)
    w2, b2 = lin(keys[2], 64, 128);          g2, be2 = bn(keys[3], 128)
    w3, b3 = lin(keys[4], 128, H);           g3, be3 = bn(keys[5], H)
    wf1, bf1 = lin(keys[6], H, H // 2);      g4, be4 = bn(keys[7], H // 2)
    wf2, bf2 = lin(keys[8], H // 2, H // 4); g5, be5 = bn(keys[9], H // 4)
    wf3, bf3 = lin(keys[10], H // 4, 4)

    return (w1, b1, g1, be1,
            w2, b2, g2, be2,
            w3, b3, g3, be3,
            wf1, bf1, g4, be4,
            wf2, bf2, g5, be5,
            wf3, bf3)


if __name__ == "__main__":
    # Small shapes consistent with the module: QSTN(net_size_max=256, num_points=128, dim=3)
    B, DIM, NUM_POINTS, NET_SIZE_MAX = 2, 3, 128, 256

    key = jax.random.PRNGKey(0)
    key_params, key_x = jax.random.split(key)

    params = init_params(key_params, DIM, NET_SIZE_MAX)
    prepared = prepare_params(params)          # one-time; NOT in the per-call path
    x = jax.random.normal(key_x, (B, DIM, NUM_POINTS), dtype=jnp.float32)

    rot, quat = qstn_forward(x, prepared)
    jax.block_until_ready((rot, quat))

    assert rot.shape == (B, 3, 3) and quat.shape == (B, 4)
    assert bool(jnp.all(jnp.isfinite(rot))) and bool(jnp.all(jnp.isfinite(quat)))
    print("KERNEL_OK")
</pallas_src>

<mosaic_0001>
module attributes {stable_mosaic.version = 11 : i64} {
  func.func @qstn_kernel(%arg0: memref<2x128x3xf32, #tpu.memory_space<vmem>>, %arg1: memref<3x64xf32, #tpu.memory_space<vmem>>, %arg2: memref<64x128xbf16, #tpu.memory_space<vmem>>, %arg3: memref<128x256xbf16, #tpu.memory_space<vmem>>, %arg4: memref<256x128xbf16, #tpu.memory_space<vmem>>, %arg5: memref<128x64xbf16, #tpu.memory_space<vmem>>, %arg6: memref<64x4xbf16, #tpu.memory_space<vmem>>, %arg7: memref<11x256xf32, #tpu.memory_space<vmem>>, %arg8: memref<2x13xf32, #tpu.memory_space<vmem>>) attributes {dimension_semantics = [], scalar_prefetch = 0 : i64, scratch_operands = 0 : i64, tpu.core_type = #tpu.core_type<tc>} {
    %c0 = arith.constant 0 : index
    %c0_0 = arith.constant 0 : index
    %c0_1 = arith.constant 0 : index
    %0 = vector.load %arg0[%c0, %c0_0, %c0_1] : memref<2x128x3xf32, #tpu.memory_space<vmem>>, vector<2x128x3xf32>
    %1 = vector.shape_cast %0 : vector<2x128x3xf32> to vector<256x3xf32>
    %2 = vector.extract_strided_slice %1 {offsets = [0, 0], sizes = [256, 1], strides = [1, 1]} : vector<256x3xf32> to vector<256x1xf32>
    %c0_2 = arith.constant 0 : index
    %c0_3 = arith.constant 0 : index
    %3 = vector.load %arg1[%c0_2, %c0_3] : memref<3x64xf32, #tpu.memory_space<vmem>>, vector<1x64xf32>
    %4 = vector.broadcast %2 : vector<256x1xf32> to vector<256x64xf32>
    %5 = vector.broadcast %3 : vector<1x64xf32> to vector<256x64xf32>
    %6 = arith.mulf %4, %5 : vector<256x64xf32>
    %7 = vector.extract_strided_slice %1 {offsets = [0, 1], sizes = [256, 1], strides = [1, 1]} : vector<256x3xf32> to vector<256x1xf32>
    %c1 = arith.constant 1 : index
    %c0_4 = arith.constant 0 : index
    %8 = vector.load %arg1[%c1, %c0_4] : memref<3x64xf32, #tpu.memory_space<vmem>>, vector<1x64xf32>
    %9 = vector.broadcast %7 : vector<256x1xf32> to vector<256x64xf32>
    %10 = vector.broadcast %8 : vector<1x64xf32> to vector<256x64xf32>
    %11 = arith.mulf %9, %10 : vector<256x64xf32>
    %12 = arith.addf %6, %11 : vector<256x64xf32>
    %13 = vector.extract_strided_slice %1 {offsets = [0, 2], sizes = [256, 1], strides = [1, 1]} : vector<256x3xf32> to vector<256x1xf32>
    %c2 = arith.constant 2 : index
    %c0_5 = arith.constant 0 : index
    %14 = vector.load %arg1[%c2, %c0_5] : memref<3x64xf32, #tpu.memory_space<vmem>>, vector<1x64xf32>
    %15 = vector.broadcast %13 : vector<256x1xf32> to vector<256x64xf32>
    %16 = vector.broadcast %14 : vector<1x64xf32> to vector<256x64xf32>
    %17 = arith.mulf %15, %16 : vector<256x64xf32>
    %18 = arith.addf %12, %17 : vector<256x64xf32>
    %cst = arith.constant dense<0.000000e+00> : vector<64xf32>
    %19 = vector.multi_reduction <add>, %18, %cst [0] : vector<256x64xf32> to vector<64xf32>
    %20 = vector.shape_cast %19 : vector<64xf32> to vector<1x64xf32>
    %cst_6 = arith.constant 3.906250e-03 : f32
    %21 = vector.broadcast %cst_6 : f32 to vector<1x64xf32>
    %22 = arith.mulf %20, %21 : vector<1x64xf32>
    %23 = vector.broadcast %22 : vector<1x64xf32> to vector<256x64xf32>
    %24 = arith.subf %18, %23 : vector<256x64xf32>
    %25 = arith.mulf %24, %24 : vector<256x64xf32>
    %cst_7 = arith.constant dense<0.000000e+00> : vector<64xf32>
    %26 = vector.multi_reduction <add>, %25, %cst_7 [0] : vector<256x64xf32> to vector<64xf32>
    %27 = vector.shape_cast %26 : vector<64xf32> to vector<1x64xf32>
    %cst_8 = arith.constant 3.906250e-03 : f32
    %28 = vector.broadcast %cst_8 : f32 to vector<1x64xf32>
    %29 = arith.mulf %27, %28 : vector<1x64xf32>
    %c0_9 = arith.constant 0 : index
    %c0_10 = arith.constant 0 : index
    %30 = vector.load %arg7[%c0_9, %c0_10] : memref<11x256xf32, #tpu.memory_space<vmem>>, vector<1x64xf32>
    %c1_11 = arith.constant 1 : index
    %c0_12 = arith.constant 0 : index
    %31 = vector.load %arg7[%c1_11, %c0_12] : memref<11x256xf32, #tpu.memory_space<vmem>>, vector<1x64xf32>
    %cst_13 = arith.constant 9.99999974E-6 : f32
    %32 = vector.broadcast %cst_13 : f32 to vector<1x64xf32>
    %33 = arith.addf %29, %32 : vector<1x64xf32>
    %34 = math.rsqrt %33 : vector<1x64xf32>
    %35 = arith.mulf %30, %34 : vector<1x64xf32>
    %36 = arith.mulf %22, %35 : vector<1x64xf32>
    %37 = arith.subf %31, %36 : vector<1x64xf32>
    %38 = vector.broadcast %35 : vector<1x64xf32> to vector<256x64xf32>
    %39 = arith.mulf %18, %38 : vector<256x64xf32>
    %40 = vector.broadcast %37 : vector<1x64xf32> to vector<256x64xf32>
    %41 = arith.addf %39, %40 : vector<256x64xf32>
    %cst_14 = arith.constant 0.000000e+00 : f32
    %42 = vector.broadcast %cst_14 : f32 to vector<256x64xf32>
    %43 = arith.maximumf %41, %42 : vector<256x64xf32>
    %44 = arith.truncf %43 : vector<256x64xf32> to vector<256x64xbf16>
    %c0_15 = arith.constant 0 : index
    %c0_16 = arith.constant 0 : index
    %45 = vector.load %arg2[%c0_15, %c0_16] : memref<64x128xbf16, #tpu.memory_space<vmem>>, vector<64x128xbf16>
    %cst_17 = arith.constant dense<0.000000e+00> : vector<256x128xf32>
    %46 = tpu.matmul %44, %45, %cst_17 {dimension_numbers = #tpu.dot_dimension_numbers<[1], [0], [0], [1], [0, 0, 1, 1], [], []>} : vector<256x64xbf16>, vector<64x128xbf16>, vector<256x128xf32> -> vector<256x128xf32>
    %cst_18 = arith.constant dense<0.000000e+00> : vector<128xf32>
    %47 = vector.multi_reduction <add>, %46, %cst_18 [0] : vector<256x128xf32> to vector<128xf32>
    %48 = vector.shape_cast %47 : vector<128xf32> to vector<1x128xf32>
    %cst_19 = arith.constant 3.906250e-03 : f32
    %49 = vector.broadcast %cst_19 : f32 to vector<1x128xf32>
    %50 = arith.mulf %48, %49 : vector<1x128xf32>
    %51 = vector.broadcast %50 : vector<1x128xf32> to vector<256x128xf32>
    %52 = arith.subf %46, %51 : vector<256x128xf32>
    %53 = arith.mulf %52, %52 : vector<256x128xf32>
    %cst_20 = arith.constant dense<0.000000e+00> : vector<128xf32>
    %54 = vector.multi_reduction <add>, %53, %cst_20 [0] : vector<256x128xf32> to vector<128xf32>
    %55 = vector.shape_cast %54 : vector<128xf32> to vector<1x128xf32>
    %cst_21 = arith.constant 3.906250e-03 : f32
    %56 = vector.broadcast %cst_21 : f32 to vector<1x128xf32>
    %57 = arith.mulf %55, %56 : vector<1x128xf32>
    %c2_22 = arith.constant 2 : index
    %c0_23 = arith.constant 0 : index
    %58 = vector.load %arg7[%c2_22, %c0_23] : memref<11x256xf32, #tpu.memory_space<vmem>>, vector<1x128xf32>
    %c3 = arith.constant 3 : index
    %c0_24 = arith.constant 0 : index
    %59 = vector.load %arg7[%c3, %c0_24] : memref<11x256xf32, #tpu.memory_space<vmem>>, vector<1x128xf32>
    %cst_25 = arith.constant 9.99999974E-6 : f32
    %60 = vector.broadcast %cst_25 : f32 to vector<1x128xf32>
    %61 = arith.addf %57, %60 : vector<1x128xf32>
    %62 = math.rsqrt %61 : vector<1x128xf32>
    %63 = arith.mulf %58, %62 : vector<1x128xf32>
    %64 = arith.mulf %50, %63 : vector<1x128xf32>
    %65 = arith.subf %59, %64 : vector<1x128xf32>
    %66 = vector.broadcast %63 : vector<1x128xf32> to vector<256x128xf32>
    %67 = arith.mulf %46, %66 : vector<256x128xf32>
    %68 = vector.broadcast %65 : vector<1x128xf32> to vector<256x128xf32>
    %69 = arith.addf %67, %68 : vector<256x128xf32>
    %cst_26 = arith.constant 0.000000e+00 : f32
    %70 = vector.broadcast %cst_26 : f32 to vector<256x128xf32>
    %71 = arith.maximumf %69, %70 : vector<256x128xf32>
    %72 = arith.truncf %71 : vector<256x128xf32> to vector<256x128xbf16>
    %c0_27 = arith.constant 0 : index
    %c0_28 = arith.constant 0 : index
    %73 = vector.load %arg3[%c0_27, %c0_28] : memref<128x256xbf16, #tpu.memory_space<vmem>>, vector<128x256xbf16>
    %cst_29 = arith.constant dense<0.000000e+00> : vector<256x256xf32>
    %74 = tpu.matmul %72, %73, %cst_29 {dimension_numbers = #tpu.dot_dimension_numbers<[1], [0], [0], [1], [0, 0, 1, 1], [], []>} : vector<256x128xbf16>, vector<128x256xbf16>, vector<256x256xf32> -> vector<256x256xf32>
    %cst_30 = arith.constant dense<0.000000e+00> : vector<256xf32>
    %75 = vector.multi_reduction <add>, %74, %cst_30 [0] : vector<256x256xf32> to vector<256xf32>
    %76 = vector.shape_cast %75 : vector<256xf32> to vector<1x256xf32>
    %cst_31 = arith.constant 3.906250e-03 : f32
    %77 = vector.broadcast %cst_31 : f32 to vector<1x256xf32>
    %78 = arith.mulf %76, %77 : vector<1x256xf32>
    %79 = vector.broadcast %78 : vector<1x256xf32> to vector<256x256xf32>
    %80 = arith.subf %74, %79 : vector<256x256xf32>
    %81 = arith.mulf %80, %80 : vector<256x256xf32>
    %cst_32 = arith.constant dense<0.000000e+00> : vector<256xf32>
    %82 = vector.multi_reduction <add>, %81, %cst_32 [0] : vector<256x256xf32> to vector<256xf32>
    %83 = vector.shape_cast %82 : vector<256xf32> to vector<1x256xf32>
    %cst_33 = arith.constant 3.906250e-03 : f32
    %84 = vector.broadcast %cst_33 : f32 to vector<1x256xf32>
    %85 = arith.mulf %83, %84 : vector<1x256xf32>
    %c4 = arith.constant 4 : index
    %c0_34 = arith.constant 0 : index
    %86 = vector.load %arg7[%c4, %c0_34] : memref<11x256xf32, #tpu.memory_space<vmem>>, vector<1x256xf32>
    %c5 = arith.constant 5 : index
    %c0_35 = arith.constant 0 : index
    %87 = vector.load %arg7[%c5, %c0_35] : memref<11x256xf32, #tpu.memory_space<vmem>>, vector<1x256xf32>
    %cst_36 = arith.constant 9.99999974E-6 : f32
    %88 = vector.broadcast %cst_36 : f32 to vector<1x256xf32>
    %89 = arith.addf %85, %88 : vector<1x256xf32>
    %90 = math.rsqrt %89 : vector<1x256xf32>
    %91 = arith.mulf %86, %90 : vector<1x256xf32>
    %92 = arith.mulf %78, %91 : vector<1x256xf32>
    %93 = arith.subf %87, %92 : vector<1x256xf32>
    %94 = vector.broadcast %91 : vector<1x256xf32> to vector<256x256xf32>
    %95 = arith.mulf %74, %94 : vector<256x256xf32>
    %96 = vector.broadcast %93 : vector<1x256xf32> to vector<256x256xf32>
    %97 = arith.addf %95, %96 : vector<256x256xf32>
    %98 = vector.shape_cast %97 : vector<256x256xf32> to vector<2x128x256xf32>
    %cst_37 = arith.constant dense<0xFF800000> : vector<2x256xf32>
    %99 = vector.multi_reduction <maximumf>, %98, %cst_37 [1] : vector<2x128x256xf32> to vector<2x256xf32>
    %cst_38 = arith.constant 0.000000e+00 : f32
    %100 = vector.broadcast %cst_38 : f32 to vector<2x256xf32>
    %101 = arith.maximumf %99, %100 : vector<2x256xf32>
    %102 = arith.truncf %101 : vector<2x256xf32> to vector<2x256xbf16>
    %c0_39 = arith.constant 0 : index
    %c0_40 = arith.constant 0 : index
    %103 = vector.load %arg4[%c0_39, %c0_40] : memref<256x128xbf16, #tpu.memory_space<vmem>>, vector<256x128xbf16>
    %cst_41 = arith.constant dense<0.000000e+00> : vector<2x128xf32>
    %104 = tpu.matmul %102, %103, %cst_41 {dimension_numbers = #tpu.dot_dimension_numbers<[1], [0], [0], [1], [0, 0, 1, 1], [], []>} : vector<2x256xbf16>, vector<256x128xbf16>, vector<2x128xf32> -> vector<2x128xf32>
    %cst_42 = arith.constant dense<0.000000e+00> : vector<128xf32>
    %105 = vector.multi_reduction <add>, %104, %cst_42 [0] : vector<2x128xf32> to vector<128xf32>
    %106 = vector.shape_cast %105 : vector<128xf32> to vector<1x128xf32>
    %cst_43 = arith.constant 5.000000e-01 : f32
    %107 = vector.broadcast %cst_43 : f32 to vector<1x128xf32>
    %108 = arith.mulf %106, %107 : vector<1x128xf32>
    %109 = vector.broadcast %108 : vector<1x128xf32> to vector<2x128xf32>
    %110 = arith.subf %104, %109 : vector<2x128xf32>
    %111 = arith.mulf %110, %110 : vector<2x128xf32>
    %cst_44 = arith.constant dense<0.000000e+00> : vector<128xf32>
    %112 = vector.multi_reduction <add>, %111, %cst_44 [0] : vector<2x128xf32> to vector<128xf32>
    %113 = vector.shape_cast %112 : vector<128xf32> to vector<1x128xf32>
    %cst_45 = arith.constant 5.000000e-01 : f32
    %114 = vector.broadcast %cst_45 : f32 to vector<1x128xf32>
    %115 = arith.mulf %113, %114 : vector<1x128xf32>
    %c6 = arith.constant 6 : index
    %c0_46 = arith.constant 0 : index
    %116 = vector.load %arg7[%c6, %c0_46] : memref<11x256xf32, #tpu.memory_space<vmem>>, vector<1x128xf32>
    %c7 = arith.constant 7 : index
    %c0_47 = arith.constant 0 : index
    %117 = vector.load %arg7[%c7, %c0_47] : memref<11x256xf32, #tpu.memory_space<vmem>>, vector<1x128xf32>
    %cst_48 = arith.constant 9.99999974E-6 : f32
    %118 = vector.broadcast %cst_48 : f32 to vector<1x128xf32>
    %119 = arith.addf %115, %118 : vector<1x128xf32>
    %120 = math.rsqrt %119 : vector<1x128xf32>
    %121 = arith.mulf %116, %120 : vector<1x128xf32>
    %122 = arith.mulf %108, %121 : vector<1x128xf32>
    %123 = arith.subf %117, %122 : vector<1x128xf32>
    %124 = vector.broadcast %121 : vector<1x128xf32> to vector<2x128xf32>
    %125 = arith.mulf %104, %124 : vector<2x128xf32>
    %126 = vector.broadcast %123 : vector<1x128xf32> to vector<2x128xf32>
    %127 = arith.addf %125, %126 : vector<2x128xf32>
    %cst_49 = arith.constant 0.000000e+00 : f32
    %128 = vector.broadcast %cst_49 : f32 to vector<2x128xf32>
    %129 = arith.maximumf %127, %128 : vector<2x128xf32>
    %130 = arith.truncf %129 : vector<2x128xf32> to vector<2x128xbf16>
    %c0_50 = arith.constant 0 : index
    %c0_51 = arith.constant 0 : index
    %131 = vector.load %arg5[%c0_50, %c0_51] : memref<128x64xbf16, #tpu.memory_space<vmem>>, vector<128x64xbf16>
    %cst_52 = arith.constant dense<0.000000e+00> : vector<2x64xf32>
    %132 = tpu.matmul %130, %131, %cst_52 {dimension_numbers = #tpu.dot_dimension_numbers<[1], [0], [0], [1], [0, 0, 1, 1], [], []>} : vector<2x128xbf16>, vector<128x64xbf16>, vector<2x64xf32> -> vector<2x64xf32>
    %cst_53 = arith.constant dense<0.000000e+00> : vector<64xf32>
    %133 = vector.multi_reduction <add>, %132, %cst_53 [0] : vector<2x64xf32> to vector<64xf32>
    %134 = vector.shape_cast %133 : vector<64xf32> to vector<1x64xf32>
    %cst_54 = arith.constant 5.000000e-01 : f32
    %135 = vector.broadcast %cst_54 : f32 to vector<1x64xf32>
    %136 = arith.mulf %134, %135 : vector<1x64xf32>
    %137 = vector.broadcast %136 : vector<1x64xf32> to vector<2x64xf32>
    %138 = arith.subf %132, %137 : vector<2x64xf32>
    %139 = arith.mulf %138, %138 : vector<2x64xf32>
    %cst_55 = arith.constant dense<0.000000e+00> : vector<64xf32>
    %140 = vector.multi_reduction <add>, %139, %cst_55 [0] : vector<2x64xf32> to vector<64xf32>
    %141 = vector.shape_cast %140 : vector<64xf32> to vector<1x64xf32>
    %cst_56 = arith.constant 5.000000e-01 : f32
    %142 = vector.broadcast %cst_56 : f32 to vector<1x64xf32>
    %143 = arith.mulf %141, %142 : vector<1x64xf32>
    %c8 = arith.constant 8 : index
    %c0_57 = arith.constant 0 : index
    %144 = vector.load %arg7[%c8, %c0_57] : memref<11x256xf32, #tpu.memory_space<vmem>>, vector<1x64xf32>
    %c9 = arith.constant 9 : index
    %c0_58 = arith.constant 0 : index
    %145 = vector.load %arg7[%c9, %c0_58] : memref<11x256xf32, #tpu.memory_space<vmem>>, vector<1x64xf32>
    %cst_59 = arith.constant 9.99999974E-6 : f32
    %146 = vector.broadcast %cst_59 : f32 to vector<1x64xf32>
    %147 = arith.addf %143, %146 : vector<1x64xf32>
    %148 = math.rsqrt %147 : vector<1x64xf32>
    %149 = arith.mulf %144, %148 : vector<1x64xf32>
    %150 = arith.mulf %136, %149 : vector<1x64xf32>
    %151 = arith.subf %145, %150 : vector<1x64xf32>
    %152 = vector.broadcast %149 : vector<1x64xf32> to vector<2x64xf32>
    %153 = arith.mulf %132, %152 : vector<2x64xf32>
    %154 = vector.broadcast %151 : vector<1x64xf32> to vector<2x64xf32>
    %155 = arith.addf %153, %154 : vector<2x64xf32>
    %cst_60 = arith.constant 0.000000e+00 : f32
    %156 = vector.broadcast %cst_60 : f32 to vector<2x64xf32>
    %157 = arith.maximumf %155, %156 : vector<2x64xf32>
    %158 = arith.truncf %157 : vector<2x64xf32> to vector<2x64xbf16>
    %c0_61 = arith.constant 0 : index
    %c0_62 = arith.constant 0 : index
    %159 = vector.load %arg6[%c0_61, %c0_62] : memref<64x4xbf16, #tpu.memory_space<vmem>>, vector<64x4xbf16>
    %cst_63 = arith.constant dense<0.000000e+00> : vector<2x4xf32>
    %160 = tpu.matmul %158, %159, %cst_63 {dimension_numbers = #tpu.dot_dimension_numbers<[1], [0], [0], [1], [0, 0, 1, 1], [], []>} : vector<2x64xbf16>, vector<64x4xbf16>, vector<2x4xf32> -> vector<2x4xf32>
    %c10 = arith.constant 10 : index
    %c0_64 = arith.constant 0 : index
    %161 = vector.load %arg7[%c10, %c0_64] : memref<11x256xf32, #tpu.memory_space<vmem>>, vector<1x4xf32>
    %162 = vector.broadcast %161 : vector<1x4xf32> to vector<2x4xf32>
    %163 = arith.addf %160, %162 : vector<2x4xf32>
    %164 = vector.extract_strided_slice %163 {offsets = [0, 0], sizes = [2, 1], strides = [1, 1]} : vector<2x4xf32> to vector<2x1xf32>
    %165 = vector.extract_strided_slice %163 {offsets = [0, 1], sizes = [2, 1], strides = [1, 1]} : vector<2x4xf32> to vector<2x1xf32>
    %166 = vector.extract_strided_slice %163 {offsets = [0, 2], sizes = [2, 1], strides = [1, 1]} : vector<2x4xf32> to vector<2x1xf32>
    %167 = vector.extract_strided_slice %163 {offsets = [0, 3], sizes = [2, 1], strides = [1, 1]} : vector<2x4xf32> to vector<2x1xf32>
    %168 = arith.mulf %164, %164 : vector<2x1xf32>
    %169 = arith.mulf %165, %165 : vector<2x1xf32>
    %170 = arith.addf %168, %169 : vector<2x1xf32>
    %171 = arith.mulf %166, %166 : vector<2x1xf32>
    %172 = arith.addf %170, %171 : vector<2x1xf32>
    %173 = arith.mulf %167, %167 : vector<2x1xf32>
    %174 = arith.addf %172, %173 : vector<2x1xf32>
    %cst_65 = arith.constant 2.000000e+00 : f32
    %175 = vector.broadcast %cst_65 : f32 to vector<2x1xf32>
    %176 = arith.divf %175, %174 : vector<2x1xf32>
    %177 = arith.mulf %166, %166 : vector<2x1xf32>
    %178 = arith.mulf %167, %167 : vector<2x1xf32>
    %179 = arith.addf %177, %178 : vector<2x1xf32>
    %180 = arith.mulf %179, %176 : vector<2x1xf32>
    %cst_66 = arith.constant 1.000000e+00 : f32
    %181 = vector.broadcast %cst_66 : f32 to vector<2x1xf32>
    %182 = arith.subf %181, %180 : vector<2x1xf32>
    %183 = arith.mulf %165, %166 : vector<2x1xf32>
    %184 = arith.mulf %167, %164 : vector<2x1xf32>
    %185 = arith.subf %183, %184 : vector<2x1xf32>
    %186 = arith.mulf %185, %176 : vector<2x1xf32>
    %187 = arith.mulf %165, %167 : vector<2x1xf32>
    %188 = arith.mulf %166, %164 : vector<2x1xf32>
    %189 = arith.addf %187, %188 : vector<2x1xf32>
    %190 = arith.mulf %189, %176 : vector<2x1xf32>
    %191 = arith.mulf %165, %166 : vector<2x1xf32>
    %192 = arith.mulf %167, %164 : vector<2x1xf32>
    %193 = arith.addf %191, %192 : vector<2x1xf32>
    %194 = arith.mulf %193, %176 : vector<2x1xf32>
    %195 = arith.mulf %165, %165 : vector<2x1xf32>
    %196 = arith.mulf %167, %167 : vector<2x1xf32>
    %197 = arith.addf %195, %196 : vector<2x1xf32>
    %198 = arith.mulf %197, %176 : vector<2x1xf32>
    %cst_67 = arith.constant 1.000000e+00 : f32
    %199 = vector.broadcast %cst_67 : f32 to vector<2x1xf32>
    %200 = arith.subf %199, %198 : vector<2x1xf32>
    %201 = arith.mulf %166, %167 : vector<2x1xf32>
    %202 = arith.mulf %165, %164 : vector<2x1xf32>
    %203 = arith.subf %201, %202 : vector<2x1xf32>
    %204 = arith.mulf %203, %176 : vector<2x1xf32>
    %205 = arith.mulf %165, %167 : vector<2x1xf32>
    %206 = arith.mulf %166, %164 : vector<2x1xf32>
    %207 = arith.subf %205, %206 : vector<2x1xf32>
    %208 = arith.mulf %207, %176 : vector<2x1xf32>
    %209 = arith.mulf %166, %167 : vector<2x1xf32>
    %210 = arith.mulf %165, %164 : vector<2x1xf32>
    %211 = arith.addf %209, %210 : vector<2x1xf32>
    %212 = arith.mulf %211, %176 : vector<2x1xf32>
    %213 = arith.mulf %165, %165 : vector<2x1xf32>
    %214 = arith.mulf %166, %166 : vector<2x1xf32>
    %215 = arith.addf %213, %214 : vector<2x1xf32>
    %216 = arith.mulf %215, %176 : vector<2x1xf32>
    %cst_68 = arith.constant 1.000000e+00 : f32
    %217 = vector.broadcast %cst_68 : f32 to vector<2x1xf32>
    %218 = arith.subf %217, %216 : vector<2x1xf32>
    %219 = tpu.concatenate %182, %186, %190, %194, %200, %204, %208, %212, %218, %164, %165, %166, %167 in 1 : vector<2x1xf32>, vector<2x1xf32>, vector<2x1xf32>, vector<2x1xf32>, vector<2x1xf32>, vector<2x1xf32>, vector<2x1xf32>, vector<2x1xf32>, vector<2x1xf32>, vector<2x1xf32>, vector<2x1xf32>, vector<2x1xf32>, vector<2x1xf32> -> vector<2x13xf32>
    %c0_69 = arith.constant 0 : index
    %c0_70 = arith.constant 0 : index
    %220 = vector.load %arg8[%c0_69, %c0_70] : memref<2x13xf32, #tpu.memory_space<vmem>>, vector<2x13xf32>
    tpu.vector_store %arg8[%c0_69, %c0_70], %219 {strides = array<i32>} : memref<2x13xf32, #tpu.memory_space<vmem>>, vector<2x13xf32>,
    return
  }
}

</mosaic_0001>

<bundles_post_ra>
// kernel: qstn_forward.1
= control target key start
LH: loop header
LB: loop body
LE: loop exit
PB: predicated region body
PF: predicated region fallthrough
CT: control target
= control target key end

     0   :  { %v5303_v0 = vmov 1   ;;  %v5307_v1 = vmov 0   ;;  %v5305_v6 = vmov 2   ;;  %vm653_vm0 = vcmask 523264   ;;  %s3248_s17 = smov 126   ;;  %s3249_s18 = smov 127   ;;  %s5294_s0 = inlined_call_operand.vmem [shape: f32[2,128,3], index: 0, kind: input, shape index: {}]   ;;  %s5295_s1 = inlined_call_operand.vmem [shape: f32[3,64], index: 1, kind: input, shape index: {}]   ;;  %s5296_s2 = inlined_call_operand.vmem [shape: bf16[64,128], index: 2, kind: input, shape index: {}]   ;;  %s5297_s7 = inlined_call_operand.vmem [shape: f32[11,256], index: 7, kind: input, shape index: {}]   ;;  %s5298_s3 = inlined_call_operand.vmem [shape: bf16[128,256], index: 3, kind: input, shape index: {}]   ;;  %s5299_s4 = inlined_call_operand.vmem [shape: bf16[256,128], index: 4, kind: input, shape index: {}]   ;;  %s5300_s5 = inlined_call_operand.vmem [shape: bf16[128,64], index: 5, kind: input, shape index: {}]   ;;  %s5301_s6 = inlined_call_operand.vmem [shape: bf16[64,4], index: 6, kind: input, shape index: {}]   ;;  %s5302_s8 = inlined_call_operand.vmem [shape: f32[2,13], index: 8, kind: output, shape index: {}]  }
   0x1   :  { %3113 = vset.pattern.permute.xlu1 %v5303_v0  ;;  %3112 = vset.pattern.permute.xlu0 %v5307_v1  ;;  %v30_v2 = vld [vmem:[%s5294_s0] sm:$0xff]  ;;  %v31_v3 = vld [vmem:[%s5294_s0 + $0x8] sm:$0xff]  ;;  %v32_v4 = vld [vmem:[%s5294_s0 + $0x10] sm:$0xff]  ;;  %vm2376_vm1 = vcmask 1041409   ;;  %vm3247_vm2 = vmmov 0   ;;  %vm2519_vm3 = vcmask 1041408  }
   0x2   :  { %261 = vperm.xlu1 %3113, %v30_v2   ;;  %65 = vperm.xlu0 %3112, %v30_v2   ;;  %v35_v5 = vld [vmem:[%s5294_s0 + $0x28] sm:$0xff]  ;;  %v36_v7 = vld [vmem:[%s5294_s0 + $0x30] sm:$0xff]  ;;  %v33_v8 = vld [vmem:[%s5294_s0 + $0x18] sm:$0xff]  ;;  %vm2653_vm4 = vcmask 517120   ;;  %s3250_s19 = smov 2   ;;  %s3251_s20 = smov 125  }
   0x3   :  { %1605 = vmatprep.mubr.bf16.mxu1 %v5307_v1  ;;  %v34_v9 = vld [vmem:[%s5294_s0 + $0x20] sm:$0xff]  ;;  %v3334_v10 = vld [vmem:[%s5294_s0 + $0x50] sm:$0xff]  ;;  %v3341_v11 = vld [vmem:[%s5294_s0 + $0x58] sm:$0xff]  ;;  %s3253_s21 = smov 3   ;;  %s3254_s22 = smov 5   ;;  %vm2869_vm5 = vcmask 7168  }
   0x4   :  { %v3348_v12 = vld [vmem:[%s5294_s0 + $0x78] sm:$0xff]  ;;  %v3355_v13 = vld [vmem:[%s5294_s0 + $0x80] sm:$0xff]  ;;  %v3371_v16 = vld [vmem:[%s5294_s0 + $0xa8] sm:$0xff]  ;;  %s3255_s23 = smov 7   ;;  %s3256_s24 = smov 9   ;;  %vm2871_vm6 = vcmask 15360  }
   0x5   :  { %v3361_v14 = vld [vmem:[%s5294_s0 + $0xa0] sm:$0xff]  ;;  %v37_v15 = vld [vmem:[%s5294_s0 + $0x38] sm:$0xff]  ;;  %v3378_v17 = vld [vmem:[%s5294_s0 + $0xc8] sm:$0xff]  ;;  %vm2873_vm7 = vcmask 23552   ;;  %vm2875_vm8 = vcmask 31744   ;;  %vm2877_vm9 = vcmask 39936  }
   0x6   :  { %265 = vperm.xlu1 %3113, %v31_v3   ;;  %70 = vperm.xlu0 %3112, %v31_v3   ;;  %v3385_v18 = vld [vmem:[%s5294_s0 + $0xd0] sm:$0xff]  ;;  %v38_v19 = vld [vmem:[%s5294_s0 + $0x40] sm:$0xff]  ;;  %v39_v20 = vld [vmem:[%s5294_s0 + $0x48] sm:$0xff]  ;;  %vm2879_vm10 = vcmask 48128   ;;  %vm2881_vm11 = vcmask 56320   ;;  %vm2883_vm12 = vcmask 64512  }
   0x7   :  { %v43_v21 = vld [vmem:[%s5294_s0 + $0x68] sm:$0xff]  ;;  %v44_v22 = vld [vmem:[%s5294_s0 + $0x70] sm:$0xff]  ;;  %v3417_v24 = vld [vmem:[%s5294_s0 + $0x98] sm:$0xff]  ;;  %vm2885_vm13 = vcmask 72704   ;;  %vm2887_vm14 = vcmask 80896   ;;  %vm2889_vm15 = vcmask 89088  }
   0x8   :  { %v3411_v23 = vld [vmem:[%s5294_s0 + $0x90] sm:$0xff]  ;;  %v42_v25 = vld [vmem:[%s5294_s0 + $0x60] sm:$0xff]  ;;  %v3428_v26 = vld [vmem:[%s5294_s0 + $0xb8] sm:$0xff] }
   0x9   :  { %v3435_v27 = vld [vmem:[%s5294_s0 + $0xc0] sm:$0xff]  ;;  %v3449_v29 = vld [vmem:[%s5294_s0 + $0xe8] sm:$0xff]  ;;  %v3490_v40 = vld [vmem:[%s5294_s0 + $0xf0] sm:$0xff] }
   0xa   :  { %269 = vperm.xlu1 %3113, %v32_v4   ;;  %75 = vperm.xlu0 %3112, %v32_v4   ;;  %v3442_v28 = vld [vmem:[%s5294_s0 + $0xe0] sm:$0xff]  ;;  %v47_v38 = vld [vmem:[%s5294_s0 + $0x88] sm:$0xff]  ;;  %v3501_v43 = vld [vmem:[%s5294_s0 + $0xf8] sm:$0xff] }
   0xb   :  { %v3521_v50 = vld [vmem:[%s5295_s1] ss:$0 sm:$0xff]  ;;  %v3530_v53 = vld [vmem:[%s5295_s1 + $0x1] ss:$0 sm:$0xff]  ;;  %v3535_v54 = vld [vmem:[%s5295_s1 + $0x2] ss:$0 sm:$0xff] }
   0xe   :  { %3114 = vset.pattern.permute.xlu1 %v5305_v6  ;;  %90 = vperm.xlu0 %3112, %v35_v5  }
   0xf   :  { %462 = vperm.xlu1 %3114, %v31_v3  }
  0x12   :  { %95 = vperm.xlu0 %3112, %v36_v7  }
  0x13   :  { %3115 = vset.pattern.permute.xlu1 %v5307_v1 }
  0x14   :  { %80 = vperm.xlu1 %3115, %v33_v8  }
  0x16   :  { %3121 = vset.pattern.permute.xlu0 %v5305_v6 }
  0x17   :  { %458 = vperm.xlu0 %3121, %v30_v2  }
  0x18   :  { %3116 = vset.pattern.permute.xlu1 %v5305_v6 }
  0x19   :  { %466 = vperm.xlu1 %3116, %v32_v4  }
  0x1b   :  { %478 = vperm.xlu0 %3121, %v35_v5  }
  0x1d   :  { %3117 = vset.pattern.permute.xlu1 %v5307_v1 }
  0x1e   :  { %85 = vperm.xlu1 %3117, %v34_v9  }
  0x1f   :  { %482 = vperm.xlu0 %3121, %v36_v7  }
  0x22   :  { %3118 = vset.pattern.permute.xlu1 %v5305_v6 }
  0x23   :  { %470 = vperm.xlu1 %3118, %v33_v8   ;;  %498 = vperm.xlu0 %3121, %v3334_v10  }
  0x27   :  { %3119 = vset.pattern.permute.xlu1 %v5303_v0  ;;  %502 = vperm.xlu0 %3121, %v3341_v11  }
  0x28   :  { %281 = vperm.xlu1 %3119, %v35_v5  }
  0x2b   :  { %518 = vperm.xlu0 %3121, %v3348_v12  }
  0x2c   :  { %3120 = vset.pattern.permute.xlu1 %v5305_v6 }
  0x2d   :  { %474 = vperm.xlu1 %3120, %v34_v9  }
  0x2f   :  { %522 = vperm.xlu0 %3121, %v3355_v13  }
  0x31   :  { %3122 = vset.pattern.permute.xlu1 %v5303_v0 }
  0x32   :  { %285 = vperm.xlu1 %3122, %v36_v7  }
  0x33   :  { %538 = vperm.xlu0 %3121, %v3361_v14  }
  0x36   :  { %3123 = vset.pattern.permute.xlu1 %v5307_v1 }
  0x37   :  { %100 = vperm.xlu1 %3123, %v37_v15   ;;  %542 = vperm.xlu0 %3121, %v3371_v16  }
  0x3b   :  { %3124 = vset.pattern.permute.xlu1 %v5303_v0  ;;  %558 = vperm.xlu0 %3121, %v3378_v17  }
  0x3c   :  { %289 = vperm.xlu1 %3124, %v37_v15  }
  0x3f   :  { %562 = vperm.xlu0 %3121, %v3385_v18  }
  0x40   :  { %3125 = vset.pattern.permute.xlu1 %v5307_v1 }
  0x41   :  { %105 = vperm.xlu1 %3125, %v38_v19  }
  0x43   :  { %3161 = vset.pattern.permute.xlu0 %v5303_v0 }
  0x44   :  { %273 = vperm.xlu0 %3161, %v33_v8  }
  0x45   :  { %3126 = vset.pattern.permute.xlu1 %v5305_v6 }
  0x46   :  { %486 = vperm.xlu1 %3126, %v37_v15  }
  0x48   :  { %277 = vperm.xlu0 %3161, %v34_v9  }
  0x4a   :  { %3127 = vset.pattern.permute.xlu1 %v5307_v1 }
  0x4b   :  { %110 = vperm.xlu1 %3127, %v39_v20  }
  0x4c   :  { %293 = vperm.xlu0 %3161, %v38_v19  }
  0x4f   :  { %3128 = vset.pattern.permute.xlu1 %v5305_v6 }
  0x50   :  { %490 = vperm.xlu1 %3128, %v38_v19   ;;  %297 = vperm.xlu0 %3161, %v39_v20  }
  0x54   :  { %3129 = vset.pattern.permute.xlu1 %v5303_v0  ;;  %313 = vperm.xlu0 %3161, %v43_v21  }
  0x55   :  { %301 = vperm.xlu1 %3129, %v3334_v10  }
  0x58   :  { %317 = vperm.xlu0 %3161, %v44_v22  }
  0x59   :  { %3130 = vset.pattern.permute.xlu1 %v5305_v6 }
  0x5a   :  { %494 = vperm.xlu1 %3130, %v39_v20  }
  0x5c   :  { %333 = vperm.xlu0 %3161, %v3411_v23  }
  0x5e   :  { %3131 = vset.pattern.permute.xlu1 %v5303_v0 }
  0x5f   :  { %305 = vperm.xlu1 %3131, %v3341_v11  }
  0x60   :  { %337 = vperm.xlu0 %3161, %v3417_v24  }
  0x63   :  { %3132 = vset.pattern.permute.xlu1 %v5307_v1 }
  0x64   :  { %125 = vperm.xlu1 %3132, %v42_v25   ;;  %353 = vperm.xlu0 %3161, %v3428_v26  }
  0x68   :  { %3133 = vset.pattern.permute.xlu1 %v5303_v0  ;;  %357 = vperm.xlu0 %3161, %v3435_v27  }
  0x69   :  { %309 = vperm.xlu1 %3133, %v42_v25  }
  0x6c   :  { %373 = vperm.xlu0 %3161, %v3442_v28  }
  0x6d   :  { %3134 = vset.pattern.permute.xlu1 %v5307_v1 }
  0x6e   :  { %130 = vperm.xlu1 %3134, %v43_v21  }
  0x70   :  { %377 = vperm.xlu0 %3161, %v3449_v29  }
  0x72   :  { %3135 = vset.pattern.permute.xlu1 %v5305_v6 }
  0x73   :  { %506 = vperm.xlu1 %3135, %v42_v25  }
  0x74   :  { %3165 = vset.pattern.permute.xlu0 %v5307_v1 }
  0x75   :  { %115 = vperm.xlu0 %3165, %v3334_v10  }
  0x77   :  { %3136 = vset.pattern.permute.xlu1 %v5307_v1 }
  0x78   :  { %135 = vperm.xlu1 %3136, %v44_v22  }
  0x79   :  { %120 = vperm.xlu0 %3165, %v3341_v11  }
  0x7c   :  { %3137 = vset.pattern.permute.xlu1 %v5305_v6 }
  0x7d   :  { %510 = vperm.xlu1 %3137, %v43_v21   ;;  %140 = vperm.xlu0 %3165, %v3348_v12  }
  0x81   :  { %3138 = vset.pattern.permute.xlu1 %v5303_v0  ;;  %v3460_v30 = vpop.permute.xlu1 %261  ;;  %v3462_v31 = vpop.permute.xlu0 %65  ;;  %145 = vperm.xlu0 %3165, %v3355_v13  }
  0x82   :  { %321 = vperm.xlu1 %3138, %v3348_v12  }
  0x85   :  { %v3466_v32 = vpop.permute.xlu1 %265  ;;  %v3468_v33 = vpop.permute.xlu0 %70  ;;  %165 = vperm.xlu0 %3165, %v3361_v14  }
  0x86   :  { %3139 = vset.pattern.permute.xlu1 %v5305_v6 }
  0x87   :  { %514 = vperm.xlu1 %3139, %v44_v22  }
  0x89   :  { %v3472_v34 = vpop.permute.xlu1 %269  ;;  %v3474_v35 = vpop.permute.xlu0 %75  ;;  %170 = vperm.xlu0 %3165, %v3371_v16  }
  0x8b   :  { %3140 = vset.pattern.permute.xlu1 %v5303_v0 }
  0x8c   :  { %325 = vperm.xlu1 %3140, %v3355_v13   ;;  %v52_v13 = vld [vmem:[%s5294_s0 + $0xb0] sm:$0xff] }
  0x8d   :  { %v91_v36 = vpop.permute.xlu0 %90  ;;  %190 = vperm.xlu0 %3165, %v3378_v17  }
  0x8e   :  { %v3480_v37 = vpop.permute.xlu1 %462  ;;  %v232_v51 = vmul.f32 %v3521_v50, %v91_v36 }
  0x90   :  { %3141 = vset.pattern.permute.xlu1 %v5307_v1 }
  0x91   :  { %150 = vperm.xlu1 %3141, %v47_v38   ;;  %v96_v39 = vpop.permute.xlu0 %95  ;;  %195 = vperm.xlu0 %3165, %v3385_v18  }
  0x92   :  { %v233_v63 = vmul.f32 %v3521_v50, %v96_v39 }
  0x93   :  { %v3492_v41 = vpop.permute.xlu1 %80 }
  0x95   :  { %3142 = vset.pattern.permute.xlu1 %v5303_v0  ;;  %215 = vperm.xlu0 %3165, %v3490_v40  }
  0x96   :  { %329 = vperm.xlu1 %3142, %v47_v38   ;;  %v3496_v42 = vpop.permute.xlu0 %458 }
  0x98   :  { %v3503_v44 = vpop.permute.xlu1 %466 }
  0x99   :  { %220 = vperm.xlu0 %3165, %v3501_v43  }
  0x9a   :  { %3143 = vset.pattern.permute.xlu1 %v5307_v1  ;;  %v479_v45 = vpop.permute.xlu0 %478 }
  0x9b   :  { %155 = vperm.xlu1 %3143, %v3411_v23   ;;  %v594_v56 = vmul.f32 %v3535_v54, %v479_v45 }
  0x9d   :  { %v3508_v46 = vpop.permute.xlu1 %85  ;;  %3170 = vset.pattern.permute.xlu0 %v5305_v6 }
  0x9e   :  { %v483_v47 = vpop.permute.xlu0 %482  ;;  %578 = vperm.xlu0 %3170, %v3490_v40  }
  0x9f   :  { %3144 = vset.pattern.permute.xlu1 %v5305_v6  ;;  %v595_v3 = vmul.f32 %v3535_v54, %v483_v47 }
  0xa0   :  { %526 = vperm.xlu1 %3144, %v47_v38  }
  0xa2   :  { %v3513_v48 = vpop.permute.xlu1 %470  ;;  %v3515_v49 = vpop.permute.xlu0 %498 }
  0xa4   :  { %3145 = vset.pattern.permute.xlu1 %v5307_v1 }
  0xa5   :  { %160 = vperm.xlu1 %3145, %v3417_v24  }
  0xa6   :  { %v3525_v52 = vpop.permute.xlu0 %502 }
  0xa7   :  { %v282_v55 = vpop.permute.xlu1 %281 }
  0xa8   :  { %v397_v57 = vmul.f32 %v3530_v53, %v282_v55 }
  0xa9   :  { %3146 = vset.pattern.permute.xlu1 %v5305_v6 }
  0xaa   :  { %v429_v58 = vadd.f32 %v397_v57, %v232_v51  ;;  %530 = vperm.xlu1 %3146, %v3411_v23   ;;  %v3541_v59 = vpop.permute.xlu0 %518 }
  0xac   :  { %v3543_v60 = vadd.f32 %v594_v56, %v429_v58  ;;  %v3545_v61 = vpop.permute.xlu1 %474 }
  0xae   :  { %3147 = vset.pattern.permute.xlu1 %v5303_v0  ;;  %v3548_v62 = vpop.permute.xlu0 %522 }
  0xaf   :  { %341 = vperm.xlu1 %3147, %v3361_v14  }
  0xb1   :  { %v286_v2 = vpop.permute.xlu1 %285 }
  0xb2   :  { %v398_v4 = vmul.f32 %v3530_v53, %v286_v2  ;;  %v3554_v5 = vpop.permute.xlu0 %538 }
  0xb3   :  { %3148 = vset.pattern.permute.xlu1 %v5305_v6 }
  0xb4   :  { %v430_v7 = vadd.f32 %v398_v4, %v233_v63  ;;  %534 = vperm.xlu1 %3148, %v3417_v24  }
  0xb6   :  { %v3558_v8 = vadd.f32 %v595_v3, %v430_v7  ;;  %v3560_v9 = vpop.permute.xlu1 %100  ;;  %v3562_v10 = vpop.permute.xlu0 %542 }
  0xb8   :  { %3149 = vset.pattern.permute.xlu1 %v5303_v0 }
  0xb9   :  { %345 = vperm.xlu1 %3149, %v3371_v16  }
  0xba   :  { %v3566_v11 = vpop.permute.xlu0 %558 }
  0xbb   :  { %5367 = vst [vmem:[#allocation2_spill] sm:$0xff] %v3566_v11  ;;  %v3568_v12 = vpop.permute.xlu1 %289 }
  0xbd   :  { %3150 = vset.pattern.permute.xlu1 %v5307_v1 }
  0xbe   :  { %175 = vperm.xlu1 %3150, %v52_v13   ;;  %v3574_v14 = vpop.permute.xlu0 %562 }
  0xbf   :  { %5368 = vst [vmem:[#allocation3_spill] sm:$0xff] %v3574_v14 }
  0xc0   :  { %v3576_v15 = vpop.permute.xlu1 %105 }
  0xc2   :  { %3151 = vset.pattern.permute.xlu1 %v5303_v0 }
  0xc3   :  { %349 = vperm.xlu1 %3151, %v52_v13   ;;  %v3579_v19 = vpop.permute.xlu0 %273 }
  0xc5   :  { %v3581_v16 = vpop.permute.xlu1 %486 }
  0xc7   :  { %3152 = vset.pattern.permute.xlu1 %v5307_v1  ;;  %v3584_v20 = vpop.permute.xlu0 %277 }
  0xc8   :  { %180 = vperm.xlu1 %3152, %v3428_v26  }
  0xca   :  { %v3587_v21 = vpop.permute.xlu1 %110 }
  0xcb   :  { %v3589_v22 = vpop.permute.xlu0 %293 }
  0xcc   :  { %3153 = vset.pattern.permute.xlu1 %v5305_v6 }
  0xcd   :  { %546 = vperm.xlu1 %3153, %v52_v13  }
  0xcf   :  { %v3592_v23 = vpop.permute.xlu1 %490  ;;  %v3594_v24 = vpop.permute.xlu0 %297 }
  0xd1   :  { %3154 = vset.pattern.permute.xlu1 %v5307_v1 }
  0xd2   :  { %185 = vperm.xlu1 %3154, %v3435_v27  }
  0xd3   :  { %v314_v25 = vpop.permute.xlu0 %313 }
  0xd4   :  { %v3598_v36 = vpop.permute.xlu1 %301 }
  0xd6   :  { %3155 = vset.pattern.permute.xlu1 %v5305_v6 }
  0xd7   :  { %550 = vperm.xlu1 %3155, %v3428_v26   ;;  %v318_v38 = vpop.permute.xlu0 %317 }
  0xd9   :  { %v3602_v39 = vpop.permute.xlu1 %494 }
  0xdb   :  { %3156 = vset.pattern.permute.xlu1 %v5303_v0  ;;  %v3605_v45 = vpop.permute.xlu0 %333 }
  0xdc   :  { %361 = vperm.xlu1 %3156, %v3378_v17   ;;  %v57_v17 = vld [vmem:[%s5294_s0 + $0xd8] sm:$0xff] }
  0xde   :  { %v306_v47 = vpop.permute.xlu1 %305 }
  0xdf   :  { %v3608_v51 = vpop.permute.xlu0 %337 }
  0xe0   :  { %3157 = vset.pattern.permute.xlu1 %v5305_v6  ;;  %v403_v6 = vmul.f32 %v3530_v53, %v306_v47 }
  0xe1   :  { %554 = vperm.xlu1 %3157, %v3435_v27  }
  0xe3   :  { %v126_v55 = vpop.permute.xlu1 %125  ;;  %v3612_v56 = vpop.permute.xlu0 %353 }
  0xe4   :  { %v239_v58 = vmul.f32 %v3521_v50, %v126_v55 }
  0xe5   :  { %3158 = vset.pattern.permute.xlu1 %v5303_v0 }
  0xe6   :  { %365 = vperm.xlu1 %3158, %v3385_v18  }
  0xe7   :  { %v3616_v26 = vpop.permute.xlu0 %357 }
  0xe8   :  { %5369 = vst [vmem:[#allocation4_spill] sm:$0xff] %v3616_v26  ;;  %v310_v57 = vpop.permute.xlu1 %309  ;;  %v5373_v26 = vmov 0  }
  0xe9   :  { %v404_v63 = vmul.f32 %v3530_v53, %v310_v57 }
  0xea   :  { %3159 = vset.pattern.permute.xlu1 %v5307_v1 }
  0xeb   :  { %v436_v27 = vadd.f32 %v404_v63, %v239_v58  ;;  %200 = vperm.xlu1 %3159, %v57_v17   ;;  %v3624_v2 = vpop.permute.xlu0 %373  ;;  %v600_v58 = vmul.f32 %v3535_v54, %v3525_v52 }
  0xec   :  { %5370 = vst [vmem:[#allocation5_spill] sm:$0xff] %v3624_v2 }
  0xed   :  { %v131_v3 = vpop.permute.xlu1 %130 }
  0xef   :  { %3160 = vset.pattern.permute.xlu1 %v5303_v0  ;;  %v3627_v18 = vpop.permute.xlu0 %377  ;;  %v405_v0 = vmul.f32 %v3530_v53, %v314_v25 }
  0xf0   :  { %5371 = vst [vmem:[#allocation6_spill] sm:$0xff] %v3627_v18  ;;  %369 = vperm.xlu1 %3160, %v57_v17   ;;  %v240_v18 = vmul.f32 %v3521_v50, %v131_v3 }
  0xf2   :  { %v507_v4 = vpop.permute.xlu1 %506  ;;  %v437_v2 = vadd.f32 %v405_v0, %v240_v18  ;;  %v406_v0 = vmul.f32 %v3530_v53, %v318_v38 }
  0xf3   :  { %v601_v7 = vmul.f32 %v3535_v54, %v507_v4 }
  0xf4   :  { %3162 = vset.pattern.permute.xlu1 %v5307_v1  ;;  %v3631_v13 = vpop.permute.xlu0 %115  ;;  %v5372_v1 = vmov 2  }
  0xf5   :  { %v3633_v55 = vadd.f32 %v601_v7, %v436_v27  ;;  %205 = vperm.xlu1 %3162, %v3442_v28  }
  0xf7   :  { %v136_v57 = vpop.permute.xlu1 %135 }
  0xf8   :  { %v121_v63 = vpop.permute.xlu0 %120  ;;  %v241_v18 = vmul.f32 %v3521_v50, %v136_v57 }
  0xf9   :  { %v238_v4 = vmul.f32 %v3521_v50, %v121_v63  ;;  %3163 = vset.pattern.permute.xlu1 %v5372_v1 }
  0xfa   :  { %566 = vperm.xlu1 %3163, %v57_v17   ;;  %v604_v17 = vmul.f32 %v3535_v54, %v3541_v59  ;;  %v438_v63 = vadd.f32 %v406_v0, %v241_v18 }
  0xfb   :  { %v435_v27 = vadd.f32 %v403_v6, %v238_v4 }
  0xfc   :  { %v511_v7 = vpop.permute.xlu1 %510  ;;  %v141_v52 = vpop.permute.xlu0 %140 }
  0xfd   :  { %v3643_v14 = vadd.f32 %v600_v58, %v435_v27  ;;  %v602_v11 = vmul.f32 %v3535_v54, %v511_v7  ;;  %v242_v47 = vmul.f32 %v3521_v50, %v141_v52  ;;  %v5374_v7 = vmov 1  }
  0xfe   :  { %3164 = vset.pattern.permute.xlu1 %v5373_v26 }
  0xff   :  { %v3647_v25 = vadd.f32 %v602_v11, %v437_v2  ;;  %210 = vperm.xlu1 %3164, %v3449_v29  }
 0x100   :  { %v146_v27 = vpop.permute.xlu0 %145 }
 0x101   :  { %v322_v3 = vpop.permute.xlu1 %321  ;;  %v243_v38 = vmul.f32 %v3521_v50, %v146_v27 }
 0x102   :  { %v407_v6 = vmul.f32 %v3530_v53, %v322_v3 }
 0x103   :  { %3166 = vset.pattern.permute.xlu1 %v5372_v1 }
 0x104   :  { %v439_v58 = vadd.f32 %v407_v6, %v242_v47  ;;  %570 = vperm.xlu1 %3166, %v3442_v28   ;;  %v605_v28 = vmul.f32 %v3535_v54, %v3548_v62 }
 0x106   :  { %v3658_v11 = vadd.f32 %v604_v17, %v439_v58  ;;  %v515_v2 = vpop.permute.xlu1 %514 }
 0x107   :  { %v603_v4 = vmul.f32 %v3535_v54, %v515_v2 }
 0x108   :  { %3167 = vset.pattern.permute.xlu1 %v5374_v7 }
 0x109   :  { %v3662_v59 = vadd.f32 %v603_v4, %v438_v63  ;;  %381 = vperm.xlu1 %3167, %v3490_v40  }
 0x10b   :  { %v326_v57 = vpop.permute.xlu1 %325 }
 0x10c   :  { %v408_v52 = vmul.f32 %v3530_v53, %v326_v57 }
 0x10d   :  { %3168 = vset.pattern.permute.xlu1 %v5372_v1 }
 0x10e   :  { %v440_v47 = vadd.f32 %v408_v52, %v243_v38  ;;  %574 = vperm.xlu1 %3168, %v3449_v29   ;;  %v393_v52 = vmul.f32 %v3530_v53, %v3466_v32 }
 0x110   :  { %v3671_v3 = vadd.f32 %v605_v28, %v440_v47  ;;  %v151_v17 = vpop.permute.xlu1 %150  ;;  %v228_v28 = vmul.f32 %v3521_v50, %v3468_v33  ;;  %v589_v47 = vmul.f32 %v3535_v54, %v3496_v42  ;;  %v230_v33 = vmul.f32 %v3521_v50, %v3492_v41 }
 0x111   :  { %v244_v6 = vmul.f32 %v3521_v50, %v151_v17 }
 0x112   :  { %3169 = vset.pattern.permute.xlu1 %v5374_v7 }
 0x113   :  { %385 = vperm.xlu1 %3169, %v3501_v43  }
 0x115   :  { %v330_v40 = vpop.permute.xlu1 %329 }
 0x116   :  { %v409_v0 = vmul.f32 %v3530_v53, %v330_v40  ;;  %v394_v40 = vmul.f32 %v3530_v53, %v3472_v34  ;;  %v591_v34 = vmul.f32 %v3535_v54, %v3503_v44  ;;  %v592_v44 = vmul.f32 %v3535_v54, %v3513_v48 }
 0x117   :  { %3171 = vset.pattern.permute.xlu1 %v5372_v1  ;;  %v392_v1 = vmul.f32 %v3530_v53, %v3460_v30  ;;  %v229_v30 = vmul.f32 %v3521_v50, %v3474_v35  ;;  %v396_v35 = vmul.f32 %v3530_v53, %v3584_v20 }
 0x118   :  { %v441_v18 = vadd.f32 %v409_v0, %v244_v6  ;;  %582 = vperm.xlu1 %3171, %v3501_v43   ;;  %v227_v43 = vmul.f32 %v3521_v50, %v3462_v31  ;;  %v590_v31 = vmul.f32 %v3535_v54, %v3480_v37  ;;  %v395_v6 = vmul.f32 %v3530_v53, %v3579_v19 }
 0x119   :  { %v425_v0 = vadd.f32 %v393_v52, %v228_v28  ;;  %v231_v37 = vmul.f32 %v3521_v50, %v3508_v46  ;;  %v593_v52 = vmul.f32 %v3535_v54, %v3545_v61  ;;  %v399_v61 = vmul.f32 %v3530_v53, %v3568_v12 }
 0x11a   :  { %v3679_v62 = vpop.permute.xlu1 %155  ;;  %v424_v17 = vadd.f32 %v392_v1, %v227_v43  ;;  %v427_v19 = vadd.f32 %v395_v6, %v230_v33  ;;  %v401_v12 = vmul.f32 %v3530_v53, %v3594_v24  ;;  %v402_v24 = vmul.f32 %v3530_v53, %v3598_v36 }
 0x11b   :  { %v428_v43 = vadd.f32 %v396_v35, %v231_v37  ;;  %v596_v35 = vmul.f32 %v3535_v54, %v3581_v16  ;;  %v235_v16 = vmul.f32 %v3521_v50, %v3576_v15  ;;  %v599_v15 = vmul.f32 %v3535_v54, %v3515_v49 }
 0x11c   :  { %v3718_v42 = vadd.f32 %v589_v47, %v424_v17  ;;  %v3740_v46 = vadd.f32 %v592_v44, %v427_v19  ;;  %v400_v44 = vmul.f32 %v3530_v53, %v3589_v22  ;;  %v597_v22 = vmul.f32 %v3535_v54, %v3592_v23 }
 0x11d   :  { %v3744_v17 = vadd.f32 %v593_v52, %v428_v43  ;;  %v237_v43 = vmul.f32 %v3521_v50, %v3631_v13  ;;  %v236_v52 = vmul.f32 %v3521_v50, %v3587_v21  ;;  %v598_v13 = vmul.f32 %v3535_v54, %v3602_v39 }
 0x11e   :  { %v654_v41 = vsel %vm653_vm0, %v3718_v42, 0.0  ;;  %v659_v48 = vsel %vm653_vm0, %v3740_v46, 0.0 }
 0x11f   :  { %v527_v29 = vpop.permute.xlu1 %526 }
 0x120   :  { %v606_v58 = vmul.f32 %v3535_v54, %v527_v29  ;;  %v3724_v29 = vadd.f32 %v590_v31, %v425_v0  ;;  %v661_v31 = vsel %vm653_vm0, %v3744_v17, 0.0 }
 0x122   :  { %v3682_v2 = vadd.f32 %v606_v58, %v441_v18  ;;  %v426_v18 = vadd.f32 %v394_v40, %v229_v30  ;;  %v655_v20 = vsel %vm653_vm0, %v3724_v29, 0.0 }
 0x123   :  { %v656_v28 = vadd.f32 %v655_v20, %v654_v41 }
 0x124   :  { %v3684_v63 = vpop.permute.xlu1 %160  ;;  %v3732_v1 = vadd.f32 %v591_v34, %v426_v18  ;;  %v234_v34 = vmul.f32 %v3521_v50, %v3560_v9  ;;  %v663_v18 = vsel %vm653_vm0, %v3543_v60, 0.0  ;;  %v665_v9 = vsel %vm653_vm0, %v3558_v8, 0.0 }
 0x126   :  { %v657_v47 = vsel %vm653_vm0, %v3732_v1, 0.0  ;;  %v431_v19 = vadd.f32 %v399_v61, %v234_v34 }
 0x127   :  { %v658_v30 = vadd.f32 %v657_v47, %v656_v28 }
 0x128   :  { %v3774_v20 = vadd.f32 %v596_v35, %v431_v19 }
 0x129   :  { %v3686_v4 = vpop.permute.xlu1 %530  ;;  %v660_v6 = vadd.f32 %v659_v48, %v658_v30  ;;  %v432_v48 = vadd.f32 %v400_v44, %v235_v16  ;;  %v433_v30 = vadd.f32 %v401_v12, %v236_v52  ;;  %v166_v52 = vpop.permute.xlu0 %165 }
 0x12a   :  { %v667_v21 = vsel %vm653_vm0, %v3774_v20, 0.0 }
 0x12b   :  { %v662_v33 = vadd.f32 %v661_v31, %v660_v6  ;;  %v434_v31 = vadd.f32 %v402_v24, %v237_v43  ;;  %v3790_v6 = vadd.f32 %v597_v22, %v432_v48  ;;  %v3792_v23 = vadd.f32 %v598_v13, %v433_v30 }
 0x12c   :  { %v410_v24 = vmul.f32 %v3530_v53, %v3605_v45  ;;  %v679_v13 = vsel %vm653_vm0, %v3647_v25, 0.0  ;;  %v411_v30 = vmul.f32 %v3530_v53, %v3608_v51 }
 0x12d   :  { %v664_v41 = vadd.f32 %v663_v18, %v662_v33  ;;  %v3794_v61 = vadd.f32 %v599_v15, %v434_v31  ;;  %v669_v33 = vsel %vm653_vm0, %v3790_v6, 0.0  ;;  %v671_v49 = vsel %vm653_vm0, %v3792_v23, 0.0  ;;  %v171_v45 = vpop.permute.xlu0 %170 }
 0x12e   :  { %v3688_v27 = vpop.permute.xlu1 %341  ;;  %v245_v15 = vmul.f32 %v3521_v50, %v3679_v62  ;;  %v246_v31 = vmul.f32 %v3521_v50, %v3684_v63  ;;  %v683_v62 = vsel %vm653_vm0, %v3658_v11, 0.0  ;;  %v248_v63 = vmul.f32 %v3521_v50, %v171_v45 }
 0x12f   :  { %v666_v28 = vadd.f32 %v665_v9, %v664_v41  ;;  %v673_v35 = vsel %vm653_vm0, %v3794_v61, 0.0  ;;  %v675_v41 = vsel %vm653_vm0, %v3643_v14, 0.0  ;;  %v677_v9 = vsel %vm653_vm0, %v3633_v55, 0.0 }
 0x130   :  { %v412_v51 = vmul.f32 %v3530_v53, %v3688_v27 }
 0x131   :  { %v668_v36 = vadd.f32 %v667_v21, %v666_v28  ;;  %v681_v28 = vsel %vm653_vm0, %v3662_v59, 0.0  ;;  %v607_v21 = vmul.f32 %v3535_v54, %v3686_v4  ;;  %v685_v4 = vsel %vm653_vm0, %v3671_v3, 0.0 }
 0x133   :  { %v3690_v7 = vpop.permute.xlu1 %534  ;;  %v670_v34 = vadd.f32 %v669_v33, %v668_v36  ;;  %v442_v33 = vadd.f32 %v410_v24, %v245_v15  ;;  %v609_v15 = vmul.f32 %v3535_v54, %v3554_v5  ;;  %v415_v5 = vmul.f32 %v3530_v53, %v3612_v56 }
 0x135   :  { %v672_v18 = vadd.f32 %v671_v49, %v670_v34  ;;  %v608_v49 = vmul.f32 %v3535_v54, %v3690_v7 }
 0x137   :  { %v674_v44 = vadd.f32 %v673_v35, %v672_v18  ;;  %v247_v35 = vmul.f32 %v3521_v50, %v166_v52  ;;  %v443_v18 = vadd.f32 %v411_v30, %v246_v31  ;;  %v191_v30 = vpop.permute.xlu0 %190 }
 0x138   :  { %v3692_v38 = vpop.permute.xlu1 %345 }
 0x139   :  { %v676_v12 = vadd.f32 %v675_v41, %v674_v44  ;;  %v3840_v41 = vadd.f32 %v607_v21, %v442_v33  ;;  %v413_v7 = vmul.f32 %v3530_v53, %v3692_v38  ;;  %v610_v38 = vmul.f32 %v3535_v54, %v3562_v10 }
 0x13b   :  { %v678_v16 = vadd.f32 %v677_v9, %v676_v12  ;;  %v687_v12 = vsel %vm653_vm0, %v3682_v2, 0.0  ;;  %v3846_v9 = vadd.f32 %v608_v49, %v443_v18  ;;  %v689_v24 = vsel %vm653_vm0, %v3840_v41, 0.0 }
 0x13d   :  { %v3698_v57 = vpop.permute.xlu1 %175  ;;  %v680_v48 = vadd.f32 %v679_v13, %v678_v16  ;;  %v444_v16 = vadd.f32 %v412_v51, %v247_v35  ;;  %v445_v13 = vadd.f32 %v413_v7, %v248_v63  ;;  %v691_v31 = vsel %vm653_vm0, %v3846_v9, 0.0  ;;  %v196_v35 = vpop.permute.xlu0 %195  ;;  %v5375_v63 = vld [vmem:[#allocation4_spill] sm:$0xff] }
 0x13e   :  { %v249_v21 = vmul.f32 %v3521_v50, %v3698_v57 }
 0x13f   :  { %v682_v36 = vadd.f32 %v681_v28, %v680_v48  ;;  %v3866_v33 = vadd.f32 %v609_v15, %v444_v16  ;;  %v3868_v10 = vadd.f32 %v610_v38, %v445_v13 }
 0x141   :  { %v684_v44 = vadd.f32 %v683_v62, %v682_v36 }
 0x142   :  { %v3714_v32 = vpop.permute.xlu1 %349 }
 0x143   :  { %v686_v27 = vadd.f32 %v685_v4, %v684_v44  ;;  %v414_v28 = vmul.f32 %v3530_v53, %v3714_v32  ;;  %v253_v44 = vmul.f32 %v3521_v50, %v196_v35 }
 0x145   :  { %v688_v48 = vadd.f32 %v687_v12, %v686_v27  ;;  %v446_v49 = vadd.f32 %v414_v28, %v249_v21  ;;  %v693_v12 = vsel %vm653_vm0, %v3866_v33, 0.0  ;;  %v695_v27 = vsel %vm653_vm0, %v3868_v10, 0.0  ;;  %v5376_v21 = vld [vmem:[#allocation2_spill] sm:$0xff] }
 0x147   :  { %v3728_v58 = vpop.permute.xlu1 %180  ;;  %v690_v36 = vadd.f32 %v689_v24, %v688_v48 }
 0x148   :  { %v250_v45 = vmul.f32 %v3521_v50, %v3728_v58 }
 0x149   :  { %v692_v58 = vadd.f32 %v691_v31, %v690_v36 }
 0x14a   :  { %v447_v4 = vadd.f32 %v415_v5, %v250_v45  ;;  %v614_v45 = vmul.f32 %v3535_v54, %v5376_v21 }
 0x14c   :  { %v3746_v40 = vpop.permute.xlu1 %546 }
 0x14d   :  { %v611_v32 = vmul.f32 %v3535_v54, %v3746_v40  ;;  %v416_v40 = vmul.f32 %v3530_v53, %v5375_v63 }
 0x14f   :  { %v3876_v56 = vadd.f32 %v611_v32, %v446_v49  ;;  %v5377_v32 = vld [vmem:[#allocation3_spill] sm:$0xff] }
 0x150   :  { %v615_v5 = vmul.f32 %v3535_v54, %v5377_v32 }
 0x151   :  { %v3752_v0 = vpop.permute.xlu1 %185 }
 0x152   :  { %v251_v62 = vmul.f32 %v3521_v50, %v3752_v0  ;;  %v252_v0 = vmul.f32 %v3521_v50, %v191_v30 }
 0x154   :  { %v448_v16 = vadd.f32 %v416_v40, %v251_v62 }
 0x156   :  { %v3762_v37 = vpop.permute.xlu1 %550 }
 0x157   :  { %v612_v57 = vmul.f32 %v3535_v54, %v3762_v37 }
 0x159   :  { %v3890_v24 = vadd.f32 %v612_v57, %v447_v4  ;;  %v5378_v4 = vld [vmem:[#allocation5_spill] sm:$0xff] }
 0x15b   :  { %v3784_v47 = vpop.permute.xlu1 %361  ;;  %v699_v30 = vsel %vm653_vm0, %v3890_v24, 0.0 }
 0x15c   :  { %v417_v7 = vmul.f32 %v3530_v53, %v3784_v47  ;;  %v697_v47 = vsel %vm653_vm0, %v3876_v56, 0.0 }
 0x15e   :  { %v449_v38 = vadd.f32 %v417_v7, %v252_v0 }
 0x160   :  { %v3796_v39 = vpop.permute.xlu1 %554  ;;  %v3911_v63 = vadd.f32 %v614_v45, %v449_v38 }
 0x161   :  { %v613_v18 = vmul.f32 %v3535_v54, %v3796_v39  ;;  %v694_v39 = vadd.f32 %v693_v12, %v692_v58  ;;  %v5379_v12 = vld [vmem:[#allocation6_spill] sm:$0xff] }
 0x163   :  { %v3894_v28 = vadd.f32 %v613_v18, %v448_v16  ;;  %v696_v15 = vadd.f32 %v695_v27, %v694_v39  ;;  %v420_v18 = vmul.f32 %v3530_v53, %v5378_v4  ;;  %v703_v16 = vsel %vm653_vm0, %v3911_v63, 0.0 }
 0x165   :  { %v3804_v19 = vpop.permute.xlu1 %365  ;;  %v698_v36 = vadd.f32 %v697_v47, %v696_v15  ;;  %v701_v49 = vsel %vm653_vm0, %v3894_v28, 0.0 }
 0x166   :  { %v418_v37 = vmul.f32 %v3530_v53, %v3804_v19  ;;  %v216_v19 = vpop.permute.xlu0 %215 }
 0x168   :  { %v450_v48 = vadd.f32 %v418_v37, %v253_v44 }
 0x16a   :  { %v3808_v43 = vpop.permute.xlu1 %200  ;;  %v3913_v40 = vadd.f32 %v615_v5, %v450_v48  ;;  %v221_v37 = vpop.permute.xlu0 %220 }
 0x16b   :  { %v254_v62 = vmul.f32 %v3521_v50, %v3808_v43 }
 0x16c   :  { %v705_v39 = vsel %vm653_vm0, %v3913_v40, 0.0 }
 0x16f   :  { %v3812_v22 = vpop.permute.xlu1 %369 }
 0x170   :  { %v419_v31 = vmul.f32 %v3530_v53, %v3812_v22  ;;  %v700_v22 = vadd.f32 %v699_v30, %v698_v36  ;;  %v579_v30 = vpop.permute.xlu0 %578 }
 0x172   :  { %v451_v7 = vadd.f32 %v419_v31, %v254_v62  ;;  %v702_v43 = vadd.f32 %v701_v49, %v700_v22  ;;  %v257_v31 = vmul.f32 %v3521_v50, %v216_v19  ;;  %v619_v49 = vmul.f32 %v3535_v54, %v579_v30 }
 0x173   :  { %v258_v22 = vmul.f32 %v3521_v50, %v221_v37 }
 0x174   :  { %v3830_v34 = vpop.permute.xlu1 %205  ;;  %v704_v48 = vadd.f32 %v703_v16, %v702_v43 }
 0x175   :  { %v255_v57 = vmul.f32 %v3521_v50, %v3830_v34  ;;  %v421_v34 = vmul.f32 %v3530_v53, %v5379_v12 }
 0x176   :  { %v706_v32 = vadd.f32 %v705_v39, %v704_v48  ;;  %v3174_v39 = vld [vmem:[%s5296_s2 + $0x10] sm:$0xff]  }
 0x179   :  { %v567_v52 = vpop.permute.xlu1 %566 }
 0x17a   :  { %v616_v58 = vmul.f32 %v3535_v54, %v567_v52  ;;  %v452_v52 = vadd.f32 %v420_v18, %v255_v57 }
 0x17c   :  { %v3921_v27 = vadd.f32 %v616_v58, %v451_v7 }
 0x17e   :  { %v211_v51 = vpop.permute.xlu1 %210  ;;  %v707_v21 = vsel %vm653_vm0, %v3921_v27, 0.0 }
 0x17f   :  { %v256_v0 = vmul.f32 %v3521_v50, %v211_v51  ;;  %v708_v57 = vadd.f32 %v707_v21, %v706_v32 }
 0x181   :  { %v453_v15 = vadd.f32 %v421_v34, %v256_v0  ;;  %v3172_v34 = vld [vmem:[%s5296_s2] sm:$0xff]  }
 0x182   :  { %3025 = vmatprep.subr.bf16.mxu0 %v3172_v34 }
 0x183   :  { %v571_v13 = vpop.permute.xlu1 %570  ;;  %3026 = vmatpush3.bf16.msra.mxu0 %v3172_v34 }
 0x184   :  { %v617_v44 = vmul.f32 %v3535_v54, %v571_v13 }
 0x186   :  { %v3927_v38 = vadd.f32 %v617_v44, %v452_v52 }
 0x188   :  { %v382_v35 = vpop.permute.xlu1 %381  ;;  %v709_v5 = vsel %vm653_vm0, %v3927_v38, 0.0 }
 0x189   :  { %v422_v51 = vmul.f32 %v3530_v53, %v382_v35  ;;  %v710_v19 = vadd.f32 %v709_v5, %v708_v57 }
 0x18b   :  { %v454_v36 = vadd.f32 %v422_v51, %v257_v31 }
 0x18d   :  { %v575_v47 = vpop.permute.xlu1 %574  ;;  %v3943_v4 = vadd.f32 %v619_v49, %v454_v36 }
 0x18e   :  { %v618_v13 = vmul.f32 %v3535_v54, %v575_v47 }
 0x18f   :  { %v713_v43 = vsel %vm653_vm0, %v3943_v4, 0.0 }
 0x190   :  { %v3934_v45 = vadd.f32 %v618_v13, %v453_v15  ;;  %v3175_v15 = vld [vmem:[%s5296_s2 + $0x18] sm:$0xff]  }
 0x192   :  { %v386_v62 = vpop.permute.xlu1 %385  ;;  %v711_v58 = vsel %vm653_vm0, %v3934_v45, 0.0 }
 0x193   :  { %v423_v35 = vmul.f32 %v3530_v53, %v386_v62  ;;  %v712_v18 = vadd.f32 %v711_v58, %v710_v19 }
 0x195   :  { %v455_v0 = vadd.f32 %v423_v35, %v258_v22  ;;  %v714_v53 = vadd.f32 %v713_v43, %v712_v18 }
 0x197   :  { %v583_v7 = vpop.permute.xlu1 %582 }
 0x198   :  { %v620_v44 = vmul.f32 %v3535_v54, %v583_v7  ;;  %v3173_v54 = vld [vmem:[%s5296_s2 + $0x8] sm:$0xff]  }
 0x199   :  { %3027 = vmatprep.subr.bf16.mxu0 %v3173_v54 }
 0x19a   :  { %v3948_v12 = vadd.f32 %v620_v44, %v455_v0  ;;  %3028 = vmatpush3.bf16.msra.mxu0 %v3173_v54 }
 0x19b   :  { %3029 = vmatprep.subr.bf16.mxu0 %v3174_v39 }
 0x19c   :  { %v715_v50 = vsel %vm653_vm0, %v3948_v12, 0.0 }
 0x19d   :  { %v716_v37 = vadd.f32 %v715_v50, %v714_v53 }
 0x19e   :  { %3030 = vmatpush3.bf16.msra.mxu0 %v3174_v39 }
 0x19f   :  { %v717_v52 = vrot.slane %v716_v37, 4  ;;  %3031 = vmatprep.subr.bf16.mxu0 %v3175_v15 }
 0x1a1   :  { %v718_v16 = vadd.f32 %v717_v52, %v716_v37 }
 0x1a2   :  { %3032 = vmatpush3.bf16.msra.mxu0 %v3175_v15 }
 0x1a3   :  { %v719_v47 = vrot.slane %v718_v16, 2 }
 0x1a5   :  { %v720_v51 = vadd.f32 %v719_v47, %v718_v16 }
 0x1a7   :  { %v721_v13 = vrot.slane %v720_v51, 1 }
 0x1a9   :  { %v722_v48 = vadd.f32 %v721_v13, %v720_v51 }
 0x1ab   :  { %v3964_v30 = vmul.f32 0.00390625, %v722_v48 }
 0x1ad   :  { %v724_v31 = vsub.f32 %v3718_v42, %v3964_v30  ;;  %v725_v21 = vsub.f32 %v3724_v29, %v3964_v30  ;;  %v726_v32 = vsub.f32 %v3732_v1, %v3964_v30  ;;  %v727_v5 = vsub.f32 %v3740_v46, %v3964_v30 }
 0x1ae   :  { %v728_v62 = vsub.f32 %v3744_v17, %v3964_v30  ;;  %v729_v58 = vsub.f32 %v3543_v60, %v3964_v30  ;;  %v730_v7 = vsub.f32 %v3558_v8, %v3964_v30  ;;  %v731_v34 = vsub.f32 %v3774_v20, %v3964_v30 }
 0x1af   :  { %v756_v36 = vmul.f32 %v724_v31, %v724_v31  ;;  %v757_v49 = vmul.f32 %v725_v21, %v725_v21  ;;  %v758_v57 = vmul.f32 %v726_v32, %v726_v32  ;;  %v759_v35 = vmul.f32 %v727_v5, %v727_v5 }
 0x1b0   :  { %v760_v0 = vmul.f32 %v728_v62, %v728_v62  ;;  %v761_v53 = vmul.f32 %v729_v58, %v729_v58  ;;  %v732_v54 = vsub.f32 %v3790_v6, %v3964_v30  ;;  %v762_v52 = vmul.f32 %v730_v7, %v730_v7 }
 0x1b1   :  { %v788_v19 = vsel %vm653_vm0, %v756_v36, 0.0  ;;  %v789_v22 = vsel %vm653_vm0, %v757_v49, 0.0  ;;  %v791_v44 = vsel %vm653_vm0, %v758_v57, 0.0  ;;  %v793_v50 = vsel %vm653_vm0, %v759_v35, 0.0 }
 0x1b2   :  { %v790_v18 = vadd.f32 %v789_v22, %v788_v19  ;;  %v795_v16 = vsel %vm653_vm0, %v760_v0, 0.0  ;;  %v733_v47 = vsub.f32 %v3792_v23, %v3964_v30  ;;  %v763_v15 = vmul.f32 %v731_v34, %v731_v34 }
 0x1b3   :  { %v797_v51 = vsel %vm653_vm0, %v761_v53, 0.0  ;;  %v734_v48 = vsub.f32 %v3794_v61, %v3964_v30  ;;  %v764_v31 = vmul.f32 %v732_v54, %v732_v54  ;;  %v799_v21 = vsel %vm653_vm0, %v762_v52, 0.0 }
 0x1b4   :  { %v792_v43 = vadd.f32 %v791_v44, %v790_v18  ;;  %v735_v5 = vsub.f32 %v3643_v14, %v3964_v30  ;;  %v765_v36 = vmul.f32 %v733_v47, %v733_v47  ;;  %v801_v49 = vsel %vm653_vm0, %v763_v15, 0.0 }
 0x1b5   :  { %v736_v57 = vsub.f32 %v3633_v55, %v3964_v30  ;;  %v766_v58 = vmul.f32 %v734_v48, %v734_v48  ;;  %v803_v35 = vsel %vm653_vm0, %v764_v31, 0.0  ;;  %v737_v22 = vsub.f32 %v3647_v25, %v3964_v30 }
 0x1b6   :  { %v794_v37 = vadd.f32 %v793_v50, %v792_v43  ;;  %v767_v18 = vmul.f32 %v735_v5, %v735_v5  ;;  %v805_v7 = vsel %vm653_vm0, %v765_v36, 0.0  ;;  %v738_v44 = vsub.f32 %v3662_v59, %v3964_v30 }
 0x1b7   :  { %v768_v43 = vmul.f32 %v736_v57, %v736_v57  ;;  %v807_v34 = vsel %vm653_vm0, %v766_v58, 0.0  ;;  %v739_v50 = vsub.f32 %v3658_v11, %v3964_v30 }
 0x1b8   :  { %v796_v39 = vadd.f32 %v795_v16, %v794_v37  ;;  %v769_v37 = vmul.f32 %v737_v22, %v737_v22  ;;  %v809_v54 = vsel %vm653_vm0, %v767_v18, 0.0  ;;  %v740_v16 = vsub.f32 %v3671_v3, %v3964_v30 }
 0x1b9   :  { %v811_v47 = vsel %vm653_vm0, %v768_v43, 0.0 }
 0x1ba   :  { %v798_v13 = vadd.f32 %v797_v51, %v796_v39  ;;  %v770_v39 = vmul.f32 %v738_v44, %v738_v44  ;;  %v741_v51 = vsub.f32 %v3682_v2, %v3964_v30  ;;  %v813_v48 = vsel %vm653_vm0, %v769_v37, 0.0 }
 0x1bc   :  { %v800_v32 = vadd.f32 %v799_v21, %v798_v13  ;;  %v771_v13 = vmul.f32 %v739_v50, %v739_v50  ;;  %v742_v21 = vsub.f32 %v3840_v41, %v3964_v30  ;;  %v815_v5 = vsel %vm653_vm0, %v770_v39, 0.0 }
 0x1be   :  { %v802_v62 = vadd.f32 %v801_v49, %v800_v32  ;;  %v772_v32 = vmul.f32 %v740_v16, %v740_v16  ;;  %v743_v49 = vsub.f32 %v3846_v9, %v3964_v30  ;;  %v817_v57 = vsel %vm653_vm0, %v771_v13, 0.0 }
 0x1c0   :  { %v804_v19 = vadd.f32 %v803_v35, %v802_v62  ;;  %v773_v62 = vmul.f32 %v741_v51, %v741_v51  ;;  %v744_v35 = vsub.f32 %v3866_v33, %v3964_v30  ;;  %v819_v22 = vsel %vm653_vm0, %v772_v32, 0.0 }
 0x1c2   :  { %v806_v0 = vadd.f32 %v805_v7, %v804_v19  ;;  %v774_v19 = vmul.f32 %v742_v21, %v742_v21  ;;  %v745_v7 = vsub.f32 %v3868_v10, %v3964_v30  ;;  %v821_v44 = vsel %vm653_vm0, %v773_v62, 0.0 }
 0x1c4   :  { %v808_v53 = vadd.f32 %v807_v34, %v806_v0  ;;  %v775_v0 = vmul.f32 %v743_v49, %v743_v49  ;;  %v746_v34 = vsub.f32 %v3876_v56, %v3964_v30  ;;  %v823_v50 = vsel %vm653_vm0, %v774_v19, 0.0 }
 0x1c6   :  { %v810_v52 = vadd.f32 %v809_v54, %v808_v53  ;;  %v776_v53 = vmul.f32 %v744_v35, %v744_v35  ;;  %v747_v54 = vsub.f32 %v3890_v24, %v3964_v30  ;;  %v825_v16 = vsel %vm653_vm0, %v775_v0, 0.0 }
 0x1c8   :  { %v812_v15 = vadd.f32 %v811_v47, %v810_v52  ;;  %v777_v52 = vmul.f32 %v745_v7, %v745_v7  ;;  %v748_v47 = vsub.f32 %v3894_v28, %v3964_v30  ;;  %v827_v51 = vsel %vm653_vm0, %v776_v53, 0.0 }
 0x1ca   :  { %v814_v31 = vadd.f32 %v813_v48, %v812_v15  ;;  %v778_v15 = vmul.f32 %v746_v34, %v746_v34  ;;  %v749_v48 = vsub.f32 %v3911_v63, %v3964_v30  ;;  %v829_v21 = vsel %vm653_vm0, %v777_v52, 0.0 }
 0x1cc   :  { %v816_v36 = vadd.f32 %v815_v5, %v814_v31  ;;  %v779_v31 = vmul.f32 %v747_v54, %v747_v54  ;;  %v750_v5 = vsub.f32 %v3913_v40, %v3964_v30  ;;  %v831_v49 = vsel %vm653_vm0, %v778_v15, 0.0 }
 0x1ce   :  { %v818_v58 = vadd.f32 %v817_v57, %v816_v36  ;;  %v780_v36 = vmul.f32 %v748_v47, %v748_v47  ;;  %v751_v57 = vsub.f32 %v3921_v27, %v3964_v30  ;;  %v833_v35 = vsel %vm653_vm0, %v779_v31, 0.0 }
 0x1d0   :  { %v820_v18 = vadd.f32 %v819_v22, %v818_v58  ;;  %v781_v58 = vmul.f32 %v749_v48, %v749_v48  ;;  %v752_v22 = vsub.f32 %v3927_v38, %v3964_v30  ;;  %v835_v7 = vsel %vm653_vm0, %v780_v36, 0.0 }
 0x1d2   :  { %v822_v43 = vadd.f32 %v821_v44, %v820_v18  ;;  %v782_v18 = vmul.f32 %v750_v5, %v750_v5  ;;  %v753_v44 = vsub.f32 %v3934_v45, %v3964_v30  ;;  %v837_v34 = vsel %vm653_vm0, %v781_v58, 0.0 }
 0x1d4   :  { %v824_v37 = vadd.f32 %v823_v50, %v822_v43  ;;  %v783_v43 = vmul.f32 %v751_v57, %v751_v57  ;;  %v754_v50 = vsub.f32 %v3943_v4, %v3964_v30  ;;  %v839_v54 = vsel %vm653_vm0, %v782_v18, 0.0 }
 0x1d6   :  { %v826_v39 = vadd.f32 %v825_v16, %v824_v37  ;;  %v784_v37 = vmul.f32 %v752_v22, %v752_v22  ;;  %v755_v16 = vsub.f32 %v3948_v12, %v3964_v30  ;;  %v841_v47 = vsel %vm653_vm0, %v783_v43, 0.0  ;;  %v858_v43 = vld [vmem:[%s5297_s7] ss:$0 sm:$0xff] }
 0x1d8   :  { %v828_v13 = vadd.f32 %v827_v51, %v826_v39  ;;  %v785_v39 = vmul.f32 %v753_v44, %v753_v44  ;;  %v786_v51 = vmul.f32 %v754_v50, %v754_v50  ;;  %v787_v31 = vmul.f32 %v755_v16, %v755_v16  ;;  %v859_v50 = vld [vmem:[%s5297_s7 + $0x1] ss:$0 sm:$0xff] }
 0x1da   :  { %v830_v32 = vadd.f32 %v829_v21, %v828_v13  ;;  %v843_v13 = vsel %vm653_vm0, %v784_v37, 0.0  ;;  %v845_v21 = vsel %vm653_vm0, %v785_v39, 0.0  ;;  %v847_v5 = vsel %vm653_vm0, %v786_v51, 0.0 }
 0x1dc   :  { %v832_v62 = vadd.f32 %v831_v49, %v830_v32  ;;  %v849_v49 = vsel %vm653_vm0, %v787_v31, 0.0 }
 0x1de   :  { %v834_v19 = vadd.f32 %v833_v35, %v832_v62 }
 0x1e0   :  { %v836_v0 = vadd.f32 %v835_v7, %v834_v19 }
 0x1e2   :  { %v838_v53 = vadd.f32 %v837_v34, %v836_v0 }
 0x1e4   :  { %v840_v52 = vadd.f32 %v839_v54, %v838_v53 }
 0x1e6   :  { %v842_v15 = vadd.f32 %v841_v47, %v840_v52 }
 0x1e8   :  { %v844_v48 = vadd.f32 %v843_v13, %v842_v15 }
 0x1ea   :  { %v846_v32 = vadd.f32 %v845_v21, %v844_v48 }
 0x1ec   :  { %v848_v36 = vadd.f32 %v847_v5, %v846_v32 }
 0x1ee   :  { %v850_v62 = vadd.f32 %v849_v49, %v848_v36 }
 0x1f0   :  { %v851_v57 = vrot.slane %v850_v62, 4 }
 0x1f2   :  { %v852_v58 = vadd.f32 %v851_v57, %v850_v62 }
 0x1f4   :  { %v853_v35 = vrot.slane %v852_v58, 2 }
 0x1f6   :  { %v854_v19 = vadd.f32 %v853_v35, %v852_v58 }
 0x1f8   :  { %v855_v22 = vrot.slane %v854_v19, 1 }
 0x1fa   :  { %v856_v18 = vadd.f32 %v855_v22, %v854_v19 }
 0x1fc   :  { %v857_v7 = vmul.f32 0.00390625, %v856_v18 }
 0x1fe   :  { %v860_v0 = vadd.f32 1e-05, %v857_v7 }
 0x200   :  { %3228 = vrsqrt.f32 %v860_v0 }
 0x20a   :  { %v3229_v44 = vpop.eup %3228 }
 0x20b   :  { %v4065_v34 = vmul.f32 %v3229_v44, %v858_v43 }
 0x20d   :  { %v863_v53 = vmul.f32 %v4065_v34, %v3964_v30  ;;  %v867_v54 = vmul.f32 %v4065_v34, %v3732_v1  ;;  %v868_v52 = vmul.f32 %v4065_v34, %v3740_v46  ;;  %v869_v16 = vmul.f32 %v4065_v34, %v3744_v17 }
 0x20e   :  { %v870_v39 = vmul.f32 %v4065_v34, %v3543_v60  ;;  %v865_v30 = vmul.f32 %v4065_v34, %v3718_v42  ;;  %v866_v47 = vmul.f32 %v4065_v34, %v3724_v29  ;;  %v871_v29 = vmul.f32 %v4065_v34, %v3558_v8 }
 0x20f   :  { %v4072_v37 = vsub.f32 %v859_v50, %v863_v53  ;;  %v872_v5 = vmul.f32 %v4065_v34, %v3774_v20  ;;  %v873_v49 = vmul.f32 %v4065_v34, %v3790_v6  ;;  %v874_v62 = vmul.f32 %v4065_v34, %v3792_v23 }
 0x210   :  { %v875_v7 = vmul.f32 %v4065_v34, %v3794_v61  ;;  %v876_v0 = vmul.f32 %v4065_v34, %v3643_v14  ;;  %v877_v44 = vmul.f32 %v4065_v34, %v3633_v55  ;;  %v878_v43 = vmul.f32 %v4065_v34, %v3647_v25 }
 0x211   :  { %v899_v15 = vadd.f32 %v867_v54, %v4072_v37  ;;  %v900_v51 = vadd.f32 %v868_v52, %v4072_v37  ;;  %v901_v1 = vadd.f32 %v869_v16, %v4072_v37  ;;  %v902_v46 = vadd.f32 %v870_v39, %v4072_v37 }
 0x212   :  { %v897_v13 = vadd.f32 %v865_v30, %v4072_v37  ;;  %v898_v17 = vadd.f32 %v866_v47, %v4072_v37  ;;  %v903_v58 = vadd.f32 %v871_v29, %v4072_v37  ;;  %v904_v35 = vadd.f32 %v872_v5, %v4072_v37 }
 0x213   :  { %v931_v48 = vmax.f32 %v899_v15, 0.0  ;;  %v932_v60 = vmax.f32 %v900_v51, 0.0  ;;  %v933_v42 = vmax.f32 %v901_v1, 0.0  ;;  %v934_v32 = vmax.f32 %v902_v46, 0.0 }
 0x214   :  { %v929_v31 = vmax.f32 %v897_v13, 0.0  ;;  %v930_v21 = vmax.f32 %v898_v17, 0.0  ;;  %v905_v8 = vadd.f32 %v873_v49, %v4072_v37  ;;  %v906_v22 = vadd.f32 %v874_v62, %v4072_v37 }
 0x215   :  { %v962_v36 = vpack.c.bf16 %v932_v60, %v931_v48  ;;  %v963_v19 = vpack.c.bf16 %v934_v32, %v933_v42  ;;  %v935_v20 = vmax.f32 %v903_v58, 0.0  ;;  %v936_v6 = vmax.f32 %v904_v35, 0.0 }
 0x216   :  { %v961_v57 = vpack.c.bf16 %v930_v21, %v929_v31  ;;  %v937_v18 = vmax.f32 %v905_v8, 0.0  ;;  %v938_v23 = vmax.f32 %v906_v22, 0.0  ;;  %v907_v50 = vadd.f32 %v875_v7, %v4072_v37 }
 0x217   :  { %v964_v53 = vpack.c.bf16 %v936_v6, %v935_v20  ;;  %v908_v54 = vadd.f32 %v876_v0, %v4072_v37  ;;  %v909_v52 = vadd.f32 %v877_v44, %v4072_v37  ;;  %v910_v16 = vadd.f32 %v878_v43, %v4072_v37 }
 0x218   :  { %3033 = vmatprep.mubr.msk.bf16.mxu0 %vm653_vm0, %v961_v57  ;;  %v965_v39 = vpack.c.bf16 %v938_v23, %v937_v18  ;;  %v939_v14 = vmax.f32 %v907_v50, 0.0  ;;  %v879_v25 = vmul.f32 %v4065_v34, %v3662_v59  ;;  %v880_v47 = vmul.f32 %v4065_v34, %v3658_v11 }
 0x219   :  { %3034 = vmatmul.mubr.msk.bf16.vlgmr.msra.gmra.mrb[0].mxu0 %vm653_vm0, %v962_v36  ;;  %v940_v61 = vmax.f32 %v908_v54, 0.0  ;;  %v941_v55 = vmax.f32 %v909_v52, 0.0  ;;  %v942_v30 = vmax.f32 %v910_v16, 0.0  ;;  %v881_v15 = vmul.f32 %v4065_v34, %v3671_v3 }
 0x21a   :  { %3037 = vmatprep.mubr.msk.bf16.mxu0 %vm653_vm0, %v963_v19  ;;  %v882_v51 = vmul.f32 %v4065_v34, %v3682_v2  ;;  %v911_v1 = vadd.f32 %v879_v25, %v4072_v37  ;;  %v912_v13 = vadd.f32 %v880_v47, %v4072_v37  ;;  %v883_v2 = vmul.f32 %v4065_v34, %v3840_v41 }
 0x21b   :  { %v966_v46 = vpack.c.bf16 %v940_v61, %v939_v14  ;;  %v967_v48 = vpack.c.bf16 %v942_v30, %v941_v55  ;;  %v913_v60 = vadd.f32 %v881_v15, %v4072_v37  ;;  %v884_v21 = vmul.f32 %v4065_v34, %v3846_v9 }
 0x21c   :  { %v914_v17 = vadd.f32 %v882_v51, %v4072_v37  ;;  %v943_v11 = vmax.f32 %v911_v1, 0.0  ;;  %v944_v59 = vmax.f32 %v912_v13, 0.0  ;;  %v885_v42 = vmul.f32 %v4065_v34, %v3866_v33 }
 0x21d   :  { %v945_v3 = vmax.f32 %v913_v60, 0.0  ;;  %v886_v32 = vmul.f32 %v4065_v34, %v3868_v10  ;;  %v915_v29 = vadd.f32 %v883_v2, %v4072_v37  ;;  %v916_v5 = vadd.f32 %v884_v21, %v4072_v37 }
 0x21e   :  { %v946_v31 = vmax.f32 %v914_v17, 0.0  ;;  %v968_v36 = vpack.c.bf16 %v944_v59, %v943_v11  ;;  %v917_v62 = vadd.f32 %v885_v42, %v4072_v37  ;;  %v887_v10 = vmul.f32 %v4065_v34, %v3876_v56 }
 0x21f   :  { %v918_v57 = vadd.f32 %v886_v32, %v4072_v37  ;;  %v947_v41 = vmax.f32 %v915_v29, 0.0  ;;  %v948_v9 = vmax.f32 %v916_v5, 0.0  ;;  %v888_v35 = vmul.f32 %v4065_v34, %v3890_v24 }
 0x220   :  { %v969_v49 = vpack.c.bf16 %v946_v31, %v945_v3  ;;  %v949_v33 = vmax.f32 %v917_v62, 0.0  ;;  %v889_v19 = vmul.f32 %v4065_v34, %v3894_v28  ;;  %v890_v8 = vmul.f32 %v4065_v34, %v3911_v63 }
 0x221   :  { %3038 = vmatmul.mubr.msk.bf16.gmra.mrb[4].mxu0 %vm653_vm0, %v964_v53  ;;  %v950_v58 = vmax.f32 %v918_v57, 0.0  ;;  %v919_v22 = vadd.f32 %v887_v10, %v4072_v37  ;;  %v920_v20 = vadd.f32 %v888_v35, %v4072_v37  ;;  %v970_v6 = vpack.c.bf16 %v948_v9, %v947_v41 }
 0x222   :  { %3041 = vmatprep.mubr.msk.bf16.mxu0 %vm653_vm0, %v965_v39  ;;  %v921_v18 = vadd.f32 %v889_v19, %v4072_v37  ;;  %v922_v7 = vadd.f32 %v890_v8, %v4072_v37  ;;  %v891_v63 = vmul.f32 %v4065_v34, %v3913_v40  ;;  %v892_v44 = vmul.f32 %v4065_v34, %v3921_v27 }
 0x223   :  { %v971_v23 = vpack.c.bf16 %v950_v58, %v949_v33  ;;  %v951_v56 = vmax.f32 %v919_v22, 0.0  ;;  %v952_v24 = vmax.f32 %v920_v20, 0.0  ;;  %v893_v43 = vmul.f32 %v4065_v34, %v3927_v38 }
 0x224   :  { %v953_v28 = vmax.f32 %v921_v18, 0.0  ;;  %v954_v0 = vmax.f32 %v922_v7, 0.0  ;;  %v894_v53 = vmul.f32 %v4065_v34, %v3934_v45  ;;  %v924_v50 = vadd.f32 %v892_v44, %v4072_v37 }
 0x225   :  { %v972_v54 = vpack.c.bf16 %v952_v24, %v951_v56  ;;  %v923_v52 = vadd.f32 %v891_v63, %v4072_v37  ;;  %v925_v16 = vadd.f32 %v893_v43, %v4072_v37  ;;  %v896_v45 = vmul.f32 %v4065_v34, %v3948_v12 }
 0x226   :  { %v926_v39 = vadd.f32 %v894_v53, %v4072_v37  ;;  %v973_v14 = vpack.c.bf16 %v954_v0, %v953_v28  ;;  %v956_v27 = vmax.f32 %v924_v50, 0.0  ;;  %v895_v55 = vmul.f32 %v4065_v34, %v3943_v4 }
 0x227   :  { %v955_v40 = vmax.f32 %v923_v52, 0.0  ;;  %v957_v38 = vmax.f32 %v925_v16, 0.0  ;;  %v928_v30 = vadd.f32 %v896_v45, %v4072_v37  ;;  %v3176_v52 = vld [vmem:[%s5298_s3 + $0x4] ss:$8 sps:$4 sm:$0xff]   ;;  %v3179_v45 = vld [vmem:[%s5298_s3 + $0x14] ss:$8 sps:$4 sm:$0xff]  }
 0x228   :  { %v958_v61 = vmax.f32 %v926_v39, 0.0  ;;  %v927_v25 = vadd.f32 %v895_v55, %v4072_v37  ;;  %1573 = vmatprep.subr.bf16.mxu1 %v3176_v52 }
 0x229   :  { %3042 = vmatmul.mubr.msk.bf16.gmra.mrb[8].mxu0 %vm653_vm0, %v966_v46  ;;  %v974_v47 = vpack.c.bf16 %v956_v27, %v955_v40  ;;  %v960_v1 = vmax.f32 %v928_v30, 0.0  ;;  %v3181_v30 = vld [vmem:[%s5298_s3 + $0x10] ss:$8 sps:$4 sm:$0xff]  }
 0x22a   :  { %3045 = vmatprep.mubr.msk.bf16.mxu0 %vm653_vm0, %v967_v48  ;;  %v975_v15 = vpack.c.bf16 %v958_v61, %v957_v38  ;;  %v959_v51 = vmax.f32 %v927_v25, 0.0 }
 0x22c   :  { %v976_v46 = vpack.c.bf16 %v960_v1, %v959_v51  ;;  %v3184_v1 = vld [vmem:[%s5298_s3 + $0x20] ss:$8 sps:$4 sm:$0xff]  }
 0x231   :  { %3046 = vmatmul.mubr.msk.bf16.gmra.mrb[12].mxu0 %vm653_vm0, %v968_v36 }
 0x232   :  { %3049 = vmatprep.mubr.msk.bf16.mxu0 %vm653_vm0, %v969_v49 }
 0x239   :  { %3050 = vmatmul.mubr.msk.bf16.gmra.mrb[16].mxu0 %vm653_vm0, %v970_v6 }
 0x23a   :  { %3053 = vmatprep.mubr.msk.bf16.mxu0 %vm653_vm0, %v971_v23 }
 0x241   :  { %3054 = vmatmul.mubr.msk.bf16.gmra.mrb[20].mxu0 %vm653_vm0, %v972_v54 }
 0x242   :  { %3057 = vmatprep.mubr.msk.bf16.mxu0 %vm653_vm0, %v973_v14  ;;  %v3178_v14 = vld [vmem:[%s5298_s3] ss:$8 sps:$4 sm:$0xff]  }
 0x243   :  { %1574 = vmatpush1.bf16.msra.mxu1 %v3178_v14 }
 0x244   :  { %1575 = vmatprep.subr.bf16.mxu1 %v3179_v45 }
 0x247   :  { %1576 = vmatpush1.bf16.msra.mxu1 %v3181_v30 }
 0x249   :  { %3058 = vmatmul.mubr.msk.bf16.gmra.mrb[24].mxu0 %vm653_vm0, %v974_v47  ;;  %v3182_v47 = vld [vmem:[%s5298_s3 + $0x24] ss:$8 sps:$4 sm:$0xff]  }
 0x24a   :  { %3061 = vmatprep.mubr.msk.bf16.mxu0 %vm653_vm0, %v975_v15  ;;  %1577 = vmatprep.subr.bf16.mxu1 %v3182_v47 }
 0x24b   :  { %1578 = vmatpush1.bf16.msra.mxu1 %v3184_v1 }
 0x251   :  { %3062 = vmatmul.mubr.msk.bf16.gmra.mrb[28].mxu0 %vm653_vm0, %v976_v46 }
 0x2ec   :  { %v4186_v13 = vpop.f32.mrb[0].mxu0 }
 0x2ed   :  { %v4188_v12 = vpop.f32.mrb[1].mxu0 }
 0x2ee   :  { %v4190_v4 = vpop.f32.mrb[2].mxu0 }
 0x2ef   :  { %v4192_v34 = vpop.f32.mrb[3].mxu0 }
 0x2f0   :  { %v1218_v37 = vadd.f32 %v4192_v34, %v4188_v12 }
 0x2f2   :  { %v1219_v17 = vadd.f32 %v4186_v13, %v1218_v37 }
 0x2f4   :  { %v4197_v48 = vpop.f32.mrb[4].mxu0  ;;  %v1220_v60 = vadd.f32 %v4190_v4, %v1219_v17 }
 0x2f5   :  { %v4200_v11 = vpop.f32.mrb[5].mxu0 }
 0x2f6   :  { %v1221_v59 = vadd.f32 %v1220_v60, %v4200_v11  ;;  %v4203_v3 = vpop.f32.mrb[6].mxu0 }
 0x2f7   :  { %v4205_v31 = vpop.f32.mrb[7].mxu0 }
 0x2f8   :  { %v1222_v2 = vadd.f32 %v1221_v59, %v4205_v31  ;;  %v3185_v59 = vld [vmem:[%s5298_s3 + $0x34] ss:$8 sps:$4 sm:$0xff]  }
 0x2f9   :  { %1579 = vmatprep.subr.bf16.mxu1 %v3185_v59 }
 0x2fa   :  { %v1223_v21 = vadd.f32 %v4197_v48, %v1222_v2 }
 0x2fc   :  { %v4209_v42 = vpop.f32.mrb[8].mxu0  ;;  %v1224_v32 = vadd.f32 %v4203_v3, %v1223_v21  ;;  %v3187_v21 = vld [vmem:[%s5298_s3 + $0x30] ss:$8 sps:$4 sm:$0xff]  }
 0x2fd   :  { %v4212_v29 = vpop.f32.mrb[9].mxu0  ;;  %1580 = vmatpush1.bf16.msra.mxu1 %v3187_v21 }
 0x2fe   :  { %v1225_v5 = vadd.f32 %v1224_v32, %v4212_v29  ;;  %v4215_v36 = vpop.f32.mrb[10].mxu0 }
 0x2ff   :  { %v4217_v49 = vpop.f32.mrb[11].mxu0 }
 0x300   :  { %v1226_v62 = vadd.f32 %v1225_v5, %v4217_v49  ;;  %v3188_v5 = vld [vmem:[%s5298_s3 + $0x44] ss:$8 sps:$4 sm:$0xff]  }
 0x301   :  { %1581 = vmatprep.subr.bf16.mxu1 %v3188_v5 }
 0x302   :  { %v1227_v57 = vadd.f32 %v4209_v42, %v1226_v62 }
 0x304   :  { %v4221_v41 = vpop.f32.mrb[12].mxu0  ;;  %v1228_v9 = vadd.f32 %v4215_v36, %v1227_v57  ;;  %v3190_v57 = vld [vmem:[%s5298_s3 + $0x40] ss:$8 sps:$4 sm:$0xff]  }
 0x305   :  { %v4224_v33 = vpop.f32.mrb[13].mxu0  ;;  %1582 = vmatpush1.bf16.msra.mxu1 %v3190_v57 }
 0x306   :  { %v1229_v58 = vadd.f32 %v1228_v9, %v4224_v33  ;;  %v4227_v10 = vpop.f32.mrb[14].mxu0 }
 0x307   :  { %v4229_v35 = vpop.f32.mrb[15].mxu0 }
 0x308   :  { %v1230_v19 = vadd.f32 %v1229_v58, %v4229_v35  ;;  %v3191_v58 = vld [vmem:[%s5298_s3 + $0x54] ss:$8 sps:$4 sm:$0xff]  }
 0x309   :  { %1583 = vmatprep.subr.bf16.mxu1 %v3191_v58 }
 0x30a   :  { %v1231_v8 = vadd.f32 %v4221_v41, %v1230_v19 }
 0x30c   :  { %v4233_v22 = vpop.f32.mrb[16].mxu0  ;;  %v1232_v20 = vadd.f32 %v4227_v10, %v1231_v8  ;;  %v3193_v8 = vld [vmem:[%s5298_s3 + $0x50] ss:$8 sps:$4 sm:$0xff]  }
 0x30d   :  { %v4236_v6 = vpop.f32.mrb[17].mxu0  ;;  %1584 = vmatpush1.bf16.msra.mxu1 %v3193_v8 }
 0x30e   :  { %v1233_v18 = vadd.f32 %v1232_v20, %v4236_v6  ;;  %v4239_v23 = vpop.f32.mrb[18].mxu0 }
 0x30f   :  { %v4241_v7 = vpop.f32.mrb[19].mxu0 }
 0x310   :  { %v1234_v56 = vadd.f32 %v1233_v18, %v4241_v7  ;;  %v3194_v18 = vld [vmem:[%s5298_s3 + $0x64] ss:$8 sps:$4 sm:$0xff]  }
 0x311   :  { %1585 = vmatprep.subr.bf16.mxu1 %v3194_v18 }
 0x312   :  { %v1235_v24 = vadd.f32 %v4233_v22, %v1234_v56 }
 0x314   :  { %v4245_v28 = vpop.f32.mrb[20].mxu0  ;;  %v1236_v0 = vadd.f32 %v4239_v23, %v1235_v24  ;;  %v3196_v24 = vld [vmem:[%s5298_s3 + $0x60] ss:$8 sps:$4 sm:$0xff]  }
 0x315   :  { %v4248_v63 = vpop.f32.mrb[21].mxu0  ;;  %1586 = vmatpush1.bf16.msra.mxu1 %v3196_v24 }
 0x316   :  { %v1237_v44 = vadd.f32 %v1236_v0, %v4248_v63  ;;  %v4251_v43 = vpop.f32.mrb[22].mxu0  ;;  %v3197_v0 = vld [vmem:[%s5298_s3 + $0x74] ss:$8 sps:$4 sm:$0xff]  }
 0x317   :  { %v4253_v53 = vpop.f32.mrb[23].mxu0  ;;  %1587 = vmatprep.subr.bf16.mxu1 %v3197_v0 }
 0x318   :  { %v1238_v50 = vadd.f32 %v1237_v44, %v4253_v53  ;;  %v3199_v44 = vld [vmem:[%s5298_s3 + $0x70] ss:$8 sps:$4 sm:$0xff]  }
 0x319   :  { %1588 = vmatpush1.bf16.msra.mxu1 %v3199_v44 }
 0x31a   :  { %v1239_v54 = vadd.f32 %v4245_v28, %v1238_v50 }
 0x31c   :  { %v4260_v16 = vpop.f32.mrb[24].mxu0  ;;  %v1240_v39 = vadd.f32 %v4251_v43, %v1239_v54 }
 0x31d   :  { %v4266_v40 = vpop.f32.mrb[25].mxu0 }
 0x31e   :  { %v1241_v27 = vadd.f32 %v1240_v39, %v4266_v40  ;;  %v4269_v38 = vpop.f32.mrb[26].mxu0 }
 0x31f   :  { %v4271_v61 = vpop.f32.mrb[27].mxu0 }
 0x320   :  { %v1242_v55 = vadd.f32 %v1241_v27, %v4271_v61 }
 0x322   :  { %v1243_v25 = vadd.f32 %v4260_v16, %v1242_v55 }
 0x324   :  { %v4284_v15 = vpop.f32.mrb[28].mxu0  ;;  %v1244_v51 = vadd.f32 %v4269_v38, %v1243_v25 }
 0x325   :  { %v4290_v46 = vpop.f32.mrb[29].mxu0 }
 0x326   :  { %v1245_v37 = vadd.f32 %v1244_v51, %v4290_v46  ;;  %v4293_v17 = vpop.f32.mrb[30].mxu0 }
 0x327   :  { %v4295_v60 = vpop.f32.mrb[31].mxu0 }
 0x328   :  { %v1246_v2 = vadd.f32 %v1245_v37, %v4295_v60 }
 0x32a   :  { %v1247_v32 = vadd.f32 %v4284_v15, %v1246_v2 }
 0x32c   :  { %v1248_v62 = vadd.f32 %v4293_v17, %v1247_v32 }
 0x32e   :  { %v1249_v9 = vrot.slane %v1248_v62, 4 }
 0x330   :  { %v1250_v19 = vadd.f32 %v1249_v9, %v1248_v62 }
 0x332   :  { %v1251_v20 = vrot.slane %v1250_v19, 2 }
 0x334   :  { %v1252_v56 = vadd.f32 %v1251_v20, %v1250_v19 }
 0x336   :  { %v1253_v50 = vrot.slane %v1252_v56, 1 }
 0x338   :  { %v1254_v54 = vadd.f32 %v1253_v50, %v1252_v56 }
 0x33a   :  { %v4330_v52 = vmul.f32 0.00390625, %v1254_v54 }
 0x33c   :  { %v1256_v39 = vsub.f32 %v4188_v12, %v4330_v52  ;;  %v1257_v14 = vsub.f32 %v4192_v34, %v4330_v52  ;;  %v1258_v27 = vsub.f32 %v4186_v13, %v4330_v52  ;;  %v1259_v30 = vsub.f32 %v4190_v4, %v4330_v52 }
 0x33d   :  { %v1260_v25 = vsub.f32 %v4200_v11, %v4330_v52  ;;  %v1261_v1 = vsub.f32 %v4205_v31, %v4330_v52  ;;  %v1262_v2 = vsub.f32 %v4197_v48, %v4330_v52  ;;  %v1263_v5 = vsub.f32 %v4203_v3, %v4330_v52 }
 0x33e   :  { %v1288_v45 = vmul.f32 %v1256_v39, %v1256_v39  ;;  %v1289_v55 = vmul.f32 %v1257_v14, %v1257_v14  ;;  %v1290_v47 = vmul.f32 %v1258_v27, %v1258_v27  ;;  %v1291_v37 = vmul.f32 %v1259_v30, %v1259_v30 }
 0x33f   :  { %v1292_v21 = vmul.f32 %v1260_v25, %v1260_v25  ;;  %v1293_v62 = vmul.f32 %v1261_v1, %v1261_v1  ;;  %v1264_v9 = vsub.f32 %v4212_v29, %v4330_v52  ;;  %v1294_v58 = vmul.f32 %v1262_v2, %v1262_v2 }
 0x340   :  { %v1320_v51 = vadd.f32 %v1289_v55, %v1288_v45  ;;  %v1265_v8 = vsub.f32 %v4217_v49, %v4330_v52  ;;  %v1295_v20 = vmul.f32 %v1263_v5, %v1263_v5  ;;  %v1266_v56 = vsub.f32 %v4209_v42, %v4330_v52 }
 0x341   :  { %v1296_v24 = vmul.f32 %v1264_v9, %v1264_v9  ;;  %v1267_v44 = vsub.f32 %v4215_v36, %v4330_v52  ;;  %v1268_v39 = vsub.f32 %v4224_v33, %v4330_v52  ;;  %v1269_v45 = vsub.f32 %v4229_v35, %v4330_v52 }
 0x342   :  { %v1321_v59 = vadd.f32 %v1320_v51, %v1290_v47  ;;  %v1297_v50 = vmul.f32 %v1265_v8, %v1265_v8  ;;  %v1298_v14 = vmul.f32 %v1266_v56, %v1266_v56  ;;  %v1270_v25 = vsub.f32 %v4221_v41, %v4330_v52 }
 0x343   :  { %v1299_v55 = vmul.f32 %v1267_v44, %v1267_v44  ;;  %v1300_v47 = vmul.f32 %v1268_v39, %v1268_v39  ;;  %v1271_v1 = vsub.f32 %v4227_v10, %v4330_v52  ;;  %v1272_v2 = vsub.f32 %v4236_v6, %v4330_v52 }
 0x344   :  { %v1322_v32 = vadd.f32 %v1321_v59, %v1291_v37  ;;  %v1301_v37 = vmul.f32 %v1269_v45, %v1269_v45  ;;  %v1273_v5 = vsub.f32 %v4241_v7, %v4330_v52  ;;  %v1274_v9 = vsub.f32 %v4233_v22, %v4330_v52 }
 0x345   :  { %v1275_v8 = vsub.f32 %v4239_v23, %v4330_v52  ;;  %v1276_v56 = vsub.f32 %v4248_v63, %v4330_v52  ;;  %v1277_v44 = vsub.f32 %v4253_v53, %v4330_v52  ;;  %v1278_v39 = vsub.f32 %v4245_v28, %v4330_v52 }
 0x346   :  { %v1323_v57 = vadd.f32 %v1322_v32, %v1292_v21  ;;  %v1302_v21 = vmul.f32 %v1270_v25, %v1270_v25  ;;  %v1279_v45 = vsub.f32 %v4251_v43, %v4330_v52  ;;  %v1280_v25 = vsub.f32 %v4266_v40, %v4330_v52 }
 0x348   :  { %v1324_v19 = vadd.f32 %v1323_v57, %v1293_v62  ;;  %v1303_v62 = vmul.f32 %v1271_v1, %v1271_v1  ;;  %v1281_v1 = vsub.f32 %v4271_v61, %v4330_v52 }
 0x34a   :  { %v1325_v18 = vadd.f32 %v1324_v19, %v1294_v58  ;;  %v1304_v58 = vmul.f32 %v1272_v2, %v1272_v2  ;;  %v1282_v2 = vsub.f32 %v4260_v16, %v4330_v52 }
 0x34c   :  { %v1326_v0 = vadd.f32 %v1325_v18, %v1295_v20  ;;  %v1305_v20 = vmul.f32 %v1273_v5, %v1273_v5  ;;  %v1283_v5 = vsub.f32 %v4269_v38, %v4330_v52 }
 0x34e   :  { %v1327_v54 = vadd.f32 %v1326_v0, %v1296_v24  ;;  %v1306_v24 = vmul.f32 %v1274_v9, %v1274_v9  ;;  %v1284_v9 = vsub.f32 %v4290_v46, %v4330_v52 }
 0x350   :  { %v1328_v27 = vadd.f32 %v1327_v54, %v1297_v50  ;;  %v1307_v50 = vmul.f32 %v1275_v8, %v1275_v8  ;;  %v1285_v8 = vsub.f32 %v4295_v60, %v4330_v52 }
 0x352   :  { %v1329_v30 = vadd.f32 %v1328_v27, %v1298_v14  ;;  %v1308_v14 = vmul.f32 %v1276_v56, %v1276_v56  ;;  %v1286_v56 = vsub.f32 %v4284_v15, %v4330_v52 }
 0x354   :  { %v1330_v51 = vadd.f32 %v1329_v30, %v1299_v55  ;;  %v1309_v55 = vmul.f32 %v1277_v44, %v1277_v44  ;;  %v1287_v44 = vsub.f32 %v4293_v17, %v4330_v52 }
 0x356   :  { %v1331_v59 = vadd.f32 %v1330_v51, %v1300_v47  ;;  %v1310_v47 = vmul.f32 %v1278_v39, %v1278_v39  ;;  %v1318_v39 = vmul.f32 %v1286_v56, %v1286_v56 }
 0x358   :  { %v1332_v32 = vadd.f32 %v1331_v59, %v1301_v37  ;;  %v1311_v37 = vmul.f32 %v1279_v45, %v1279_v45 }
 0x35a   :  { %v1333_v57 = vadd.f32 %v1332_v32, %v1302_v21  ;;  %v1312_v21 = vmul.f32 %v1280_v25, %v1280_v25 }
 0x35c   :  { %v1334_v19 = vadd.f32 %v1333_v57, %v1303_v62  ;;  %v1313_v62 = vmul.f32 %v1281_v1, %v1281_v1 }
 0x35e   :  { %v1335_v18 = vadd.f32 %v1334_v19, %v1304_v58  ;;  %v1314_v58 = vmul.f32 %v1282_v2, %v1282_v2 }
 0x360   :  { %v1336_v0 = vadd.f32 %v1335_v18, %v1305_v20  ;;  %v1315_v20 = vmul.f32 %v1283_v5, %v1283_v5 }
 0x362   :  { %v1337_v54 = vadd.f32 %v1336_v0, %v1306_v24  ;;  %v1316_v24 = vmul.f32 %v1284_v9, %v1284_v9 }
 0x364   :  { %v1338_v27 = vadd.f32 %v1337_v54, %v1307_v50  ;;  %v1317_v50 = vmul.f32 %v1285_v8, %v1285_v8 }
 0x366   :  { %v1339_v30 = vadd.f32 %v1338_v27, %v1308_v14  ;;  %v1319_v27 = vmul.f32 %v1287_v44, %v1287_v44 }
 0x368   :  { %v1340_v51 = vadd.f32 %v1339_v30, %v1309_v55 }
 0x36a   :  { %v1341_v59 = vadd.f32 %v1340_v51, %v1310_v47 }
 0x36c   :  { %v1342_v32 = vadd.f32 %v1341_v59, %v1311_v37 }
 0x36e   :  { %v1343_v57 = vadd.f32 %v1342_v32, %v1312_v21  ;;  %v1358_v21 = vld [vmem:[%s5297_s7 + $0x2] ss:$0 sm:$0xff] }
 0x370   :  { %v1344_v19 = vadd.f32 %v1343_v57, %v1313_v62  ;;  %v1359_v62 = vld [vmem:[%s5297_s7 + $0x3] ss:$0 sm:$0xff] }
 0x372   :  { %v1345_v18 = vadd.f32 %v1344_v19, %v1314_v58 }
 0x374   :  { %v1346_v0 = vadd.f32 %v1345_v18, %v1315_v20 }
 0x376   :  { %v1347_v54 = vadd.f32 %v1346_v0, %v1316_v24 }
 0x378   :  { %v1348_v14 = vadd.f32 %v1347_v54, %v1317_v50 }
 0x37a   :  { %v1349_v45 = vadd.f32 %v1348_v14, %v1318_v39 }
 0x37c   :  { %v1350_v55 = vadd.f32 %v1349_v45, %v1319_v27 }
 0x37e   :  { %v1351_v30 = vrot.slane %v1350_v55, 4 }
 0x380   :  { %v1352_v25 = vadd.f32 %v1351_v30, %v1350_v55 }
 0x382   :  { %v1353_v47 = vrot.slane %v1352_v25, 2 }
 0x384   :  { %v1354_v51 = vadd.f32 %v1353_v47, %v1352_v25 }
 0x386   :  { %v1355_v1 = vrot.slane %v1354_v51, 1 }
 0x388   :  { %v1356_v37 = vadd.f32 %v1355_v1, %v1354_v51 }
 0x38a   :  { %v1357_v59 = vmul.f32 0.00390625, %v1356_v37 }
 0x38c   :  { %v1360_v2 = vadd.f32 1e-05, %v1357_v59 }
 0x38e   :  { %3230 = vrsqrt.f32 %v1360_v2 }
 0x398   :  { %v3231_v32 = vpop.eup %3230 }
 0x399   :  { %v1362_v5 = vmul.f32 %v3231_v32, %v1358_v21 }
 0x39b   :  { %v1363_v57 = vmul.f32 %v1362_v5, %v4330_v52  ;;  %v1394_v9 = vmul.f32 %v1362_v5, %v4295_v60  ;;  %v1365_v58 = vmul.f32 %v1362_v5, %v4188_v12  ;;  %v1366_v19 = vmul.f32 %v1362_v5, %v4192_v34 }
 0x39c   :  { %v1367_v8 = vmul.f32 %v4186_v13, %v1362_v5  ;;  %v1368_v20 = vmul.f32 %v4190_v4, %v1362_v5  ;;  %v1369_v18 = vmul.f32 %v1362_v5, %v4200_v11  ;;  %v1370_v56 = vmul.f32 %v1362_v5, %v4205_v31 }
 0x39d   :  { %v1364_v24 = vsub.f32 %v1359_v62, %v1363_v57  ;;  %v1371_v0 = vmul.f32 %v4197_v48, %v1362_v5  ;;  %v1372_v44 = vmul.f32 %v4203_v3, %v1362_v5  ;;  %v1373_v52 = vmul.f32 %v1362_v5, %v4212_v29 }
 0x39e   :  { %v1374_v60 = vmul.f32 %v1362_v5, %v4217_v49  ;;  %v1375_v12 = vmul.f32 %v4209_v42, %v1362_v5  ;;  %v1376_v34 = vmul.f32 %v4215_v36, %v1362_v5  ;;  %v1377_v13 = vmul.f32 %v1362_v5, %v4224_v33 }
 0x39f   :  { %v4417_v4 = vadd.f32 %v1394_v9, %v1364_v24  ;;  %v1378_v11 = vmul.f32 %v1362_v5, %v4229_v35  ;;  %v1379_v31 = vmul.f32 %v4221_v41, %v1362_v5  ;;  %v1380_v48 = vmul.f32 %v4227_v10, %v1362_v5 }
 0x3a0   :  { %v1381_v3 = vmul.f32 %v1362_v5, %v4236_v6  ;;  %v1382_v29 = vmul.f32 %v1362_v5, %v4241_v7  ;;  %v1383_v49 = vmul.f32 %v4233_v22, %v1362_v5  ;;  %v1384_v42 = vmul.f32 %v4239_v23, %v1362_v5 }
 0x3a1   :  { %v1385_v36 = vmul.f32 %v1362_v5, %v4248_v63  ;;  %v1386_v33 = vmul.f32 %v1362_v5, %v4253_v53  ;;  %v1387_v50 = vmul.f32 %v4245_v28, %v1362_v5  ;;  %v1388_v35 = vmul.f32 %v4251_v43, %v1362_v5 }
 0x3a2   :  { %v1389_v41 = vmul.f32 %v1362_v5, %v4266_v40  ;;  %v1390_v10 = vmul.f32 %v1362_v5, %v4271_v61  ;;  %v1391_v6 = vmul.f32 %v4260_v16, %v1362_v5  ;;  %v1392_v7 = vmul.f32 %v4269_v38, %v1362_v5 }
 0x3a3   :  { %v1393_v22 = vmul.f32 %v1362_v5, %v4290_v46  ;;  %v1395_v23 = vmul.f32 %v4284_v15, %v1362_v5  ;;  %v1396_v63 = vmul.f32 %v4293_v17, %v1362_v5  ;;  %v1397_v54 = vadd.f32 %v1365_v58, %v1364_v24 }
 0x3a4   :  { %v1398_v53 = vadd.f32 %v1366_v19, %v1364_v24  ;;  %v1399_v39 = vadd.f32 %v1367_v8, %v1364_v24  ;;  %v1400_v28 = vadd.f32 %v1368_v20, %v1364_v24  ;;  %v1401_v14 = vadd.f32 %v1369_v18, %v1364_v24 }
 0x3a5   :  { %v1402_v43 = vadd.f32 %v1370_v56, %v1364_v24  ;;  %v1403_v27 = vadd.f32 %v1371_v0, %v1364_v24  ;;  %v1404_v40 = vadd.f32 %v1372_v44, %v1364_v24  ;;  %v1405_v45 = vadd.f32 %v1373_v52, %v1364_v24 }
 0x3a6   :  { %v1406_v61 = vadd.f32 %v1374_v60, %v1364_v24  ;;  %v1407_v55 = vadd.f32 %v1375_v12, %v1364_v24  ;;  %v1408_v16 = vadd.f32 %v1376_v34, %v1364_v24  ;;  %v1409_v30 = vadd.f32 %v1377_v13, %v1364_v24 }
 0x3a7   :  { %v1410_v38 = vadd.f32 %v1378_v11, %v1364_v24  ;;  %v1411_v25 = vadd.f32 %v1379_v31, %v1364_v24  ;;  %v1412_v46 = vadd.f32 %v1380_v48, %v1364_v24  ;;  %v1413_v47 = vadd.f32 %v1381_v3, %v1364_v24 }
 0x3a8   :  { %v1414_v15 = vadd.f32 %v1382_v29, %v1364_v24  ;;  %v1415_v51 = vadd.f32 %v1383_v49, %v1364_v24  ;;  %v1416_v17 = vadd.f32 %v1384_v42, %v1364_v24  ;;  %v1417_v1 = vadd.f32 %v1385_v36, %v1364_v24 }
 0x3a9   :  { %v1418_v37 = vadd.f32 %v1386_v33, %v1364_v24  ;;  %v1419_v59 = vadd.f32 %v1387_v50, %v1364_v24  ;;  %v1420_v2 = vadd.f32 %v1388_v35, %v1364_v24  ;;  %v1421_v21 = vadd.f32 %v1389_v41, %v1364_v24 }
 0x3aa   :  { %v1422_v32 = vadd.f32 %v1390_v10, %v1364_v24  ;;  %v1423_v5 = vadd.f32 %v1391_v6, %v1364_v24  ;;  %v1424_v62 = vadd.f32 %v1392_v7, %v1364_v24  ;;  %v1425_v57 = vadd.f32 %v1393_v22, %v1364_v24 }
 0x3ab   :  { %v1427_v9 = vadd.f32 %v1395_v23, %v1364_v24  ;;  %v1428_v58 = vadd.f32 %v1396_v63, %v1364_v24  ;;  %v1429_v19 = vmax.f32 %v1397_v54, 0.0  ;;  %v1430_v8 = vmax.f32 %v1398_v53, 0.0 }
 0x3ac   :  { %v1431_v20 = vmax.f32 %v1399_v39, 0.0  ;;  %v1432_v18 = vmax.f32 %v1400_v28, 0.0  ;;  %v1433_v56 = vmax.f32 %v1401_v14, 0.0  ;;  %v1434_v0 = vmax.f32 %v1402_v43, 0.0 }
 0x3ad   :  { %v1461_v44 = vpack.c.bf16 %v1430_v8, %v1429_v19  ;;  %v1435_v52 = vmax.f32 %v1403_v27, 0.0  ;;  %v1436_v60 = vmax.f32 %v1404_v40, 0.0  ;;  %v1437_v12 = vmax.f32 %v1405_v45, 0.0 }
 0x3ae   :  { %v1462_v34 = vpack.c.bf16 %v1432_v18, %v1431_v20  ;;  %v1463_v13 = vpack.c.bf16 %v1434_v0, %v1433_v56  ;;  %v1438_v11 = vmax.f32 %v1406_v61, 0.0  ;;  %v1439_v31 = vmax.f32 %v1407_v55, 0.0 }
 0x3af   :  { %1606 = vmatmul.mubr.bf16.vlgmr.msra.gmra.mrb[0].mxu1 %v1461_v44  ;;  %v1464_v48 = vpack.c.bf16 %v1436_v60, %v1435_v52  ;;  %v1440_v3 = vmax.f32 %v1408_v16, 0.0  ;;  %v1441_v29 = vmax.f32 %v1409_v30, 0.0  ;;  %v1442_v49 = vmax.f32 %v1410_v38, 0.0 }
 0x3b0   :  { %1615 = vmatprep.mubr.bf16.mxu1 %v5373_v26  ;;  %v1465_v24 = vpack.c.bf16 %v1438_v11, %v1437_v12  ;;  %v1443_v42 = vmax.f32 %v1411_v25, 0.0  ;;  %v1444_v36 = vmax.f32 %v1412_v46, 0.0  ;;  %v1445_v33 = vmax.f32 %v1413_v47, 0.0 }
 0x3b1   :  { %v1466_v50 = vpack.c.bf16 %v1440_v3, %v1439_v31  ;;  %v1467_v35 = vpack.c.bf16 %v1442_v49, %v1441_v29  ;;  %v1446_v41 = vmax.f32 %v1414_v15, 0.0  ;;  %v1447_v10 = vmax.f32 %v1415_v51, 0.0 }
 0x3b2   :  { %v1468_v6 = vpack.c.bf16 %v1444_v36, %v1443_v42  ;;  %v1448_v7 = vmax.f32 %v1416_v17, 0.0  ;;  %v1449_v22 = vmax.f32 %v1417_v1, 0.0  ;;  %v1450_v23 = vmax.f32 %v1418_v37, 0.0 }
 0x3b3   :  { %v1469_v63 = vpack.c.bf16 %v1446_v41, %v1445_v33  ;;  %v1451_v54 = vmax.f32 %v1419_v59, 0.0  ;;  %v1452_v53 = vmax.f32 %v1420_v2, 0.0  ;;  %v1453_v39 = vmax.f32 %v1421_v21, 0.0 }
 0x3b4   :  { %v1470_v28 = vpack.c.bf16 %v1448_v7, %v1447_v10  ;;  %v1471_v14 = vpack.c.bf16 %v1450_v23, %v1449_v22  ;;  %v1454_v43 = vmax.f32 %v1422_v32, 0.0  ;;  %v1455_v27 = vmax.f32 %v1423_v5, 0.0 }
 0x3b5   :  { %v1472_v40 = vpack.c.bf16 %v1452_v53, %v1451_v54  ;;  %v1456_v45 = vmax.f32 %v1424_v62, 0.0  ;;  %v1457_v61 = vmax.f32 %v1425_v57, 0.0  ;;  %v1458_v55 = vmax.f32 %v4417_v4, 0.0 }
 0x3b6   :  { %v1473_v16 = vpack.c.bf16 %v1454_v43, %v1453_v39  ;;  %v1459_v30 = vmax.f32 %v1427_v9, 0.0  ;;  %v1460_v38 = vmax.f32 %v1428_v58, 0.0 }
 0x3b7   :  { %1616 = vmatmul.mubr.bf16.gmra.mrb[4].mxu1 %v1462_v34  ;;  %v1474_v25 = vpack.c.bf16 %v1456_v45, %v1455_v27  ;;  %v1475_v46 = vpack.c.bf16 %v1458_v55, %v1457_v61 }
 0x3b8   :  { %1625 = vmatprep.mubr.bf16.mxu1 %v5373_v26  ;;  %v1476_v47 = vpack.c.bf16 %v1460_v38, %v1459_v30 }
 0x3bf   :  { %1626 = vmatmul.mubr.bf16.gmra.mrb[8].mxu1 %v1463_v13 }
 0x3c0   :  { %1635 = vmatprep.mubr.bf16.mxu1 %v5373_v26 }
 0x3c7   :  { %1636 = vmatmul.mubr.bf16.gmra.mrb[12].mxu1 %v1464_v48 }
 0x3c8   :  { %1645 = vmatprep.mubr.bf16.mxu1 %v5373_v26 }
 0x3cf   :  { %1646 = vmatmul.mubr.bf16.gmra.mrb[16].mxu1 %v1465_v24 }
 0x3d0   :  { %1655 = vmatprep.mubr.bf16.mxu1 %v5373_v26 }
 0x3d7   :  { %1656 = vmatmul.mubr.bf16.gmra.mrb[20].mxu1 %v1466_v50 }
 0x3d8   :  { %1665 = vmatprep.mubr.bf16.mxu1 %v5373_v26 }
 0x3df   :  { %1666 = vmatmul.mubr.bf16.gmra.mrb[24].mxu1 %v1467_v35 }
 0x3e0   :  { %1675 = vmatprep.mubr.bf16.mxu1 %v5373_v26 }
 0x3e7   :  { %1676 = vmatmul.mubr.bf16.gmra.mrb[28].mxu1 %v1468_v6 }
 0x3e8   :  { %1685 = vmatprep.mubr.bf16.mxu1 %v5373_v26 }
 0x3ef   :  { %1686 = vmatmul.mubr.bf16.gmra.mrb[32].mxu1 %v1469_v63 }
 0x3f0   :  { %1695 = vmatprep.mubr.bf16.mxu1 %v5373_v26 }
 0x3f7   :  { %1696 = vmatmul.mubr.bf16.gmra.mrb[36].mxu1 %v1470_v28 }
 0x3f8   :  { %1705 = vmatprep.mubr.bf16.mxu1 %v5373_v26 }
 0x3ff   :  { %1706 = vmatmul.mubr.bf16.gmra.mrb[40].mxu1 %v1471_v14 }
 0x400   :  { %1715 = vmatprep.mubr.bf16.mxu1 %v5373_v26 }
 0x407   :  { %1716 = vmatmul.mubr.bf16.gmra.mrb[44].mxu1 %v1472_v40 }
 0x408   :  { %1725 = vmatprep.mubr.bf16.mxu1 %v5373_v26 }
 0x40f   :  { %1726 = vmatmul.mubr.bf16.gmra.mrb[48].mxu1 %v1473_v16 }
 0x410   :  { %1735 = vmatprep.mubr.bf16.mxu1 %v5373_v26 }
 0x417   :  { %1736 = vmatmul.mubr.bf16.gmra.mrb[52].mxu1 %v1474_v25 }
 0x418   :  { %1745 = vmatprep.mubr.bf16.mxu1 %v5373_v26 }
 0x41f   :  { %1746 = vmatmul.mubr.bf16.gmra.mrb[56].mxu1 %v1475_v46 }
 0x420   :  { %1755 = vmatprep.mubr.bf16.mxu1 %v5373_v26 }
 0x427   :  { %1756 = vmatmul.mubr.bf16.gmra.mrb[60].mxu1 %v1476_v47 }
 0x482   :  { %v4453_v4 = vpop.f32.mrb[0].mxu1 }
 0x483   :  { %5380 = vst [vmem:[#allocation4_spill] sm:$0xff] %v4453_v4  ;;  %v4455_v15 = vpop.f32.mrb[1].mxu1 }
 0x484   :  { %v4457_v51 = vpop.f32.mrb[2].mxu1 }
 0x485   :  { %5381 = vst [vmem:[#allocation2_spill] sm:$0xff] %v4457_v51  ;;  %v1766_v17 = vadd.f32 %v4457_v51, %v4453_v4  ;;  %v4461_v1 = vpop.f32.mrb[3].mxu1 }
 0x486   :  { %v1803_v37 = vadd.f32 %v4461_v1, %v4455_v15 }
 0x48a   :  { %v4465_v59 = vpop.f32.mrb[4].mxu1 }
 0x48b   :  { %5382 = vst [vmem:[#allocation3_spill] sm:$0xff] %v4465_v59  ;;  %v1767_v2 = vadd.f32 %v1766_v17, %v4465_v59  ;;  %v4468_v26 = vpop.f32.mrb[5].mxu1 }
 0x48c   :  { %v1804_v21 = vadd.f32 %v1803_v37, %v4468_v26  ;;  %v4471_v32 = vpop.f32.mrb[6].mxu1 }
 0x48d   :  { %5383 = vst [vmem:[#allocation5_spill] sm:$0xff] %v4471_v32  ;;  %v1768_v5 = vadd.f32 %v1767_v2, %v4471_v32  ;;  %v4474_v62 = vpop.f32.mrb[7].mxu1 }
 0x48e   :  { %v1805_v57 = vadd.f32 %v1804_v21, %v4474_v62 }
 0x492   :  { %v4477_v9 = vpop.f32.mrb[8].mxu1 }
 0x493   :  { %v1769_v58 = vadd.f32 %v1768_v5, %v4477_v9  ;;  %v4480_v19 = vpop.f32.mrb[9].mxu1 }
 0x494   :  { %v1806_v8 = vadd.f32 %v1805_v57, %v4480_v19  ;;  %v4483_v20 = vpop.f32.mrb[10].mxu1 }
 0x495   :  { %v1770_v18 = vadd.f32 %v1769_v58, %v4483_v20  ;;  %v4486_v56 = vpop.f32.mrb[11].mxu1 }
 0x496   :  { %v1807_v0 = vadd.f32 %v1806_v8, %v4486_v56 }
 0x49a   :  { %v4489_v44 = vpop.f32.mrb[12].mxu1 }
 0x49b   :  { %v1771_v52 = vadd.f32 %v1770_v18, %v4489_v44  ;;  %v4492_v60 = vpop.f32.mrb[13].mxu1 }
 0x49c   :  { %v1808_v12 = vadd.f32 %v1807_v0, %v4492_v60  ;;  %v4495_v34 = vpop.f32.mrb[14].mxu1 }
 0x49d   :  { %v1772_v13 = vadd.f32 %v1771_v52, %v4495_v34  ;;  %v4498_v11 = vpop.f32.mrb[15].mxu1 }
 0x49e   :  { %v1809_v31 = vadd.f32 %v1808_v12, %v4498_v11 }
 0x4a2   :  { %v4501_v48 = vpop.f32.mrb[16].mxu1 }
 0x4a3   :  { %v1773_v3 = vadd.f32 %v1772_v13, %v4501_v48  ;;  %v4504_v29 = vpop.f32.mrb[17].mxu1 }
 0x4a4   :  { %v1810_v49 = vadd.f32 %v1809_v31, %v4504_v29  ;;  %v4507_v24 = vpop.f32.mrb[18].mxu1 }
 0x4a5   :  { %v1774_v42 = vadd.f32 %v1773_v3, %v4507_v24  ;;  %v4510_v36 = vpop.f32.mrb[19].mxu1 }
 0x4a6   :  { %v1811_v33 = vadd.f32 %v1810_v49, %v4510_v36 }
 0x4aa   :  { %v4513_v50 = vpop.f32.mrb[20].mxu1 }
 0x4ab   :  { %v1775_v35 = vadd.f32 %v1774_v42, %v4513_v50  ;;  %v4516_v41 = vpop.f32.mrb[21].mxu1 }
 0x4ac   :  { %v1812_v10 = vadd.f32 %v1811_v33, %v4516_v41  ;;  %v4519_v6 = vpop.f32.mrb[22].mxu1 }
 0x4ad   :  { %v1776_v7 = vadd.f32 %v1775_v35, %v4519_v6  ;;  %v4522_v22 = vpop.f32.mrb[23].mxu1 }
 0x4ae   :  { %v1813_v23 = vadd.f32 %v1812_v10, %v4522_v22 }
 0x4b2   :  { %v4525_v63 = vpop.f32.mrb[24].mxu1 }
 0x4b3   :  { %5384 = vst [vmem:[#allocation6_spill] sm:$0xff] %v4525_v63  ;;  %v1777_v54 = vadd.f32 %v1776_v7, %v4525_v63  ;;  %v4528_v53 = vpop.f32.mrb[25].mxu1 }
 0x4b4   :  { %v1814_v39 = vadd.f32 %v1813_v23, %v4528_v53  ;;  %v4531_v28 = vpop.f32.mrb[26].mxu1 }
 0x4b5   :  { %5385 = vst [vmem:[#allocation7_spill] sm:$0xff] %v4531_v28  ;;  %v1778_v14 = vadd.f32 %v1777_v54, %v4531_v28  ;;  %v4534_v43 = vpop.f32.mrb[27].mxu1 }
 0x4b6   :  { %5386 = vst [vmem:[#allocation8_spill] sm:$0xff] %v4534_v43  ;;  %v1815_v27 = vadd.f32 %v1814_v39, %v4534_v43 }
 0x4ba   :  { %v4537_v40 = vpop.f32.mrb[28].mxu1 }
 0x4bb   :  { %5387 = vst [vmem:[#allocation9_spill] sm:$0xff] %v4537_v40  ;;  %v1779_v45 = vadd.f32 %v1778_v14, %v4537_v40  ;;  %v4540_v61 = vpop.f32.mrb[29].mxu1 }
 0x4bc   :  { %5388 = vst [vmem:[#allocation10_spill] sm:$0xff] %v4540_v61  ;;  %v1816_v55 = vadd.f32 %v1815_v27, %v4540_v61  ;;  %v4543_v16 = vpop.f32.mrb[30].mxu1 }
 0x4bd   :  { %5389 = vst [vmem:[#allocation11_spill] sm:$0xff] %v4543_v16  ;;  %v1780_v30 = vadd.f32 %v1779_v45, %v4543_v16  ;;  %v4546_v38 = vpop.f32.mrb[31].mxu1 }
 0x4be   :  { %5390 = vst [vmem:[#allocation12_spill] sm:$0xff] %v4546_v38  ;;  %v1817_v25 = vadd.f32 %v1816_v55, %v4546_v38 }
 0x4c2   :  { %v4549_v46 = vpop.f32.mrb[32].mxu1 }
 0x4c3   :  { %5391 = vst [vmem:[#allocation13_spill] sm:$0xff] %v4549_v46  ;;  %v1781_v47 = vadd.f32 %v1780_v30, %v4549_v46  ;;  %v4552_v17 = vpop.f32.mrb[33].mxu1 }
 0x4c4   :  { %v1818_v37 = vadd.f32 %v1817_v25, %v4552_v17  ;;  %v4555_v2 = vpop.f32.mrb[34].mxu1 }
 0x4c5   :  { %5392 = vst [vmem:[#allocation14_spill] sm:$0xff] %v4555_v2  ;;  %v1782_v21 = vadd.f32 %v1781_v47, %v4555_v2  ;;  %v4558_v5 = vpop.f32.mrb[35].mxu1 }
 0x4c6   :  { %v1819_v57 = vadd.f32 %v1818_v37, %v4558_v5 }
 0x4ca   :  { %v4561_v58 = vpop.f32.mrb[36].mxu1 }
 0x4cb   :  { %5393 = vst [vmem:[#allocation15_spill] sm:$0xff] %v4561_v58  ;;  %v1783_v8 = vadd.f32 %v1782_v21, %v4561_v58  ;;  %v4564_v18 = vpop.f32.mrb[37].mxu1 }
 0x4cc   :  { %5394 = vst [vmem:[#allocation16_spill] sm:$0xff] %v4564_v18  ;;  %v1820_v0 = vadd.f32 %v1819_v57, %v4564_v18  ;;  %v4567_v52 = vpop.f32.mrb[38].mxu1 }
 0x4cd   :  { %5395 = vst [vmem:[#allocation17_spill] sm:$0xff] %v4567_v52  ;;  %v1784_v12 = vadd.f32 %v1783_v8, %v4567_v52  ;;  %v4570_v13 = vpop.f32.mrb[39].mxu1 }
 0x4ce   :  { %5396 = vst [vmem:[#allocation18_spill] sm:$0xff] %v4570_v13  ;;  %v1821_v31 = vadd.f32 %v1820_v0, %v4570_v13 }
 0x4d2   :  { %v4573_v3 = vpop.f32.mrb[40].mxu1 }
 0x4d3   :  { %5397 = vst [vmem:[#allocation19_spill] sm:$0xff] %v4573_v3  ;;  %v1785_v49 = vadd.f32 %v1784_v12, %v4573_v3  ;;  %v4576_v42 = vpop.f32.mrb[41].mxu1 }
 0x4d4   :  { %5398 = vst [vmem:[#allocation20_spill] sm:$0xff] %v4576_v42  ;;  %v1822_v33 = vadd.f32 %v1821_v31, %v4576_v42  ;;  %v4579_v35 = vpop.f32.mrb[42].mxu1 }
 0x4d5   :  { %5399 = vst [vmem:[#allocation21_spill] sm:$0xff] %v4579_v35  ;;  %v1786_v10 = vadd.f32 %v1785_v49, %v4579_v35  ;;  %v4582_v7 = vpop.f32.mrb[43].mxu1 }
 0x4d6   :  { %5400 = vst [vmem:[#allocation22_spill] sm:$0xff] %v4582_v7  ;;  %v1823_v23 = vadd.f32 %v1822_v33, %v4582_v7 }
 0x4da   :  { %v4585_v54 = vpop.f32.mrb[44].mxu1 }
 0x4db   :  { %5401 = vst [vmem:[#allocation23_spill] sm:$0xff] %v4585_v54  ;;  %v1787_v39 = vadd.f32 %v1786_v10, %v4585_v54  ;;  %v4588_v14 = vpop.f32.mrb[45].mxu1 }
 0x4dc   :  { %5402 = vst [vmem:[#allocation24_spill] sm:$0xff] %v4588_v14  ;;  %v1824_v27 = vadd.f32 %v1823_v23, %v4588_v14  ;;  %v4591_v45 = vpop.f32.mrb[46].mxu1 }
 0x4dd   :  { %5403 = vst [vmem:[#allocation25_spill] sm:$0xff] %v4591_v45  ;;  %v1788_v55 = vadd.f32 %v1787_v39, %v4591_v45  ;;  %v4594_v30 = vpop.f32.mrb[47].mxu1 }
 0x4de   :  { %5404 = vst [vmem:[#allocation26_spill] sm:$0xff] %v4594_v30  ;;  %v1825_v25 = vadd.f32 %v1824_v27, %v4594_v30 }
 0x4e2   :  { %v4597_v47 = vpop.f32.mrb[48].mxu1 }
 0x4e3   :  { %5405 = vst [vmem:[#allocation27_spill] sm:$0xff] %v4597_v47  ;;  %v1789_v37 = vadd.f32 %v1788_v55, %v4597_v47  ;;  %v4600_v21 = vpop.f32.mrb[49].mxu1 }
 0x4e4   :  { %5406 = vst [vmem:[#allocation28_spill] sm:$0xff] %v4600_v21  ;;  %v1826_v57 = vadd.f32 %v1825_v25, %v4600_v21  ;;  %v4603_v8 = vpop.f32.mrb[50].mxu1 }
 0x4e5   :  { %5407 = vst [vmem:[#allocation29_spill] sm:$0xff] %v4603_v8  ;;  %v1790_v0 = vadd.f32 %v1789_v37, %v4603_v8  ;;  %v4606_v12 = vpop.f32.mrb[51].mxu1 }
 0x4e6   :  { %5408 = vst [vmem:[#allocation30_spill] sm:$0xff] %v4606_v12  ;;  %v1827_v31 = vadd.f32 %v1826_v57, %v4606_v12 }
 0x4ea   :  { %v4609_v49 = vpop.f32.mrb[52].mxu1 }
 0x4eb   :  { %5409 = vst [vmem:[#allocation31_spill] sm:$0xff] %v4609_v49  ;;  %v1791_v33 = vadd.f32 %v1790_v0, %v4609_v49  ;;  %v4612_v10 = vpop.f32.mrb[53].mxu1 }
 0x4ec   :  { %5410 = vst [vmem:[#allocation32_spill] sm:$0xff] %v4612_v10  ;;  %v1828_v23 = vadd.f32 %v1827_v31, %v4612_v10  ;;  %v4615_v39 = vpop.f32.mrb[54].mxu1 }
 0x4ed   :  { %5411 = vst [vmem:[#allocation33_spill] sm:$0xff] %v4615_v39  ;;  %v1792_v27 = vadd.f32 %v1791_v33, %v4615_v39  ;;  %v4618_v55 = vpop.f32.mrb[55].mxu1 }
 0x4ee   :  { %5412 = vst [vmem:[#allocation34_spill] sm:$0xff] %v4618_v55  ;;  %v1829_v25 = vadd.f32 %v1828_v23, %v4618_v55 }
 0x4f2   :  { %v4621_v37 = vpop.f32.mrb[56].mxu1 }
 0x4f3   :  { %5413 = vst [vmem:[#allocation35_spill] sm:$0xff] %v4621_v37  ;;  %v1793_v57 = vadd.f32 %v1792_v27, %v4621_v37  ;;  %v4624_v12 = vpop.f32.mrb[57].mxu1 }
 0x4f4   :  { %5414 = vst [vmem:[#allocation36_spill] sm:$0xff] %v4624_v12  ;;  %v1830_v0 = vadd.f32 %v1829_v25, %v4624_v12  ;;  %v4627_v21 = vpop.f32.mrb[58].mxu1 }
 0x4f5   :  { %5415 = vst [vmem:[#allocation37_spill] sm:$0xff] %v4627_v21  ;;  %v1794_v31 = vadd.f32 %v1793_v57, %v4627_v21  ;;  %v4630_v10 = vpop.f32.mrb[59].mxu1 }
 0x4f6   :  { %5416 = vst [vmem:[#allocation38_spill] sm:$0xff] %v4630_v10  ;;  %v1831_v33 = vadd.f32 %v1830_v0, %v4630_v10 }
 0x4fa   :  { %v4633_v30 = vpop.f32.mrb[60].mxu1 }
 0x4fb   :  { %5417 = vst [vmem:[#allocation39_spill] sm:$0xff] %v4633_v30  ;;  %v1795_v23 = vadd.f32 %v1794_v31, %v4633_v30  ;;  %v4636_v55 = vpop.f32.mrb[61].mxu1 }
 0x4fc   :  { %5418 = vst [vmem:[#allocation40_spill] sm:$0xff] %v4636_v55  ;;  %v1832_v27 = vadd.f32 %v1831_v33, %v4636_v55  ;;  %v4639_v14 = vpop.f32.mrb[62].mxu1 }
 0x4fd   :  { %5419 = vst [vmem:[#allocation41_spill] sm:$0xff] %v4639_v14  ;;  %v1796_v25 = vadd.f32 %v1795_v23, %v4639_v14  ;;  %v4642_v12 = vpop.f32.mrb[63].mxu1 }
 0x4fe   :  { %5420 = vst [vmem:[#allocation42_spill] sm:$0xff] %v4642_v12  ;;  %v1833_v57 = vadd.f32 %v1832_v27, %v4642_v12 }
 0x4ff   :  { %v1797_v7 = vrot.slane %v1796_v25, 4 }
 0x500   :  { %v1834_v13 = vrot.slane %v1833_v57, 4 }
 0x501   :  { %v1798_v42 = vadd.f32 %v1797_v7, %v1796_v25 }
 0x502   :  { %v1835_v31 = vadd.f32 %v1834_v13, %v1833_v57 }
 0x503   :  { %v1799_v21 = vrot.slane %v1798_v42, 2 }
 0x504   :  { %v1836_v18 = vrot.slane %v1835_v31, 2 }
 0x505   :  { %v1800_v0 = vadd.f32 %v1799_v21, %v1798_v42 }
 0x506   :  { %v1837_v55 = vadd.f32 %v1836_v18, %v1835_v31 }
 0x507   :  { %v1801_v10 = vrot.slane %v1800_v0, 1 }
 0x508   :  { %v1838_v21 = vrot.slane %v1837_v55, 1 }
 0x509   :  { %v1802_v37 = vadd.f32 %v1801_v10, %v1800_v0 }
 0x50a   :  { %v1839_v18 = vadd.f32 %v1838_v21, %v1837_v55 }
 0x50b   :  { %v4645_v30 = vmul.f32 0.00390625, %v1802_v37 }
 0x50c   :  { %v4663_v12 = vmul.f32 0.00390625, %v1839_v18 }
 0x50d   :  { %v1842_v33 = vsub.f32 %v4453_v4, %v4645_v30  ;;  %v1844_v23 = vsub.f32 %v4457_v51, %v4645_v30  ;;  %v1846_v27 = vsub.f32 %v4465_v59, %v4645_v30  ;;  %v1848_v42 = vsub.f32 %v4471_v32, %v4645_v30 }
 0x50e   :  { %v1850_v13 = vsub.f32 %v4477_v9, %v4645_v30  ;;  %v1852_v57 = vsub.f32 %v4483_v20, %v4645_v30  ;;  %v1854_v31 = vsub.f32 %v4489_v44, %v4645_v30  ;;  %v1856_v32 = vsub.f32 %v4495_v34, %v4645_v30 }
 0x50f   :  { %v1906_v7 = vmul.f32 %v1842_v33, %v1842_v33  ;;  %v1908_v25 = vmul.f32 %v1844_v23, %v1844_v23  ;;  %v1910_v10 = vmul.f32 %v1846_v27, %v1846_v27  ;;  %v1912_v0 = vmul.f32 %v1848_v42, %v1848_v42 }
 0x510   :  { %v1914_v33 = vmul.f32 %v1850_v13, %v1850_v13  ;;  %v1916_v59 = vmul.f32 %v1852_v57, %v1852_v57  ;;  %v1858_v27 = vsub.f32 %v4501_v48, %v4645_v30  ;;  %v1860_v55 = vsub.f32 %v4507_v24, %v4645_v30 }
 0x511   :  { %v1970_v37 = vadd.f32 %v1908_v25, %v1906_v7  ;;  %v1918_v7 = vmul.f32 %v1854_v31, %v1854_v31  ;;  %v1920_v42 = vmul.f32 %v1856_v32, %v1856_v32  ;;  %v1845_v13 = vsub.f32 %v4461_v1, %v4663_v12 }
 0x512   :  { %v1847_v32 = vsub.f32 %v4468_v26, %v4663_v12 }
 0x513   :  { %v1971_v51 = vadd.f32 %v1970_v37, %v1910_v10  ;;  %v1862_v10 = vsub.f32 %v4513_v50, %v4645_v30  ;;  %v1922_v37 = vmul.f32 %v1858_v27, %v1858_v27  ;;  %v1909_v31 = vmul.f32 %v1845_v13, %v1845_v13 }
 0x514   :  { %v1868_v27 = vsub.f32 %v4531_v28, %v4645_v30  ;;  %v1872_v28 = vsub.f32 %v4543_v16, %v4645_v30 }
 0x515   :  { %v1972_v23 = vadd.f32 %v1971_v51, %v1912_v0  ;;  %v1843_v51 = vsub.f32 %v4455_v15, %v4663_v12  ;;  %v1864_v0 = vsub.f32 %v4519_v6, %v4645_v30 }
 0x517   :  { %v1973_v4 = vadd.f32 %v1972_v23, %v1914_v33  ;;  %v1907_v18 = vmul.f32 %v1843_v51, %v1843_v51  ;;  %v1866_v33 = vsub.f32 %v4525_v63, %v4645_v30  ;;  %v1926_v23 = vmul.f32 %v1862_v10, %v1862_v10 }
 0x518   :  { %v1870_v51 = vsub.f32 %v4537_v40, %v4645_v30  ;;  %v1853_v10 = vsub.f32 %v4486_v56, %v4663_v12 }
 0x519   :  { %v1974_v25 = vadd.f32 %v1973_v4, %v1916_v59  ;;  %v1924_v4 = vmul.f32 %v1860_v55, %v1860_v55  ;;  %v1851_v55 = vsub.f32 %v4480_v19, %v4663_v12  ;;  %v1930_v13 = vmul.f32 %v1866_v33, %v1866_v33 }
 0x51a   :  { %v1934_v33 = vmul.f32 %v1870_v51, %v1870_v51 }
 0x51b   :  { %v1975_v21 = vadd.f32 %v1974_v25, %v1918_v7  ;;  %v1849_v25 = vsub.f32 %v4474_v62, %v4663_v12 }
 0x51d   :  { %v1976_v57 = vadd.f32 %v1975_v21, %v1920_v42  ;;  %v1928_v42 = vmul.f32 %v1864_v0, %v1864_v0  ;;  %v1932_v0 = vmul.f32 %v1868_v27, %v1868_v27  ;;  %v1936_v27 = vmul.f32 %v1872_v28, %v1872_v28 }
 0x51f   :  { %v1977_v59 = vadd.f32 %v1976_v57, %v1922_v37  ;;  %v1911_v37 = vmul.f32 %v1847_v32, %v1847_v32  ;;  %v2007_v57 = vadd.f32 %v1909_v31, %v1907_v18  ;;  %v1915_v32 = vmul.f32 %v1851_v55, %v1851_v55 }
 0x520   :  { %v1874_v31 = vsub.f32 %v4549_v46, %v4645_v30 }
 0x521   :  { %v1978_v7 = vadd.f32 %v1977_v59, %v1924_v4  ;;  %v1913_v4 = vmul.f32 %v1849_v25, %v1849_v25  ;;  %v2008_v59 = vadd.f32 %v2007_v57, %v1911_v37  ;;  %v1917_v25 = vmul.f32 %v1853_v10, %v1853_v10 }
 0x522   :  { %v1876_v57 = vsub.f32 %v4555_v2, %v4645_v30  ;;  %v1938_v51 = vmul.f32 %v1874_v31, %v1874_v31 }
 0x523   :  { %v1979_v21 = vadd.f32 %v1978_v7, %v1926_v23  ;;  %v1855_v7 = vsub.f32 %v4492_v60, %v4663_v12  ;;  %v2009_v18 = vadd.f32 %v2008_v59, %v1913_v4  ;;  %v1878_v59 = vsub.f32 %v4561_v58, %v4645_v30 }
 0x524   :  { %v1940_v28 = vmul.f32 %v1876_v57, %v1876_v57 }
 0x525   :  { %v1980_v63 = vadd.f32 %v1979_v21, %v1928_v42  ;;  %v1857_v21 = vsub.f32 %v4498_v11, %v4663_v12  ;;  %v2010_v37 = vadd.f32 %v2009_v18, %v1915_v32  ;;  %v1919_v55 = vmul.f32 %v1855_v7, %v1855_v7 }
 0x526   :  { %v1880_v18 = vsub.f32 %v4567_v52, %v4645_v30  ;;  %v1942_v31 = vmul.f32 %v1878_v59, %v1878_v59 }
 0x527   :  { %v1981_v23 = vadd.f32 %v1980_v63, %v1930_v13  ;;  %v1859_v13 = vsub.f32 %v4504_v29, %v4663_v12  ;;  %v2011_v4 = vadd.f32 %v2010_v37, %v1917_v25  ;;  %v1921_v10 = vmul.f32 %v1857_v21, %v1857_v21 }
 0x528   :  { %v1882_v37 = vsub.f32 %v4573_v3, %v4645_v30  ;;  %v1944_v57 = vmul.f32 %v1880_v18, %v1880_v18  ;;  %v3215_v3 = vld [vmem:[%s5299_s4 + $0x38] sm:$0xff]  }
 0x529   :  { %v1982_v42 = vadd.f32 %v1981_v23, %v1932_v0  ;;  %v1861_v23 = vsub.f32 %v4510_v36, %v4663_v12  ;;  %v2012_v32 = vadd.f32 %v2011_v4, %v1919_v55  ;;  %v1923_v7 = vmul.f32 %v1859_v13, %v1859_v13 }
 0x52a   :  { %v1884_v4 = vsub.f32 %v4579_v35, %v4645_v30  ;;  %v1946_v59 = vmul.f32 %v1882_v37, %v1882_v37 }
 0x52b   :  { %v1983_v63 = vadd.f32 %v1982_v42, %v1934_v33  ;;  %v1863_v42 = vsub.f32 %v4516_v41, %v4663_v12  ;;  %v2013_v25 = vadd.f32 %v2012_v32, %v1921_v10  ;;  %v1925_v21 = vmul.f32 %v1861_v23, %v1861_v23 }
 0x52c   :  { %v1886_v32 = vsub.f32 %v4585_v54, %v4645_v30  ;;  %v1948_v18 = vmul.f32 %v1884_v4, %v1884_v4 }
 0x52d   :  { %v1984_v0 = vadd.f32 %v1983_v63, %v1936_v27  ;;  %v1865_v63 = vsub.f32 %v4522_v22, %v4663_v12  ;;  %v2014_v55 = vadd.f32 %v2013_v25, %v1923_v7  ;;  %v1927_v13 = vmul.f32 %v1863_v42, %v1863_v42 }
 0x52e   :  { %v1888_v25 = vsub.f32 %v4591_v45, %v4645_v30  ;;  %v1950_v37 = vmul.f32 %v1886_v32, %v1886_v32 }
 0x52f   :  { %v1985_v33 = vadd.f32 %v1984_v0, %v1938_v51  ;;  %v1867_v0 = vsub.f32 %v4528_v53, %v4663_v12  ;;  %v2015_v10 = vadd.f32 %v2014_v55, %v1925_v21  ;;  %v1929_v23 = vmul.f32 %v1865_v63, %v1865_v63 }
 0x530   :  { %v1890_v55 = vsub.f32 %v4597_v47, %v4645_v30  ;;  %v1952_v4 = vmul.f32 %v1888_v25, %v1888_v25 }
 0x531   :  { %v1986_v27 = vadd.f32 %v1985_v33, %v1940_v28  ;;  %v1869_v33 = vsub.f32 %v4534_v43, %v4663_v12  ;;  %v2016_v7 = vadd.f32 %v2015_v10, %v1927_v13  ;;  %v1931_v42 = vmul.f32 %v1867_v0, %v1867_v0 }
 0x532   :  { %v1892_v10 = vsub.f32 %v4603_v8, %v4645_v30  ;;  %v1954_v32 = vmul.f32 %v1890_v55, %v1890_v55 }
 0x533   :  { %v1987_v51 = vadd.f32 %v1986_v27, %v1942_v31  ;;  %v1871_v27 = vsub.f32 %v4540_v61, %v4663_v12  ;;  %v2017_v21 = vadd.f32 %v2016_v7, %v1929_v23  ;;  %v1933_v63 = vmul.f32 %v1869_v33, %v1869_v33 }
 0x534   :  { %v1894_v7 = vsub.f32 %v4609_v49, %v4645_v30  ;;  %v1956_v25 = vmul.f32 %v1892_v10, %v1892_v10 }
 0x535   :  { %v1988_v28 = vadd.f32 %v1987_v51, %v1944_v57  ;;  %v1873_v51 = vsub.f32 %v4546_v38, %v4663_v12  ;;  %v2018_v13 = vadd.f32 %v2017_v21, %v1931_v42  ;;  %v1935_v0 = vmul.f32 %v1871_v27, %v1871_v27 }
 0x536   :  { %v1896_v21 = vsub.f32 %v4615_v39, %v4645_v30 }
 0x537   :  { %v1989_v31 = vadd.f32 %v1988_v28, %v1946_v59  ;;  %v1875_v28 = vsub.f32 %v4552_v17, %v4663_v12  ;;  %v2019_v23 = vadd.f32 %v2018_v13, %v1933_v63  ;;  %v1937_v33 = vmul.f32 %v1873_v51, %v1873_v51  ;;  %v5422_v51 = vld [vmem:[#allocation35_spill] sm:$0xff] }
 0x539   :  { %v1990_v57 = vadd.f32 %v1989_v31, %v1948_v18  ;;  %v1877_v31 = vsub.f32 %v4558_v5, %v4663_v12  ;;  %v2020_v42 = vadd.f32 %v2019_v23, %v1935_v0  ;;  %v1939_v13 = vmul.f32 %v1875_v28, %v1875_v28  ;;  %v5423_v23 = vld [vmem:[#allocation18_spill] sm:$0xff] }
 0x53a   :  { %v1958_v0 = vmul.f32 %v1894_v7, %v1894_v7  ;;  %v1881_v39 = vsub.f32 %v5423_v23, %v4663_v12 }
 0x53b   :  { %v1991_v59 = vadd.f32 %v1990_v57, %v1950_v37  ;;  %v3200_v37 = vld [vmem:[%s5299_s4 + $0x40] sm:$0xff]   ;;  %v5421_v57 = vld [vmem:[#allocation16_spill] sm:$0xff]  ;;  %v2021_v55 = vadd.f32 %v2020_v42, %v1937_v33  ;;  %v1941_v49 = vmul.f32 %v1877_v31, %v1877_v31  ;;  %v1960_v33 = vmul.f32 %v1896_v21, %v1896_v21  ;;  %v3202_v42 = vld [vmem:[%s5299_s4 + $0x48] sm:$0xff]  }
 0x53c   :  { %v1879_v63 = vsub.f32 %v5421_v57, %v4663_v12  ;;  %2989 = vmatprep.subr.bf16.mxu0 %v3200_v37  ;;  %v3203_v31 = vld [vmem:[%s5299_s4 + $0x8] sm:$0xff]   ;;  %v1945_v47 = vmul.f32 %v1881_v39, %v1881_v39  ;;  %v3205_v39 = vld [vmem:[%s5299_s4 + $0x10] sm:$0xff]  }
 0x53d   :  { %v1992_v18 = vadd.f32 %v1991_v59, %v1952_v4  ;;  %v3201_v4 = vld [vmem:[%s5299_s4] sm:$0xff]   ;;  %v1898_v59 = vsub.f32 %v5422_v51, %v4645_v30  ;;  %v5425_v51 = vld [vmem:[#allocation20_spill] sm:$0xff] }
 0x53e   :  { %2990 = vmatpush3.bf16.msra.mxu0 %v3201_v4  ;;  %v1883_v7 = vsub.f32 %v5425_v51, %v4663_v12  ;;  %v1943_v37 = vmul.f32 %v1879_v63, %v1879_v63  ;;  %v5427_v4 = vld [vmem:[#allocation22_spill] sm:$0xff]  ;;  %v1904_v63 = vsub.f32 %v4639_v14, %v4645_v30 }
 0x53f   :  { %v1993_v27 = vadd.f32 %v1992_v18, %v1954_v32  ;;  %v2022_v32 = vadd.f32 %v2021_v55, %v1939_v13  ;;  %v5424_v18 = vld [vmem:[#allocation37_spill] sm:$0xff]  ;;  %v1962_v55 = vmul.f32 %v1898_v59, %v1898_v59  ;;  %2991 = vmatprep.subr.bf16.mxu0 %v3202_v42 }
 0x540   :  { %v1900_v28 = vsub.f32 %v5424_v18, %v4645_v30  ;;  %v1885_v18 = vsub.f32 %v5427_v4, %v4663_v12  ;;  %v1947_v42 = vmul.f32 %v1883_v7, %v1883_v7  ;;  %v1968_v45 = vmul.f32 %v1904_v63, %v1904_v63 }
 0x541   :  { %v1994_v10 = vadd.f32 %v1993_v27, %v1956_v25  ;;  %v2023_v25 = vadd.f32 %v2022_v32, %v1941_v49  ;;  %v5426_v27 = vld [vmem:[#allocation39_spill] sm:$0xff] }
 0x542   :  { %v1902_v13 = vsub.f32 %v5426_v27, %v4645_v30  ;;  %2992 = vmatpush3.bf16.msra.mxu0 %v3203_v31  ;;  %v1964_v49 = vmul.f32 %v1900_v28, %v1900_v28  ;;  %v5428_v27 = vld [vmem:[#allocation24_spill] sm:$0xff]  ;;  %v1949_v31 = vmul.f32 %v1885_v18, %v1885_v18  ;;  %v5431_v18 = vld [vmem:[#allocation30_spill] sm:$0xff] }
 0x543   :  { %v1995_v8 = vadd.f32 %v1994_v10, %v1958_v0  ;;  %v2024_v0 = vadd.f32 %v2023_v25, %v1943_v37  ;;  %v3204_v10 = vld [vmem:[%s5299_s4 + $0x50] sm:$0xff]   ;;  %v1887_v59 = vsub.f32 %v5428_v27, %v4663_v12  ;;  %v5429_v25 = vld [vmem:[#allocation26_spill] sm:$0xff] }
 0x544   :  { %2993 = vmatprep.subr.bf16.mxu0 %v3204_v10  ;;  %v1889_v28 = vsub.f32 %v5429_v25, %v4663_v12  ;;  %v1893_v10 = vsub.f32 %v5431_v18, %v4663_v12 }
 0x545   :  { %v1996_v21 = vadd.f32 %v1995_v8, %v1960_v33  ;;  %v2025_v8 = vadd.f32 %v2024_v0, %v1945_v47  ;;  %v1966_v33 = vmul.f32 %v1902_v13, %v1902_v13  ;;  %v5430_v47 = vld [vmem:[#allocation28_spill] sm:$0xff]  ;;  %v1951_v0 = vmul.f32 %v1887_v59, %v1887_v59  ;;  %v3207_v13 = vld [vmem:[%s5299_s4 + $0x18] sm:$0xff]  }
 0x546   :  { %2994 = vmatpush3.bf16.msra.mxu0 %v3205_v39  ;;  %v1953_v63 = vmul.f32 %v1889_v28, %v1889_v28  ;;  %v5432_v59 = vld [vmem:[#allocation32_spill] sm:$0xff] }
 0x547   :  { %v1997_v32 = vadd.f32 %v1996_v21, %v1962_v55  ;;  %v2026_v14 = vadd.f32 %v2025_v8, %v1947_v42  ;;  %v3206_v55 = vld [vmem:[%s5299_s4 + $0x58] sm:$0xff]   ;;  %v1891_v21 = vsub.f32 %v5430_v47, %v4663_v12  ;;  %v3208_v42 = vld [vmem:[%s5299_s4 + $0x60] sm:$0xff]  }
 0x548   :  { %2995 = vmatprep.subr.bf16.mxu0 %v3206_v55  ;;  %v3210_v55 = vld [vmem:[%s5299_s4 + $0x68] sm:$0xff]  }
 0x549   :  { %v1998_v37 = vadd.f32 %v1997_v32, %v1964_v49  ;;  %v2027_v54 = vadd.f32 %v2026_v14, %v1949_v31  ;;  %v1895_v14 = vsub.f32 %v5432_v59, %v4663_v12  ;;  %v1955_v39 = vmul.f32 %v1891_v21, %v1891_v21 }
 0x54a   :  { %2996 = vmatpush3.bf16.msra.mxu0 %v3207_v13 }
 0x54b   :  { %v1999_v7 = vadd.f32 %v1998_v37, %v1966_v33  ;;  %v2028_v32 = vadd.f32 %v2027_v54, %v1951_v0  ;;  %2997 = vmatprep.subr.bf16.mxu0 %v3208_v42  ;;  %v5433_v37 = vld [vmem:[#allocation34_spill] sm:$0xff]  ;;  %v1957_v54 = vmul.f32 %v1893_v10, %v1893_v10  ;;  %v5434_v0 = vld [vmem:[#allocation36_spill] sm:$0xff]  ;;  %v1959_v13 = vmul.f32 %v1895_v14, %v1895_v14  ;;  %v3214_v14 = vld [vmem:[%s5299_s4 + $0x78] sm:$0xff]  }
 0x54c   :  { %v1897_v28 = vsub.f32 %v5433_v37, %v4663_v12  ;;  %v1899_v21 = vsub.f32 %v5434_v0, %v4663_v12  ;;  %v5435_v42 = vld [vmem:[#allocation38_spill] sm:$0xff] }
 0x54d   :  { %v2000_v49 = vadd.f32 %v1999_v7, %v1968_v45  ;;  %v2029_v33 = vadd.f32 %v2028_v32, %v1953_v63  ;;  %v3209_v45 = vld [vmem:[%s5299_s4 + $0x20] sm:$0xff]   ;;  %v3211_v32 = vld [vmem:[%s5299_s4 + $0x28] sm:$0xff]   ;;  %v1901_v10 = vsub.f32 %v5435_v42, %v4663_v12 }
 0x54e   :  { %2998 = vmatpush3.bf16.msra.mxu0 %v3209_v45 }
 0x54f   :  { %v2001_v8 = vrot.slane %v2000_v49, 4  ;;  %v2030_v31 = vadd.f32 %v2029_v33, %v1955_v39  ;;  %2999 = vmatprep.subr.bf16.mxu0 %v3210_v55  ;;  %v1961_v39 = vmul.f32 %v1897_v28, %v1897_v28  ;;  %v1963_v55 = vmul.f32 %v1899_v21, %v1899_v21 }
 0x551   :  { %v2002_v7 = vadd.f32 %v2001_v8, %v2000_v49  ;;  %v2031_v63 = vadd.f32 %v2030_v31, %v1957_v54  ;;  %v3212_v49 = vld [vmem:[%s5299_s4 + $0x70] sm:$0xff]  }
 0x552   :  { %3000 = vmatpush3.bf16.msra.mxu0 %v3211_v32  ;;  %v3213_v8 = vld [vmem:[%s5299_s4 + $0x30] sm:$0xff]   ;;  %v1965_v32 = vmul.f32 %v1901_v10, %v1901_v10 }
 0x553   :  { %v2032_v33 = vadd.f32 %v2031_v63, %v1959_v13  ;;  %v2003_v45 = vrot.slane %v2002_v7, 2  ;;  %v5436_v54 = vld [vmem:[#allocation40_spill] sm:$0xff]  ;;  %3001 = vmatprep.subr.bf16.mxu0 %v3212_v49  ;;  %v5437_v13 = vld [vmem:[#allocation42_spill] sm:$0xff] }
 0x554   :  { %v1903_v31 = vsub.f32 %v5436_v54, %v4663_v12  ;;  %v1905_v63 = vsub.f32 %v5437_v13, %v4663_v12 }
 0x555   :  { %v2033_v28 = vadd.f32 %v2032_v33, %v1961_v39  ;;  %v2004_v52 = vadd.f32 %v2003_v45, %v2002_v7  ;;  %v3245_v7 = vmov 1966171168   ;;  %v2060_v45 = vlaneseq }
 0x556   :  { %3002 = vmatpush3.bf16.msra.mxu0 %v3213_v8  ;;  %v1967_v58 = vmul.f32 %v1903_v31, %v1903_v31  ;;  %v1969_v46 = vmul.f32 %v1905_v63, %v1905_v63 }
 0x557   :  { %v2034_v35 = vadd.f32 %v2033_v28, %v1963_v55  ;;  %3003 = vmatprep.subr.bf16.mxu0 %v3214_v14  ;;  %v2005_v21 = vrot.slane %v2004_v52, 1 }
 0x559   :  { %v2035_v2 = vadd.f32 %v2034_v35, %v1965_v32  ;;  %v2006_v49 = vadd.f32 %v2005_v21, %v2004_v52  ;;  %v2058_v35 = vunpack.c.l.s4 %v3245_v7 }
 0x55a   :  { %3004 = vmatpush3.bf16.msra.mxu0 %v3215_v3 }
 0x55b   :  { %v2036_v38 = vadd.f32 %v2035_v2, %v1967_v58  ;;  %v2044_v10 = vmul.f32 0.00390625, %v2006_v49  ;;  %v2059_v2 = vunpack.c.0.s8 %v2058_v35  ;;  %v2061_v58 = vshrl.u32 %v2060_v45, 7  ;;  %v5439_v35 = vld [vmem:[#allocation2_spill] sm:$0xff]  ;;  %v5440_v45 = vld [vmem:[#allocation3_spill] sm:$0xff] }
 0x55d   :  { %v2037_v39 = vadd.f32 %v2036_v38, %v1969_v46  ;;  %v2050_v28 = vadd.f32 1e-05, %v2044_v10  ;;  %v2062_v38 = vsub.s32 %v2059_v2, %v2061_v58  ;;  %v2076_v63 = vsub.s32 0, %v2061_v58 }
 0x55f   :  { %v2038_v33 = vrot.slane %v2037_v39, 4  ;;  %3232 = vrsqrt.f32 %v2050_v28 }
 0x561   :  { %v2039_v16 = vadd.f32 %v2038_v33, %v2037_v39 }
 0x563   :  { %v2040_v61 = vrot.slane %v2039_v16, 2 }
 0x565   :  { %v2041_v55 = vadd.f32 %v2040_v61, %v2039_v16  ;;  %v2938_v61 = vld [vmem:[%s5297_s7 + $0x4] ss:$8 sm:$0x3] }
 0x567   :  { %v2042_v8 = vrot.slane %v2041_v55, 1 }
 0x569   :  { %v2043_v40 = vadd.f32 %v2042_v8, %v2041_v55  ;;  %v3233_v3 = vpop.eup %3232 }
 0x56b   :  { %v2045_v43 = vmul.f32 0.00390625, %v2043_v40  ;;  %v2080_v40 = vsub.s32 1, %v2061_v58 }
 0x56d   :  { %v2051_v14 = vadd.f32 1e-05, %v2045_v43 }
 0x56f   :  { %3234 = vrsqrt.f32 %v2051_v14 }
 0x579   :  { %v3235_v46 = vpop.eup %3234 }
 0x57a   :  { %v2056_v52 = vcombine.low %v3233_v3, %v3235_v46  ;;  %v5441_v3 = vld [vmem:[#allocation5_spill] sm:$0xff] }
 0x57c   :  { %v2063_v31 = vrot.slane %v2056_v52, %v2062_v38 }
 0x57e   :  { %v2070_v16 = vrot.slane %v2063_v31, %v2062_v38 }
 0x580   :  { %v2072_v32 = vmul.f32 %v2938_v61, %v2070_v16 }
 0x582   :  { %v4828_v43 = vrot.slane %v2072_v32, %v2076_v63  ;;  %v4830_v21 = vrot.slane %v2072_v32, %v2080_v40 }
 0x584   :  { %v2084_v39 = vmul.f32 %v4828_v43, %v4645_v30  ;;  %v2085_v33 = vmul.f32 %v4830_v21, %v4663_v12  ;;  %v2138_v49 = vmul.f32 %v4830_v21, %v4552_v17  ;;  %v2140_v10 = vmul.f32 %v4830_v21, %v4558_v5 }
 0x585   :  { %v2142_v55 = vmul.f32 %v4830_v21, %v5421_v57  ;;  %v2144_v8 = vmul.f32 %v4830_v21, %v5423_v23  ;;  %v2146_v28 = vmul.f32 %v4830_v21, %v5425_v51  ;;  %v2148_v30 = vmul.f32 %v4830_v21, %v5427_v4 }
 0x586   :  { %v2088_v14 = vcombine.low %v2084_v39, %v2085_v33  ;;  %v2150_v12 = vmul.f32 %v4830_v21, %v5428_v27  ;;  %v2152_v17 = vmul.f32 %v4830_v21, %v5429_v25  ;;  %v2154_v5 = vmul.f32 %v4830_v21, %v5430_v47 }
 0x587   :  { %v2156_v57 = vmul.f32 %v4830_v21, %v5431_v18  ;;  %v2158_v23 = vmul.f32 %v4830_v21, %v5432_v59  ;;  %v2160_v51 = vmul.f32 %v4830_v21, %v5433_v37  ;;  %v2162_v4 = vmul.f32 %v4830_v21, %v5434_v0  ;;  %v2939_v18 = vld [vmem:[%s5297_s7 + $0x5] ss:$8 sm:$0x3]  ;;  %v5438_v59 = vld [vmem:[#allocation4_spill] sm:$0xff] }
 0x588   :  { %v2095_v7 = vrot.slane %v2088_v14, %v2062_v38  ;;  %v2164_v27 = vmul.f32 %v4830_v21, %v5435_v42  ;;  %v2166_v25 = vmul.f32 %v4830_v21, %v5436_v54  ;;  %v2168_v47 = vmul.f32 %v4830_v21, %v5437_v13 }
 0x589   :  { %v4873_v37 = vmul.f32 %v4828_v43, %v5438_v59  ;;  %v4877_v0 = vmul.f32 %v4830_v21, %v4455_v15  ;;  %v4881_v42 = vmul.f32 %v4828_v43, %v5439_v35  ;;  %v4885_v54 = vmul.f32 %v4830_v21, %v4461_v1 }
 0x58a   :  { %v2102_v13 = vrot.slane %v2095_v7, %v2062_v38  ;;  %v4889_v2 = vmul.f32 %v4828_v43, %v5440_v45  ;;  %v4893_v58 = vmul.f32 %v4830_v21, %v4468_v26  ;;  %v4897_v15 = vmul.f32 %v4828_v43, %v5441_v3  ;;  %v5453_v7 = vld [vmem:[#allocation9_spill] sm:$0xff] }
 0x58b   :  { %v4901_v46 = vmul.f32 %v4830_v21, %v4474_v62  ;;  %v4905_v1 = vmul.f32 %v4828_v43, %v4477_v9  ;;  %v4909_v38 = vmul.f32 %v4830_v21, %v4480_v19  ;;  %v4913_v26 = vmul.f32 %v4828_v43, %v4483_v20 }
 0x58c   :  { %v2104_v52 = vsub.f32 %v2939_v18, %v2102_v13  ;;  %v4917_v31 = vmul.f32 %v4830_v21, %v4486_v56  ;;  %v4921_v62 = vmul.f32 %v4828_v43, %v4489_v44  ;;  %v4925_v9 = vmul.f32 %v4830_v21, %v4492_v60  ;;  %v5455_v18 = vld [vmem:[#allocation11_spill] sm:$0xff]  ;;  %v5456_v13 = vld [vmem:[#allocation12_spill] sm:$0xff] }
 0x58d   :  { %v4929_v19 = vmul.f32 %v4828_v43, %v4495_v34  ;;  %v4933_v20 = vmul.f32 %v4830_v21, %v4498_v11  ;;  %v4937_v56 = vmul.f32 %v4828_v43, %v4501_v48  ;;  %v4941_v44 = vmul.f32 %v4830_v21, %v4504_v29 }
 0x58e   :  { %v4943_v61 = vrot.slane %v2104_v52, %v2076_v63  ;;  %v4945_v60 = vrot.slane %v2104_v52, %v2080_v40  ;;  %v4949_v34 = vmul.f32 %v4828_v43, %v4507_v24  ;;  %v4953_v11 = vmul.f32 %v4830_v21, %v4510_v36  ;;  %v5458_v52 = vld [vmem:[#allocation14_spill] sm:$0xff] }
 0x58f   :  { %v4957_v48 = vmul.f32 %v4828_v43, %v4513_v50  ;;  %v4961_v29 = vmul.f32 %v4830_v21, %v4516_v41  ;;  %v4965_v16 = vmul.f32 %v4828_v43, %v4519_v6  ;;  %v4969_v24 = vmul.f32 %v4830_v21, %v4522_v22 }
 0x590   :  { %v2213_v63 = vadd.f32 %v4945_v60, %v2138_v49  ;;  %v2215_v36 = vadd.f32 %v4945_v60, %v2140_v10  ;;  %v2217_v40 = vadd.f32 %v4945_v60, %v2142_v55  ;;  %v2219_v50 = vadd.f32 %v4945_v60, %v2144_v8 }
 0x591   :  { %v2221_v32 = vadd.f32 %v4945_v60, %v2146_v28  ;;  %v2223_v41 = vadd.f32 %v4945_v60, %v2148_v30  ;;  %v2225_v39 = vadd.f32 %v4945_v60, %v2150_v12  ;;  %v4979_v6 = vadd.f32 %v4945_v60, %v2152_v17  ;;  %v5450_v12 = vld [vmem:[#allocation6_spill] sm:$0xff] }
 0x592   :  { %v4982_v22 = vadd.f32 %v4945_v60, %v2154_v5  ;;  %v4985_v33 = vadd.f32 %v4945_v60, %v2156_v57  ;;  %v4988_v49 = vadd.f32 %v4945_v60, %v2158_v23  ;;  %v4991_v10 = vadd.f32 %v4945_v60, %v2160_v51  ;;  %v5451_v57 = vld [vmem:[#allocation7_spill] sm:$0xff]  ;;  %v5452_v51 = vld [vmem:[#allocation8_spill] sm:$0xff] }
 0x593   :  { %v4994_v55 = vadd.f32 %v4945_v60, %v2162_v4  ;;  %v4997_v8 = vadd.f32 %v4945_v60, %v2164_v27  ;;  %v5000_v28 = vadd.f32 %v4945_v60, %v2166_v25  ;;  %v5003_v30 = vadd.f32 %v4945_v60, %v2168_v47  ;;  %v5454_v25 = vld [vmem:[#allocation10_spill] sm:$0xff] }
 0x594   :  { %5442 = vst [vmem:[#allocation16_spill] sm:$0xff] %v4982_v22  ;;  %5443 = vst [vmem:[#allocation18_spill] sm:$0xff] %v4985_v33  ;;  %v2307_v14 = vmax.f32 %v2213_v63, %v2215_v36  ;;  %v2129_v17 = vmul.f32 %v4828_v43, %v5450_v12  ;;  %v2130_v5 = vmul.f32 %v4830_v21, %v4528_v53  ;;  %v5457_v53 = vld [vmem:[#allocation13_spill] sm:$0xff]  ;;  %v5459_v36 = vld [vmem:[#allocation15_spill] sm:$0xff] }
 0x595   :  { %5444 = vst [vmem:[#allocation20_spill] sm:$0xff] %v4988_v49  ;;  %5445 = vst [vmem:[#allocation22_spill] sm:$0xff] %v4991_v10  ;;  %v2131_v23 = vmul.f32 %v4828_v43, %v5451_v57  ;;  %v2132_v4 = vmul.f32 %v4830_v21, %v5452_v51  ;;  %v2133_v27 = vmul.f32 %v4828_v43, %v5453_v7  ;;  %v5460_v57 = vld [vmem:[#allocation17_spill] sm:$0xff]  ;;  %v5461_v7 = vld [vmem:[#allocation19_spill] sm:$0xff] }
 0x596   :  { %5446 = vst [vmem:[#allocation24_spill] sm:$0xff] %v4994_v55  ;;  %5447 = vst [vmem:[#allocation26_spill] sm:$0xff] %v4997_v8  ;;  %v2134_v47 = vmul.f32 %v4830_v21, %v5454_v25  ;;  %v2135_v59 = vmul.f32 %v4828_v43, %v5455_v18  ;;  %v2308_v35 = vmax.f32 %v2307_v14, %v2217_v40  ;;  %v5462_v18 = vld [vmem:[#allocation21_spill] sm:$0xff] }
 0x597   :  { %5448 = vst [vmem:[#allocation28_spill] sm:$0xff] %v5000_v28  ;;  %5449 = vst [vmem:[#allocation30_spill] sm:$0xff] %v5003_v30  ;;  %v2136_v45 = vmul.f32 %v4830_v21, %v5456_v13  ;;  %v2137_v3 = vmul.f32 %v4828_v43, %v5457_v53  ;;  %v2139_v63 = vmul.f32 %v4828_v43, %v5458_v52  ;;  %v5463_v21 = vld [vmem:[#allocation23_spill] sm:$0xff]  ;;  %v5464_v53 = vld [vmem:[#allocation25_spill] sm:$0xff] }
 0x598   :  { %v2141_v12 = vmul.f32 %v4828_v43, %v5459_v36  ;;  %v2143_v51 = vmul.f32 %v4828_v43, %v5460_v57  ;;  %v2145_v25 = vmul.f32 %v4828_v43, %v5461_v7  ;;  %v2147_v40 = vmul.f32 %v4828_v43, %v5462_v18  ;;  %v5465_v52 = vld [vmem:[#allocation27_spill] sm:$0xff]  ;;  %v5466_v36 = vld [vmem:[#allocation29_spill] sm:$0xff] }
 0x599   :  { %v2309_v14 = vmax.f32 %v2308_v35, %v2219_v50  ;;  %v2149_v13 = vmul.f32 %v4828_v43, %v5463_v21  ;;  %v2151_v30 = vmul.f32 %v4828_v43, %v5464_v53  ;;  %v2153_v28 = vmul.f32 %v4828_v43, %v5465_v52  ;;  %v5467_v57 = vld [vmem:[#allocation31_spill] sm:$0xff]  ;;  %v5468_v7 = vld [vmem:[#allocation33_spill] sm:$0xff] }
 0x59a   :  { %v2155_v8 = vmul.f32 %v4828_v43, %v5466_v36  ;;  %v2157_v55 = vmul.f32 %v4828_v43, %v5467_v57  ;;  %v2159_v10 = vmul.f32 %v4828_v43, %v5468_v7  ;;  %v5469_v18 = vld [vmem:[#allocation35_spill] sm:$0xff]  ;;  %v5470_v21 = vld [vmem:[#allocation37_spill] sm:$0xff]  ;;  %v2180_v36 = vadd.f32 %v4943_v61, %v4873_v37 }
 0x59b   :  { %v2161_v50 = vmul.f32 %v4828_v43, %v5469_v18  ;;  %v2310_v35 = vmax.f32 %v2309_v14, %v2221_v32  ;;  %v2163_v49 = vmul.f32 %v4828_v43, %v5470_v21  ;;  %v5471_v53 = vld [vmem:[#allocation39_spill] sm:$0xff]  ;;  %v5472_v52 = vld [vmem:[#allocation41_spill] sm:$0xff]  ;;  %v2181_v57 = vadd.f32 %v4945_v60, %v4877_v0 }
 0x59c   :  { %v2165_v33 = vmul.f32 %v4828_v43, %v5471_v53  ;;  %v2167_v22 = vmul.f32 %v4828_v43, %v5472_v52  ;;  %v2182_v7 = vadd.f32 %v4943_v61, %v4881_v42  ;;  %v2183_v32 = vadd.f32 %v4945_v60, %v4885_v54 }
 0x59d   :  { %v2311_v14 = vmax.f32 %v2310_v35, %v2223_v41  ;;  %v2184_v18 = vadd.f32 %v4943_v61, %v4889_v2  ;;  %v2185_v21 = vadd.f32 %v4945_v60, %v4893_v58  ;;  %v2186_v43 = vadd.f32 %v4943_v61, %v4897_v15 }
 0x59e   :  { %v2187_v37 = vadd.f32 %v4945_v60, %v4901_v46  ;;  %v2188_v0 = vadd.f32 %v4943_v61, %v4905_v1  ;;  %v2189_v42 = vadd.f32 %v4945_v60, %v4909_v38  ;;  %v5075_v54 = vadd.f32 %v4943_v61, %v4913_v26 }
 0x59f   :  { %v2312_v2 = vmax.f32 %v2311_v14, %v2225_v39  ;;  %v5079_v58 = vadd.f32 %v4945_v60, %v4917_v31  ;;  %v2192_v15 = vadd.f32 %v4943_v61, %v4921_v62  ;;  %v2193_v46 = vadd.f32 %v4945_v60, %v4925_v9 }
 0x5a0   :  { %v5087_v1 = vadd.f32 %v4943_v61, %v4929_v19  ;;  %v5091_v38 = vadd.f32 %v4945_v60, %v4933_v20  ;;  %v5095_v26 = vadd.f32 %v4943_v61, %v4937_v56  ;;  %v5099_v31 = vadd.f32 %v4945_v60, %v4941_v44 }
 0x5a1   :  { %v2313_v62 = vmax.f32 %v2312_v2, %v4979_v6  ;;  %v5104_v9 = vadd.f32 %v4943_v61, %v4949_v34  ;;  %v5108_v19 = vadd.f32 %v4945_v60, %v4953_v11  ;;  %v5112_v20 = vadd.f32 %v4943_v61, %v4957_v48  ;;  %v5473_v11 = vld [vmem:[#allocation16_spill] sm:$0xff] }
 0x5a2   :  { %v5116_v56 = vadd.f32 %v4945_v60, %v4961_v29  ;;  %v5120_v44 = vadd.f32 %v4943_v61, %v4965_v16  ;;  %v5124_v34 = vadd.f32 %v4945_v60, %v4969_v24  ;;  %v5127_v41 = vadd.f32 %v4943_v61, %v2129_v17  ;;  %v5481_v2 = vld [vmem:[#allocation20_spill] sm:$0xff] }
 0x5a3   :  { %v2314_v39 = vmax.f32 %v2313_v62, %v5473_v11  ;;  %v5131_v48 = vadd.f32 %v4945_v60, %v2130_v5  ;;  %v5134_v6 = vadd.f32 %v4943_v61, %v2131_v23  ;;  %v5137_v29 = vadd.f32 %v4945_v60, %v2132_v4  ;;  %v5480_v5 = vld [vmem:[#allocation18_spill] sm:$0xff] }
 0x5a4   :  { %v5140_v16 = vadd.f32 %v4943_v61, %v2133_v27  ;;  %v5143_v24 = vadd.f32 %v4945_v60, %v2134_v47  ;;  %v5146_v17 = vadd.f32 %v4943_v61, %v2135_v59  ;;  %v5149_v35 = vadd.f32 %v4945_v60, %v2136_v45  ;;  %v5482_v11 = vld [vmem:[#allocation22_spill] sm:$0xff] }
 0x5a5   :  { %5474 = vst [vmem:[#allocation32_spill] sm:$0xff] %v5134_v6  ;;  %5475 = vst [vmem:[#allocation34_spill] sm:$0xff] %v5137_v29  ;;  %v2315_v53 = vmax.f32 %v2314_v39, %v5480_v5  ;;  %v2212_v23 = vadd.f32 %v4943_v61, %v2137_v3  ;;  %v2214_v52 = vadd.f32 %v4943_v61, %v2139_v63  ;;  %v5486_v6 = vld [vmem:[#allocation30_spill] sm:$0xff] }
 0x5a6   :  { %5476 = vst [vmem:[#allocation36_spill] sm:$0xff] %v5140_v16  ;;  %5477 = vst [vmem:[#allocation38_spill] sm:$0xff] %v5143_v24  ;;  %v2216_v4 = vadd.f32 %v4943_v61, %v2141_v12  ;;  %v2218_v27 = vadd.f32 %v4943_v61, %v2143_v51  ;;  %v2220_v14 = vadd.f32 %v4943_v61, %v2145_v25 }
 0x5a7   :  { %5478 = vst [vmem:[#allocation40_spill] sm:$0xff] %v5146_v17  ;;  %5479 = vst [vmem:[#allocation42_spill] sm:$0xff] %v5149_v35  ;;  %v2222_v47 = vadd.f32 %v4943_v61, %v2147_v40  ;;  %v2224_v59 = vadd.f32 %v4943_v61, %v2149_v13  ;;  %v2316_v62 = vmax.f32 %v2315_v53, %v5481_v2  ;;  %v5484_v17 = vld [vmem:[#allocation26_spill] sm:$0xff] }
 0x5a8   :  { %v2226_v60 = vadd.f32 %v4943_v61, %v2151_v30  ;;  %v2228_v45 = vadd.f32 %v4943_v61, %v2153_v28  ;;  %v2230_v3 = vadd.f32 %v4943_v61, %v2155_v8  ;;  %v2232_v63 = vadd.f32 %v4943_v61, %v2157_v55  ;;  %v5483_v28 = vld [vmem:[#allocation24_spill] sm:$0xff] }
 0x5a9   :  { %v2234_v12 = vadd.f32 %v4943_v61, %v2159_v10  ;;  %v2236_v51 = vadd.f32 %v4943_v61, %v2161_v50  ;;  %v2238_v25 = vadd.f32 %v4943_v61, %v2163_v49  ;;  %v2317_v40 = vmax.f32 %v2316_v62, %v5482_v11  ;;  %v5485_v49 = vld [vmem:[#allocation28_spill] sm:$0xff] }
 0x5aa   :  { %v2240_v13 = vadd.f32 %v4943_v61, %v2165_v33  ;;  %v2242_v39 = vadd.f32 %v4943_v61, %v2167_v22  ;;  %v2244_v5 = vmax.f32 %v2180_v36, %v2182_v7  ;;  %v2265_v30 = vmax.f32 %v2181_v57, %v2183_v32 }
 0x5ab   :  { %v2286_v53 = vmax.f32 %v2212_v23, %v2214_v52  ;;  %v2318_v2 = vmax.f32 %v2317_v40, %v5483_v28 }
 0x5ac   :  { %v2245_v8 = vmax.f32 %v2244_v5, %v2184_v18  ;;  %v2266_v35 = vmax.f32 %v2265_v30, %v2185_v21  ;;  %v5487_v52 = vld [vmem:[#allocation32_spill] sm:$0xff] }
 0x5ad   :  { %v2287_v55 = vmax.f32 %v2286_v53, %v2216_v4  ;;  %v2319_v10 = vmax.f32 %v2318_v2, %v5484_v17 }
 0x5ae   :  { %v2246_v24 = vmax.f32 %v2245_v8, %v2186_v43  ;;  %v2267_v50 = vmax.f32 %v2266_v35, %v2187_v37 }
 0x5af   :  { %v2288_v16 = vmax.f32 %v2287_v55, %v2218_v27  ;;  %v2320_v29 = vmax.f32 %v2319_v10, %v5485_v49  ;;  %v5488_v27 = vld [vmem:[#allocation34_spill] sm:$0xff] }
 0x5b0   :  { %v2247_v62 = vmax.f32 %v2246_v24, %v2188_v0  ;;  %v2268_v11 = vmax.f32 %v2267_v50, %v2189_v42 }
 0x5b1   :  { %v2289_v33 = vmax.f32 %v2288_v16, %v2220_v14  ;;  %v2321_v61 = vmax.f32 %v2320_v29, %v5486_v6 }
 0x5b2   :  { %v2248_v22 = vmax.f32 %v2247_v62, %v5075_v54  ;;  %v2269_v36 = vmax.f32 %v2268_v11, %v5079_v58 }
 0x5b3   :  { %v2290_v57 = vmax.f32 %v2289_v33, %v2222_v47  ;;  %v2322_v43 = vrot.slane %v2321_v61, 4  ;;  %v5489_v47 = vld [vmem:[#allocation36_spill] sm:$0xff] }
 0x5b4   :  { %v2249_v7 = vmax.f32 %v2248_v22, %v2192_v15  ;;  %v2270_v32 = vmax.f32 %v2269_v36, %v2193_v46 }
 0x5b5   :  { %v2291_v18 = vmax.f32 %v2290_v57, %v2224_v59  ;;  %v2323_v54 = vmax.f32 %v2321_v61, %v2322_v43  ;;  %v5490_v59 = vld [vmem:[#allocation38_spill] sm:$0xff] }
 0x5b6   :  { %v2250_v21 = vmax.f32 %v2249_v7, %v5087_v1  ;;  %v2271_v37 = vmax.f32 %v2270_v32, %v5091_v38 }
 0x5b7   :  { %v2292_v17 = vmax.f32 %v2291_v18, %v2226_v60  ;;  %v2324_v38 = vrot.slane %v2323_v54, 2 }
 0x5b8   :  { %v2251_v0 = vmax.f32 %v2250_v21, %v5095_v26  ;;  %v2272_v42 = vmax.f32 %v2271_v37, %v5099_v31 }
 0x5b9   :  { %v2293_v16 = vmax.f32 %v2292_v17, %v2228_v45  ;;  %v5491_v45 = vld [vmem:[#allocation40_spill] sm:$0xff] }
 0x5ba   :  { %v2252_v6 = vmax.f32 %v2251_v0, %v5104_v9  ;;  %v2273_v58 = vmax.f32 %v2272_v42, %v5108_v19  ;;  %v2325_v19 = vmax.f32 %v2323_v54, %v2324_v38  ;;  %v3221_v38 = vld [vmem:[%s5300_s5 + $0x28] sm:$0xff]  }
 0x5bb   :  { %v2294_v29 = vmax.f32 %v2293_v16, %v2230_v3 }
 0x5bc   :  { %v2253_v15 = vmax.f32 %v2252_v6, %v5112_v20  ;;  %v2274_v46 = vmax.f32 %v2273_v58, %v5116_v56  ;;  %v3216_v58 = vld [vmem:[%s5300_s5] sm:$0xff]  }
 0x5bd   :  { %v2295_v1 = vmax.f32 %v2294_v29, %v2232_v63  ;;  %v5492_v63 = vld [vmem:[#allocation42_spill] sm:$0xff]  ;;  %v3246_v29 = vmov 0.0  }
 0x5be   :  { %v2254_v24 = vmax.f32 %v2253_v15, %v5120_v44  ;;  %v2275_v35 = vmax.f32 %v2274_v46, %v5124_v34  ;;  %v2326_v34 = vrot.slane %v2325_v19, 1  ;;  %3065 = vmatprep.subr.bf16.mxu0 %v3246_v29  ;;  %v3217_v15 = vld [vmem:[%s5300_s5 + $0x8] sm:$0xff]   ;;  %v3218_v46 = vld [vmem:[%s5300_s5 + $0x10] sm:$0xff]  }
 0x5bf   :  { %v2296_v26 = vmax.f32 %v2295_v1, %v2234_v12  ;;  %v3219_v1 = vld [vmem:[%s5300_s5 + $0x18] sm:$0xff]  }
 0x5c0   :  { %v2255_v31 = vmax.f32 %v2254_v24, %v5127_v41  ;;  %v2276_v23 = vmax.f32 %v2275_v35, %v5131_v48  ;;  %v2327_v28 = vmax.f32 %v2325_v19, %v2326_v34  ;;  %v3220_v24 = vld [vmem:[%s5300_s5 + $0x20] sm:$0xff]   ;;  %v3222_v35 = vld [vmem:[%s5300_s5 + $0x30] sm:$0xff]  }
 0x5c1   :  { %v2297_v9 = vmax.f32 %v2296_v26, %v2236_v51  ;;  %v3223_v26 = vld [vmem:[%s5300_s5 + $0x38] sm:$0xff]  }
 0x5c2   :  { %v2256_v4 = vmax.f32 %v2255_v31, %v5487_v52  ;;  %v2277_v14 = vmax.f32 %v2276_v23, %v5488_v27 }
 0x5c3   :  { %v2298_v20 = vmax.f32 %v2297_v9, %v2238_v25 }
 0x5c4   :  { %v2257_v56 = vmax.f32 %v2256_v4, %v5489_v47  ;;  %v2278_v60 = vmax.f32 %v2277_v14, %v5490_v59 }
 0x5c5   :  { %v2299_v44 = vmax.f32 %v2298_v20, %v2240_v13  ;;  %v2331_v13 = vmax.f32 %v2327_v28, 0.0 }
 0x5c6   :  { %v2258_v3 = vmax.f32 %v2257_v56, %v5491_v45  ;;  %v2279_v12 = vmax.f32 %v2278_v60, %v5492_v63 }
 0x5c7   :  { %v2300_v41 = vmax.f32 %v2299_v44, %v2242_v39  ;;  %v2335_v22 = vpack.c.bf16 %v2331_v13, %v2331_v13 }
 0x5c8   :  { %v2259_v40 = vrot.slane %v2258_v3, 4  ;;  %v2280_v48 = vrot.slane %v2279_v12, 4 }
 0x5c9   :  { %v2301_v51 = vrot.slane %v2300_v41, 4  ;;  %v2375_v43 = vunpack.c.l.b16 %v2335_v22 }
 0x5ca   :  { %v2260_v5 = vmax.f32 %v2258_v3, %v2259_v40  ;;  %v2281_v30 = vmax.f32 %v2279_v12, %v2280_v48 }
 0x5cb   :  { %v2302_v53 = vmax.f32 %v2300_v41, %v2301_v51 }
 0x5cc   :  { %v2261_v2 = vrot.slane %v2260_v5, 2  ;;  %v2282_v25 = vrot.slane %v2281_v30, 2 }
 0x5cd   :  { %v2303_v8 = vrot.slane %v2302_v53, 2 }
 0x5ce   :  { %v2262_v55 = vmax.f32 %v2260_v5, %v2261_v2  ;;  %v2283_v10 = vmax.f32 %v2281_v30, %v2282_v25  ;;  %v2538_v30 = vld [vmem:[%s5297_s7 + $0x6] ss:$0 sm:$0xff]  ;;  %v2539_v2 = vld [vmem:[%s5297_s7 + $0x7] ss:$0 sm:$0xff] }
 0x5cf   :  { %v2304_v50 = vmax.f32 %v2302_v53, %v2303_v8 }
 0x5d0   :  { %v2263_v49 = vrot.slane %v2262_v55, 1  ;;  %v2284_v11 = vrot.slane %v2283_v10, 1 }
 0x5d1   :  { %v2305_v62 = vrot.slane %v2304_v50, 1 }
 0x5d2   :  { %v2264_v33 = vmax.f32 %v2262_v55, %v2263_v49  ;;  %v2285_v39 = vmax.f32 %v2283_v10, %v2284_v11  ;;  %v3224_v49 = vld [vmem:[%s5301_s6] sm:$0xff]   ;;  %v3226_v11 = vld [vmem:[%s5301_s6 + $0x10] sm:$0xff]  }
 0x5d3   :  { %v2306_v61 = vmax.f32 %v2304_v50, %v2305_v62  ;;  %v3225_v62 = vld [vmem:[%s5301_s6 + $0x8] sm:$0xff]  }
 0x5d4   :  { %v2328_v36 = vmax.f32 %v2264_v33, 0.0  ;;  %v2329_v7 = vmax.f32 %v2285_v39, 0.0  ;;  %v3227_v33 = vld [vmem:[%s5301_s6 + $0x18] sm:$0xff]  }
 0x5d5   :  { %v2330_v57 = vmax.f32 %v2306_v61, 0.0 }
 0x5d6   :  { %v2332_v32 = vpack.c.bf16 %v2328_v36, %v2328_v36  ;;  %v2333_v18 = vpack.c.bf16 %v2329_v7, %v2329_v7 }
 0x5d7   :  { %v2334_v21 = vpack.c.bf16 %v2330_v57, %v2330_v57 }
 0x5d8   :  { %v2372_v37 = vunpack.c.l.b16 %v2332_v32  ;;  %v2373_v17 = vunpack.c.l.b16 %v2333_v18 }
 0x5d9   :  { %v2374_v0 = vunpack.c.l.b16 %v2334_v21 }
 0x5da   :  { %v2378_v16 = vsel %vm2376_vm1, %v2375_v43, %v2373_v17 }
 0x5db   :  { %v2377_v42 = vsel %vm2376_vm1, %v2374_v0, %v2372_v37  ;;  %v2380_v54 = vpack.c.b16 %v2378_v16, %v2378_v16  ;;  %vm2893_vm1 = vcmask 99328  }
 0x5dc   :  { %v2379_v6 = vpack.c.b16 %v2377_v42, %v2377_v42 }
 0x5dd   :  { %2511 = vmatprep.mubr.bf16.mxu0 %v2380_v54 }
 0x5de   :  { %2512 = vmatmul.mubr.bf16.vlgmr.msra.gmra.mrb[32].mxu0 %v2379_v6 }
 0x5df   :  { %3066 = vmatpush3.bf16.msra.mxu0 %v3216_v58  ;;  %3081 = vmatprep.mubr.msk.bf16.mxu0 %vm3247_vm2, %v3246_v29 }
 0x5e0   :  { %3067 = vmatprep.subr.bf16.mxu0 %v3246_v29 }
 0x5e3   :  { %3068 = vmatpush3.bf16.msra.mxu0 %v3217_v15 }
 0x5e4   :  { %3069 = vmatprep.subr.bf16.mxu0 %v3246_v29 }
 0x5e7   :  { %3070 = vmatpush3.bf16.msra.mxu0 %v3218_v46 }
 0x5e8   :  { %3071 = vmatprep.subr.bf16.mxu0 %v3246_v29 }
 0x5eb   :  { %3072 = vmatpush3.bf16.msra.mxu0 %v3219_v1 }
 0x5ec   :  { %3073 = vmatprep.subr.bf16.mxu0 %v3246_v29 }
 0x5ef   :  { %3074 = vmatpush3.bf16.msra.mxu0 %v3220_v24 }
 0x5f0   :  { %3075 = vmatprep.subr.bf16.mxu0 %v3246_v29 }
 0x5f3   :  { %3076 = vmatpush3.bf16.msra.mxu0 %v3221_v38  ;;  %v2672_v38 = vld [vmem:[%s5297_s7 + $0x10] ss:$0 sm:$0xff] }
 0x5f4   :  { %3077 = vmatprep.subr.bf16.mxu0 %v3246_v29 }
 0x5f7   :  { %3078 = vmatpush3.bf16.msra.mxu0 %v3222_v35 }
 0x5f8   :  { %3079 = vmatprep.subr.bf16.mxu0 %v3246_v29 }
 0x5fb   :  { %3080 = vmatpush3.bf16.msra.mxu0 %v3223_v26 }
 0x5fc   :  { %3085 = vmatprep.subr.bf16.mxu0 %v3246_v29 }
 0x6b1   :  { %v3005_v31 = vpop.f32.mrb[32].mxu0 }
 0x6b2   :  { %v3006_v23 = vpop.f32.mrb[33].mxu0 }
 0x6b3   :  { %v3007_v9 = vadd.f32 %v3006_v23, %v3005_v31  ;;  %v3008_v52 = vpop.f32.mrb[34].mxu0  ;;  %v2673_v31 = vld [vmem:[%s5297_s7 + $0x11] ss:$0 sm:$0xff] }
 0x6b4   :  { %v3009_v4 = vpop.f32.mrb[35].mxu0 }
 0x6b5   :  { %v2520_v19 = vsel %vm2519_vm3, %v3007_v9, 0.0 }
 0x6b6   :  { %v2521_v27 = vrot.slane %v2520_v19, 4 }
 0x6b8   :  { %v2522_v14 = vadd.f32 %v2521_v27, %v2520_v19 }
 0x6ba   :  { %v2523_v20 = vrot.slane %v2522_v14, 2 }
 0x6bc   :  { %v2524_v47 = vadd.f32 %v2523_v20, %v2522_v14  ;;  %v2691_v14 = vld [vmem:[%s5297_s7 + $0x12] ss:$0 sm:$0xff]  ;;  %s3252_s7 = smov 1  }
 0x6be   :  { %v2525_v56 = vrot.slane %v2524_v47, 1 }
 0x6c0   :  { %v2526_v59 = vadd.f32 %v2525_v56, %v2524_v47 }
 0x6c2   :  { %v2527_v60 = vmul.f32 0.5, %v2526_v59 }
 0x6c4   :  { %v2528_v44 = vsub.f32 %v3007_v9, %v2527_v60 }
 0x6c6   :  { %v2529_v45 = vmul.f32 %v2528_v44, %v2528_v44 }
 0x6c8   :  { %v2530_v3 = vsel %vm2519_vm3, %v2529_v45, 0.0 }
 0x6c9   :  { %v2531_v34 = vrot.slane %v2530_v3, 4 }
 0x6cb   :  { %v2532_v63 = vadd.f32 %v2531_v34, %v2530_v3 }
 0x6cd   :  { %v2533_v12 = vrot.slane %v2532_v63, 2 }
 0x6cf   :  { %v2534_v41 = vadd.f32 %v2533_v12, %v2532_v63 }
 0x6d1   :  { %v2535_v40 = vrot.slane %v2534_v41, 1 }
 0x6d3   :  { %v2536_v48 = vadd.f32 %v2535_v40, %v2534_v41 }
 0x6d5   :  { %v2537_v51 = vmul.f32 0.5, %v2536_v48 }
 0x6d7   :  { %v2540_v5 = vadd.f32 1e-05, %v2537_v51 }
 0x6d9   :  { %3236 = vrsqrt.f32 %v2540_v5 }
 0x6e3   :  { %v3237_v53 = vpop.eup %3236 }
 0x6e4   :  { %v2542_v28 = vmul.f32 %v3237_v53, %v2538_v30 }
 0x6e6   :  { %v2543_v25 = vmul.f32 %v2542_v28, %v2527_v60  ;;  %v2545_v55 = vmul.f32 %v3007_v9, %v2542_v28 }
 0x6e8   :  { %v2544_v8 = vsub.f32 %v2539_v2, %v2543_v25 }
 0x6ea   :  { %v2546_v10 = vadd.f32 %v2545_v55, %v2544_v8 }
 0x6ec   :  { %v2547_v50 = vmax.f32 %v2546_v10, 0.0 }
 0x6ee   :  { %v2548_v13 = vpack.c.bf16 %v2547_v50, %v2547_v50 }
 0x6f0   :  { %3082 = vmatmul.mubr.bf16.vlgmr.msra.gmra.mrb[36].mxu0 %v2548_v13 }
 0x6f1   :  { %3093 = vmatprep.mubr.msk.bf16.mxu0 %vm3247_vm2, %v3246_v29  ;;  %3086 = vmatpush3.bf16.msra.mxu0 %v3224_v49 }
 0x6f2   :  { %3087 = vmatprep.subr.bf16.mxu0 %v3246_v29 }
 0x6f5   :  { %3088 = vmatpush3.bf16.msra.mxu0 %v3225_v62 }
 0x6f6   :  { %3089 = vmatprep.subr.bf16.mxu0 %v3246_v29 }
 0x6f9   :  { %3090 = vmatpush3.bf16.msra.mxu0 %v3226_v11 }
 0x6fa   :  { %3091 = vmatprep.subr.bf16.mxu0 %v3246_v29 }
 0x6fd   :  { %3092 = vmatpush3.bf16.msra.mxu0 %v3227_v33 }
 0x7c3   :  { %v2647_v61 = vpop.f32.mrb[36].mxu0 }
 0x7c4   :  { %v2654_v39 = vsel %vm2653_vm4, %v2647_v61, 0.0  ;;  %v3083_v22 = vpop.f32.mrb[37].mxu0 }
 0x7c5   :  { %v2655_v36 = vrot.slane %v2654_v39, 4  ;;  %v2650_v57 = vpop.f32.mrb[38].mxu0 }
 0x7c6   :  { %v3084_v7 = vpop.f32.mrb[39].mxu0 }
 0x7c7   :  { %v2656_v32 = vadd.f32 %v2655_v36, %v2654_v39 }
 0x7c9   :  { %v2657_v18 = vrot.slane %v2656_v32, 2 }
 0x7cb   :  { %v2658_v21 = vadd.f32 %v2657_v18, %v2656_v32 }
 0x7cd   :  { %v2659_v43 = vrot.slane %v2658_v21, 1 }
 0x7cf   :  { %v2660_v37 = vadd.f32 %v2659_v43, %v2658_v21 }
 0x7d1   :  { %v2661_v17 = vmul.f32 0.5, %v2660_v37 }
 0x7d3   :  { %v2662_v0 = vsub.f32 %v2647_v61, %v2661_v17 }
 0x7d5   :  { %v2663_v42 = vmul.f32 %v2662_v0, %v2662_v0 }
 0x7d7   :  { %v2664_v16 = vsel %vm2653_vm4, %v2663_v42, 0.0 }
 0x7d8   :  { %v2665_v6 = vrot.slane %v2664_v16, 4 }
 0x7da   :  { %v2666_v54 = vadd.f32 %v2665_v6, %v2664_v16 }
 0x7dc   :  { %v2667_v58 = vrot.slane %v2666_v54, 2 }
 0x7de   :  { %v2668_v29 = vadd.f32 %v2667_v58, %v2666_v54 }
 0x7e0   :  { %v2669_v15 = vrot.slane %v2668_v29, 1 }
 0x7e2   :  { %v2670_v46 = vadd.f32 %v2669_v15, %v2668_v29 }
 0x7e4   :  { %v2671_v1 = vmul.f32 0.5, %v2670_v46 }
 0x7e6   :  { %v2674_v24 = vadd.f32 1e-05, %v2671_v1 }
 0x7e8   :  { %3238 = vrsqrt.f32 %v2674_v24 }
 0x7f2   :  { %v3239_v35 = vpop.eup %3238 }
 0x7f3   :  { %v2676_v26 = vmul.f32 %v3239_v35, %v2672_v38 }
 0x7f5   :  { %v2677_v23 = vmul.f32 %v2676_v26, %v2661_v17  ;;  %v2679_v52 = vmul.f32 %v2676_v26, %v2647_v61 }
 0x7f7   :  { %v2678_v9 = vsub.f32 %v2673_v31, %v2677_v23 }
 0x7f9   :  { %v2680_v4 = vadd.f32 %v2679_v52, %v2678_v9 }
 0x7fb   :  { %v2681_v19 = vmax.f32 %v2680_v4, 0.0 }
 0x7fd   :  { %v2682_v27 = vpack.c.bf16 %v2681_v19, %v2681_v19 }
 0x7ff   :  { %3094 = vmatmul.mubr.msk.bf16.vlgmr.msra.gmra.mrb[40].mxu0 %vm653_vm0, %v2682_v27  ;;  %vm2891_vm0 = vcmask 97280  }
 0x8d2   :  { %v2753_v20 = vpop.f32.mrb[40].mxu0 }
 0x8d3   :  { %v5262_v47 = vadd.f32 %v2753_v20, %v2691_v14  ;;  %v3095_v56 = vpop.f32.mrb[41].mxu0 }
 0x8d4   :  { %v2756_v59 = vpop.f32.mrb[42].mxu0 }
 0x8d5   :  { %v3096_v60 = vpop.f32.mrb[43].mxu0  ;;  %v2759_v44 = vmul.f32 %v5262_v47, %v5262_v47 }
 0x8d7   :  { %2765 = vrot.lane.b32.xlu0 %v2759_v44, %s3248_s17  ;;  %2761 = vrot.lane.b32.xlu1 %v2759_v44, %s3249_s18 }
 0x8db   :  { %2803 = vrot.lane.b32.xlu0 %v5262_v47, %s3250_s19  ;;  %2769 = vrot.lane.b32.xlu1 %v2759_v44, %s3251_s20 }
 0x8df   :  { %2818 = vrot.lane.b32.xlu0 %v5262_v47, %s3252_s7  ;;  %2786 = vrot.lane.b32.xlu1 %v5262_v47, %s3253_s21 }
 0x8e3   :  { %2799 = vrot.lane.b32.xlu1 %v5262_v47, %s3248_s17 }
 0x8e7   :  { %2782 = vrot.lane.b32.xlu1 %v5262_v47, %s3249_s18 }
 0x949   :  { %v2766_v45 = vpop.permute.xlu0 %2765  ;;  %v2762_v3 = vpop.permute.xlu1 %2761 }
 0x94a   :  { %v2764_v34 = vadd.f32 %v2762_v3, %v2759_v44  ;;  %v2815_v57 = vadd.f32 %v2766_v45, %v2759_v44 }
 0x94c   :  { %v2768_v63 = vadd.f32 %v2766_v45, %v2764_v34 }
 0x94d   :  { %v2804_v12 = vpop.permute.xlu0 %2803  ;;  %v2770_v41 = vpop.permute.xlu1 %2769 }
 0x94e   :  { %v2806_v40 = vmul.f32 %v2804_v12, %v5262_v47  ;;  %v2772_v48 = vadd.f32 %v2770_v41, %v2768_v63 }
 0x950   :  { %3240 = vrcp.f32 %v2772_v48  ;;  %2808 = vrot.lane.b32.xlu0 %v2806_v40, %s3249_s18 }
 0x951   :  { %v2787_v51 = vpop.permute.xlu1 %2786  ;;  %v2819_v30 = vpop.permute.xlu0 %2818 }
 0x952   :  { %v2789_v5 = vmul.f32 %v2787_v51, %v5262_v47  ;;  %v2821_v53 = vmul.f32 %v2819_v30, %v5262_v47 }
 0x954   :  { %2791 = vrot.lane.b32.xlu1 %v2789_v5, %s3248_s17 }
 0x955   :  { %v2800_v25 = vpop.permute.xlu1 %2799 }
 0x956   :  { %v2802_v62 = vmul.f32 %v2800_v25, %v5262_v47 }
 0x958   :  { %2823 = vrot.lane.b32.xlu1 %v2821_v53, %s3252_s7 }
 0x959   :  { %v2783_v8 = vpop.permute.xlu1 %2782 }
 0x95a   :  { %v3241_v28 = vpop.eup %3240  ;;  %v2785_v55 = vmul.f32 %v2783_v8, %v5262_v47 }
 0x95b   :  { %v2774_v2 = vmul.f32 2.0, %v3241_v28 }
 0x95d   :  { %2776 = vrot.lane.b32.xlu0 %v2774_v2, %s3250_s19 }
 0x961   :  { %2795 = vrot.lane.b32.xlu0 %v2774_v2, %s3252_s7 }
 0x9c2   :  { %v2809_v13 = vpop.permute.xlu0 %2808 }
 0x9c3   :  { %v2811_v11 = vadd.f32 %v2809_v13, %v2802_v62  ;;  %v2828_v7 = vsub.f32 %v2802_v62, %v2809_v13 }
 0x9c6   :  { %v2792_v10 = vpop.permute.xlu1 %2791 }
 0x9c7   :  { %v2794_v50 = vsub.f32 %v2785_v55, %v2792_v10  ;;  %v2813_v33 = vadd.f32 %v2792_v10, %v2785_v55 }
 0x9ca   :  { %v2824_v61 = vpop.permute.xlu1 %2823 }
 0x9cb   :  { %v2826_v32 = vsub.f32 %v2785_v55, %v2824_v61  ;;  %v2830_v16 = vadd.f32 %v2824_v61, %v2785_v55 }
 0x9cf   :  { %v2777_v49 = vpop.permute.xlu0 %2776 }
 0x9d0   :  { %v2779_v18 = vmul.f32 %v2777_v49, %v2764_v34  ;;  %v2827_v21 = vmul.f32 %v2826_v32, %v2777_v49  ;;  %v2831_v6 = vmul.f32 %v2830_v16, %v2777_v49 }
 0x9d2   :  { %v2780_v0 = vsub.f32 1.0, %v2779_v18 }
 0x9d3   :  { %v2796_v39 = vpop.permute.xlu0 %2795 }
 0x9d4   :  { %v2812_v22 = vmul.f32 %v2811_v11, %v2796_v39  ;;  %v2814_v36 = vmul.f32 %v2813_v33, %v2796_v39  ;;  %v2829_v43 = vmul.f32 %v2828_v7, %v2796_v39  ;;  %v2816_v37 = vmul.f32 %v2815_v57, %v2796_v39 }
 0x9d5   :  { %v2832_v42 = vmul.f32 %v2796_v39, %v2764_v34  ;;  %v2798_v1 = vmul.f32 %v2796_v39, %v2794_v50 }
 0x9d6   :  { %2839 = vrot.lane.b32.xlu1 %v2812_v22, %s3252_s7  ;;  %2843 = vrot.lane.b32.xlu0 %v2814_v36, %s3250_s19  ;;  %v2817_v17 = vsub.f32 1.0, %v2816_v37 }
 0x9d7   :  { %v2833_v54 = vsub.f32 1.0, %v2832_v42 }
 0x9da   :  { %2855 = vrot.lane.b32.xlu1 %v2829_v43, %s3254_s22  ;;  %2851 = vrot.lane.b32.xlu0 %v2827_v21, %s3253_s21 }
 0x9de   :  { %2847 = vrot.lane.b32.xlu1 %v2817_v17, %s3253_s21  ;;  %2835 = vrot.lane.b32.xlu0 %v2780_v0, %s3248_s17 }
 0x9e2   :  { %2863 = vrot.lane.b32.xlu1 %v2833_v54, %s3255_s23  ;;  %2859 = vrot.lane.b32.xlu0 %v2831_v6, %s3254_s22 }
 0x9e6   :  { %2866 = vrot.lane.b32.xlu0 %v5262_v47, %s3256_s24 }
 0xa48   :  { %v2844_v58 = vpop.permute.xlu0 %2843  ;;  %v2840_v29 = vpop.permute.xlu1 %2839 }
 0xa4c   :  { %v2852_v15 = vpop.permute.xlu0 %2851  ;;  %v2856_v46 = vpop.permute.xlu1 %2855 }
 0xa50   :  { %v2836_v24 = vpop.permute.xlu0 %2835  ;;  %v2848_v35 = vpop.permute.xlu1 %2847 }
 0xa51   :  { %v2870_v38 = vsel %vm2869_vm5, %v2836_v24, %v2798_v1 }
 0xa52   :  { %v2872_v26 = vsel %vm2871_vm6, %v2870_v38, %v2840_v29 }
 0xa53   :  { %v2874_v31 = vsel %vm2873_vm7, %v2872_v26, %v2844_v58 }
 0xa54   :  { %v2876_v23 = vsel %vm2875_vm8, %v2874_v31, %v2848_v35  ;;  %v2860_v9 = vpop.permute.xlu0 %2859  ;;  %v2864_v27 = vpop.permute.xlu1 %2863 }
 0xa55   :  { %v2878_v52 = vsel %vm2877_vm9, %v2876_v23, %v2852_v15 }
 0xa56   :  { %v2880_v4 = vsel %vm2879_vm10, %v2878_v52, %v2856_v46 }
 0xa57   :  { %v2882_v19 = vsel %vm2881_vm11, %v2880_v4, %v2860_v9 }
 0xa58   :  { %v2884_v14 = vsel %vm2883_vm12, %v2882_v19, %v2864_v27  ;;  %v2867_v20 = vpop.permute.xlu0 %2866 }
 0xa59   :  { %v2886_v47 = vsel %vm2885_vm13, %v2884_v14, %v2867_v20 }
 0xa5a   :  { %v2888_v56 = vsel %vm2887_vm14, %v2886_v47, %v2867_v20 }
 0xa5b   :  { %v2890_v59 = vsel %vm2889_vm15, %v2888_v56, %v2867_v20 }
 0xa5c   :  { %v2892_v60 = vsel %vm2891_vm0, %v2890_v59, %v2867_v20 }
 0xa5d   :  { %2894 = vst.msk [vmem:[%s5302_s8] sm:$0x3] %vm2893_vm1, %v2892_v60 }

</bundles_post_ra>
